<compile_context>
chip_gen: v7x
topology: tpu7x:2x2x1
jax: 0.10.0
libtpu: 0.0.40
codegen_flags: <defaults>
</compile_context>

<pallas_src>
import jax
import jax.numpy as jnp
from jax import lax
from jax.experimental import pallas as pl
from jax.experimental.pallas import tpu as pltpu

BN_EPS = 1e-5
FC_PAD = 128  # pad the final Linear to a full 128-lane output slab


# ----------------------------------------------------------------------------
# Shared math helpers (pure functions on values): used both inside the Pallas
# kernel body and by the bit-matched XLA twin reference, so the two paths are
# twins by construction.
# ----------------------------------------------------------------------------
def _bn_relu_fold(y, gamma, beta):
    """Training-mode BatchNorm folded to one scale/shift, then ReLU.

    y: (L, C) f32 bias-free conv output; gamma/beta: (1, C) f32.
    var is clamped at 0 to guard against catastrophic cancellation in the
    single-pass E[y^2] - mean^2 form.
    """
    mean = jnp.mean(y, axis=0, keepdims=True)
    var = jnp.maximum(jnp.mean(y * y, axis=0, keepdims=True) - mean * mean, 0.0)
    scale = gamma * lax.rsqrt(var + BN_EPS)
    shift = beta - mean * scale
    return jnp.maximum(y * scale + shift, 0.0)


def _lstm_step(g, c, H):
    """One LSTM cell update; gate pre-activations come in (i, f, o | g) order."""
    sg = jax.nn.sigmoid(g[:, : 3 * H])
    i, f, o = sg[:, :H], sg[:, H:2 * H], sg[:, 2 * H:]
    gg = jnp.tanh(g[:, 3 * H:])
    c_new = f * c + i * gg
    return o * jnp.tanh(c_new), c_new


def _conv_bn_relu(h_bf, w_stk, gamma, beta):
    """One Conv1d(k=3, p=1) + BN(train) + ReLU layer along the flattened L axis.

    h_bf: (L, C_in) bf16.  w_stk: (3*C_in, C_out) bf16 with the 3 taps stacked
    along K so the whole layer is a single (drain-bound) MXU matmul.  The two
    shifted tap operands are register-level shifted copies of h_bf with a zero
    boundary row (k=3 conv with zero padding across the whole L axis, exactly
    like the PyTorch reference which convolves across batch boundaries).
    """
    L, C = h_bf.shape
    z = jnp.zeros((1, C), h_bf.dtype)
    left = jnp.concatenate([z, h_bf[:L - 1, :]], axis=0)   # x[i-1], row0 = 0
    right = jnp.concatenate([h_bf[1:, :], z], axis=0)      # x[i+1], rowL-1 = 0
    a = jnp.concatenate([left, h_bf, right], axis=1)       # (L, 3*C_in)
    y = jnp.dot(a, w_stk, preferred_element_type=jnp.float32)
    return _bn_relu_fold(y, gamma, beta)


def _forward_math(x_bf, conv_ops, wih0, b0, whh0_get, w1s_get, b1, fcw, fcb,
                  B, S, H):
    """Whole forward on values: conv chain -> LSTM(2) -> FC.

    Returns (L, FC_PAD) f32 with rows in batch-major order (row = b*S + t).
    whh0_get / w1s_get are zero-arg getters so the Pallas kernel re-reads the
    recurrence weights through their refs at each use (no vreg pinning).
    """
    # Conv -> BN(train) -> ReLU chain over the flattened L = B*S rows.
    h = x_bf
    for (w_stk, gamma, beta) in conv_ops:
        h = _conv_bn_relu(h.astype(jnp.bfloat16), w_stk, gamma, beta)
    h_bf = h.astype(jnp.bfloat16)

    # LSTM layer-0 input projection hoisted out of the recurrence: one
    # (L, C_last) x (C_last, 4H) matmul (bias folded in here).
    g0 = jnp.dot(h_bf, wih0, preferred_element_type=jnp.float32) + b0  # (L,4H)

    z = jnp.zeros((B, H), jnp.float32)
    h0 = c0 = h1 = c1 = z
    hs = []
    # Statically unrolled time loop: S is small and fixed, so the scheduler
    # gets cross-step visibility over the tiny matmuls / EUP transcendentals.
    for t in range(S):
        # Gather the B rows of g0 for time step t (batch-major rows b*S + t).
        g_t = jnp.concatenate(
            [g0[b * S + t: b * S + t + 1, :] for b in range(B)], axis=0)
        gates0 = g_t + jnp.dot(h0.astype(jnp.bfloat16), whh0_get(),
                               preferred_element_type=jnp.float32)
        h0, c0 = _lstm_step(gates0, c0, H)
        # Layer-1: the two per-step matmuls fused into one via stacked weights.
        z1 = jnp.concatenate([h0, h1], axis=1).astype(jnp.bfloat16)  # (B, 2H)
        gates1 = jnp.dot(z1, w1s_get(),
                         preferred_element_type=jnp.float32) + b1
        h1, c1 = _lstm_step(gates1, c1, H)
        hs.append(h1)

    # Reorder the per-step hidden states to batch-major (row b*S + t) entirely
    # in registers, then one (L, H) x (H, FC_PAD) matmul for the Linear and a
    # single unmasked lane-dense output.
    h_all = jnp.concatenate(
        [hs[t][b: b + 1, :] for b in range(B) for t in range(S)], axis=0)
    y = jnp.dot(h_all.astype(jnp.bfloat16), fcw,
                preferred_element_type=jnp.float32) + fcb
    return y


# ----------------------------------------------------------------------------
# Parameter prep shared by the Pallas path and the bf16 XLA twin.
# ----------------------------------------------------------------------------
def _prep_conv_operands(conv_params):
    ops = []
    for (w, _b, gamma, beta) in conv_params:
        c_out, _c_in, _k = w.shape
        # (C_out, C_in, 3) -> taps stacked along K: (3*C_in, C_out) bf16, so
        # each conv layer is one MXU matmul.  Conv bias `_b` is intentionally
        # dropped: training-mode BN subtracts the per-channel batch mean, so
        # the bias cancels exactly.
        w_stk = jnp.concatenate([w[:, :, k].T for k in range(3)], axis=0)
        ops.append((w_stk.astype(jnp.bfloat16),
                    gamma.reshape(1, c_out).astype(jnp.float32),
                    beta.reshape(1, c_out).astype(jnp.float32)))
    return ops


def _permute_gate_rows(m, H):
    # PyTorch LSTM gate order (i, f, g, o) -> (i, f, o, g): sigmoid gates first.
    return jnp.concatenate([m[: 2 * H], m[3 * H:], m[2 * H: 3 * H]], axis=0)


def _prep_lstm_operands(lstm_params, fc_w, fc_b):
    (wih0, whh0, bih0, bhh0), (wih1, whh1, bih1, bhh1) = lstm_params
    H = whh0.shape[1]
    wih0_t = _permute_gate_rows(wih0, H).T.astype(jnp.bfloat16)    # (C_last,4H)
    whh0_t = _permute_gate_rows(whh0, H).T.astype(jnp.bfloat16)    # (H, 4H)
    b0 = _permute_gate_rows(bih0 + bhh0, H).reshape(1, 4 * H).astype(jnp.float32)
    # Layer-1: stack [Wih1; Whh1] so the per-step layer-1 update is one matmul.
    w1s = jnp.concatenate(
        [_permute_gate_rows(wih1, H).T, _permute_gate_rows(whh1, H).T],
        axis=0).astype(jnp.bfloat16)                               # (2H, 4H)
    b1 = _permute_gate_rows(bih1 + bhh1, H).reshape(1, 4 * H).astype(jnp.float32)
    # Pad the FC to a 128-lane output slab: unmasked store, MXU-aligned N.
    dim_out = fc_w.shape[0]
    assert dim_out <= FC_PAD
    fcw = jnp.zeros((H, FC_PAD), jnp.float32).at[:, :dim_out].set(fc_w.T)
    fcb = jnp.zeros((1, FC_PAD), jnp.float32).at[:, :dim_out].set(fc_b)
    return wih0_t, b0, whh0_t, w1s, b1, fcw.astype(jnp.bfloat16), fcb


# ----------------------------------------------------------------------------
# The single fused kernel.
# ----------------------------------------------------------------------------
def _make_fused_kernel(num_conv, B, S, H):
    def kernel(*refs):
        x_ref = refs[0]
        conv_refs = refs[1: 1 + 3 * num_conv]
        (wih0_ref, b0_ref, whh0_ref, w1s_ref, b1_ref,
         fcw_ref, fcb_ref, out_ref) = refs[1 + 3 * num_conv:]

        conv_ops = [(conv_refs[3 * j][...],
                     conv_refs[3 * j + 1][...],
                     conv_refs[3 * j + 2][...]) for j in range(num_conv)]

        y = _forward_math(
            x_ref[...], conv_ops, wih0_ref[...], b0_ref[...],
            lambda: whh0_ref[...],   # re-read per step (no vreg pinning)
            lambda: w1s_ref[...],
            b1_ref[...], fcw_ref[...], fcb_ref[...], B, S, H)
        out_ref[...] = y             # one unmasked (L, 128) f32 store

    return kernel


# ----------------------------------------------------------------------------
# Full forward.
# ----------------------------------------------------------------------------
@jax.jit
def convlstm_forward(x, params):
    B, S, dim_in = x.shape
    L = B * S
    assert len(params["lstm"]) == 2

    conv_ops = _prep_conv_operands(params["conv"])
    wih0_t, b0, whh0_t, w1s, b1, fcw, fcb = _prep_lstm_operands(
        params["lstm"], params["fc_w"], params["fc_b"])
    H = whh0_t.shape[0]
    dim_out = params["fc_w"].shape[0]
    num_conv = len(conv_ops)

    # torch: x.view(dim_in, batch*seq); lane-dense (L, C_in) layout, bf16 once.
    x_rows = x.reshape(dim_in, L).T.astype(jnp.bfloat16)

    args = [x_rows]
    for (w_stk, gamma, beta) in conv_ops:
        args += [w_stk, gamma, beta]
    args += [wih0_t, b0, whh0_t, w1s, b1, fcw, fcb]

    vmem_spec = pl.BlockSpec(memory_space=pltpu.MemorySpace.VMEM)

    # Single fused launch; everything (weights ~1 MiB + activations a few KiB)
    # fits VMEM on every generation (v5e/v6e/v7x).
    # TODO(synk): for large batch*seq, tile the conv stage over L with a grid
    # (two-pass BN statistics), size the tile against v7x's 64 MiB physical /
    # 32 MiB scoped VMEM with bf16 activation tiles, and mark the L axis
    # "parallel" so both v7x TensorCores are used.
    y_flat = pl.pallas_call(
        _make_fused_kernel(num_conv, B, S, H),
        out_shape=jax.ShapeDtypeStruct((L, FC_PAD), jnp.float32),
        in_specs=[vmem_spec] * len(args),
        out_specs=vmem_spec,
        compiler_params=pltpu.CompilerParams(
            vmem_limit_bytes=32 * 1024 * 1024),
    )(*args)

    # Rows are already batch-major (b*S + s): free reshape + column slice.
    return y_flat.reshape(B, S, FC_PAD)[:, :, :dim_out]


# ----------------------------------------------------------------------------
# Pure-JAX references.
# ----------------------------------------------------------------------------
def reference_bf16(x, params):
    """XLA twin of the Pallas path (identical prepared operands and math)."""
    B, S, dim_in = x.shape
    L = B * S
    conv_ops = _prep_conv_operands(params["conv"])
    wih0_t, b0, whh0_t, w1s, b1, fcw, fcb = _prep_lstm_operands(
        params["lstm"], params["fc_w"], params["fc_b"])
    H = whh0_t.shape[0]
    dim_out = params["fc_w"].shape[0]
    x_rows = x.reshape(dim_in, L).T.astype(jnp.bfloat16)
    y = _forward_math(x_rows, conv_ops, wih0_t, b0,
                      lambda: whh0_t, lambda: w1s, b1, fcw, fcb, B, S, H)
    return y.reshape(B, S, FC_PAD)[:, :, :dim_out]


def reference_f32(x, params):
    """Faithful f32 re-implementation of the PyTorch forward (conv bias kept,
    two-pass BN statistics, standard LSTM gate order)."""
    B, S, dim_in = x.shape
    L = B * S
    h = x.reshape(dim_in, L)
    for (w, b, gamma, beta) in params["conv"]:
        y = lax.conv_general_dilated(
            h[None], w, window_strides=(1,), padding=((1, 1),),
            dimension_numbers=("NCH", "OIH", "NCH"))[0] + b[:, None]
        mean = jnp.mean(y, axis=1, keepdims=True)
        var = jnp.mean((y - mean) ** 2, axis=1, keepdims=True)
        y = gamma[:, None] * (y - mean) * lax.rsqrt(var + BN_EPS) + beta[:, None]
        h = jnp.maximum(y, 0.0)
    seq = h.T.reshape(B, S, -1)
    for (wih, whh, bih, bhh) in params["lstm"]:
        H = whh.shape[1]

        def step(carry, x_t):
            hh, cc = carry
            g = x_t @ wih.T + bih + hh @ whh.T + bhh
            i = jax.nn.sigmoid(g[:, :H])
            f = jax.nn.sigmoid(g[:, H:2 * H])
            gg = jnp.tanh(g[:, 2 * H:3 * H])
            o = jax.nn.sigmoid(g[:, 3 * H:])
            cc = f * cc + i * gg
            hh = o * jnp.tanh(cc)
            return (hh, cc), hh

        init = (jnp.zeros((B, H), jnp.float32), jnp.zeros((B, H), jnp.float32))
        _, hs = lax.scan(step, init, jnp.transpose(seq, (1, 0, 2)))
        seq = jnp.transpose(hs, (1, 0, 2))
    return seq @ params["fc_w"].T + params["fc_b"]


# ----------------------------------------------------------------------------
# Deterministic parameter init (shapes follow ConvLSTMNet.__init__).
# ----------------------------------------------------------------------------
def init_params(key, dim_in, dim_out, layer_dims, hidden, num_layers):
    keys = iter(jax.random.split(key, 64))
    conv = []
    c_in = dim_in
    for c_out in layer_dims:
        w = 0.2 * jax.random.normal(next(keys), (c_out, c_in, 3), jnp.float32)
        b = 0.1 * jax.random.normal(next(keys), (c_out,), jnp.float32)
        gamma = 1.0 + 0.1 * jax.random.normal(next(keys), (c_out,), jnp.float32)
        beta = 0.1 * jax.random.normal(next(keys), (c_out,), jnp.float32)
        conv.append((w, b, gamma, beta))
        c_in = c_out
    lstm = []
    in_sz = layer_dims[-1]
    s = 1.0 / jnp.sqrt(jnp.float32(hidden))
    for l in range(num_layers):
        isz = in_sz if l == 0 else hidden
        wih = s * jax.random.normal(next(keys), (4 * hidden, isz), jnp.float32)
        whh = s * jax.random.normal(next(keys), (4 * hidden, hidden), jnp.float32)
        bih = s * jax.random.normal(next(keys), (4 * hidden,), jnp.float32)
        bhh = s * jax.random.normal(next(keys), (4 * hidden,), jnp.float32)
        lstm.append((wih, whh, bih, bhh))
    fc_w = 0.1 * jax.random.normal(next(keys), (dim_out, hidden), jnp.float32)
    fc_b = 0.1 * jax.random.normal(next(keys), (dim_out,), jnp.float32)
    return {"conv": conv, "lstm": lstm, "fc_w": fc_w, "fc_b": fc_b}


if __name__ == "__main__":
    # Small shapes consistent with the module defaults.
    batch, seq, dim_in, dim_out = 2, 8, 4, 3
    layer_dims = [512, 256, 128, 64]
    lstm_hidden, lstm_layers = 64, 2

    key = jax.random.PRNGKey(0)
    k_x, k_p = jax.random.split(key)
    x = jax.random.normal(k_x, (batch, seq, dim_in), jnp.float32)
    params = init_params(k_p, dim_in, dim_out, layer_dims, lstm_hidden,
                         lstm_layers)

    out = jax.block_until_ready(convlstm_forward(x, params))
    assert out.shape == (batch, seq, dim_out), out.shape
    assert bool(jnp.all(jnp.isfinite(out)))

    # Tight check vs. the XLA twin (identical bf16 MXU operands and folding).
    ref16 = jax.block_until_ready(jax.jit(reference_bf16)(x, params))
    assert jnp.allclose(out, ref16, rtol=1e-2, atol=1e-2), (
        float(jnp.max(jnp.abs(out - ref16))))

    # Loose sanity check vs. the faithful f32 PyTorch-semantics forward
    # (bf16 MXU operands introduce small end-to-end deviations).
    ref32 = jax.block_until_ready(jax.jit(reference_f32)(x, params))
    assert jnp.allclose(out, ref32, rtol=1.5e-1, atol=1.5e-1), (
        float(jnp.max(jnp.abs(out - ref32))))

    print("KERNEL_OK")
</pallas_src>

<mosaic_0001>
module attributes {stable_mosaic.version = 11 : i64} {
  func.func @kernel(%arg0: memref<16x4xbf16, #tpu.memory_space<vmem>>, %arg1: memref<12x512xbf16, #tpu.memory_space<vmem>>, %arg2: memref<1x512xf32, #tpu.memory_space<vmem>>, %arg3: memref<1x512xf32, #tpu.memory_space<vmem>>, %arg4: memref<1536x256xbf16, #tpu.memory_space<vmem>>, %arg5: memref<1x256xf32, #tpu.memory_space<vmem>>, %arg6: memref<1x256xf32, #tpu.memory_space<vmem>>, %arg7: memref<768x128xbf16, #tpu.memory_space<vmem>>, %arg8: memref<1x128xf32, #tpu.memory_space<vmem>>, %arg9: memref<1x128xf32, #tpu.memory_space<vmem>>, %arg10: memref<384x64xbf16, #tpu.memory_space<vmem>>, %arg11: memref<1x64xf32, #tpu.memory_space<vmem>>, %arg12: memref<1x64xf32, #tpu.memory_space<vmem>>, %arg13: memref<64x256xbf16, #tpu.memory_space<vmem>>, %arg14: memref<1x256xf32, #tpu.memory_space<vmem>>, %arg15: memref<64x256xbf16, #tpu.memory_space<vmem>>, %arg16: memref<128x256xbf16, #tpu.memory_space<vmem>>, %arg17: memref<1x256xf32, #tpu.memory_space<vmem>>, %arg18: memref<64x128xbf16, #tpu.memory_space<vmem>>, %arg19: memref<1x128xf32, #tpu.memory_space<vmem>>, %arg20: memref<16x128xf32, #tpu.memory_space<vmem>>) attributes {dimension_semantics = [], scalar_prefetch = 0 : i64, scratch_operands = 0 : i64, tpu.core_type = #tpu.core_type<tc>} {
    %c0 = arith.constant 0 : index
    %c0_0 = arith.constant 0 : index
    %0 = vector.load %arg1[%c0, %c0_0] : memref<12x512xbf16, #tpu.memory_space<vmem>>, vector<12x512xbf16>
    %c0_1 = arith.constant 0 : index
    %c0_2 = arith.constant 0 : index
    %1 = vector.load %arg2[%c0_1, %c0_2] : memref<1x512xf32, #tpu.memory_space<vmem>>, vector<1x512xf32>
    %c0_3 = arith.constant 0 : index
    %c0_4 = arith.constant 0 : index
    %2 = vector.load %arg3[%c0_3, %c0_4] : memref<1x512xf32, #tpu.memory_space<vmem>>, vector<1x512xf32>
    %c0_5 = arith.constant 0 : index
    %c0_6 = arith.constant 0 : index
    %3 = vector.load %arg4[%c0_5, %c0_6] : memref<1536x256xbf16, #tpu.memory_space<vmem>>, vector<1536x256xbf16>
    %c0_7 = arith.constant 0 : index
    %c0_8 = arith.constant 0 : index
    %4 = vector.load %arg5[%c0_7, %c0_8] : memref<1x256xf32, #tpu.memory_space<vmem>>, vector<1x256xf32>
    %c0_9 = arith.constant 0 : index
    %c0_10 = arith.constant 0 : index
    %5 = vector.load %arg6[%c0_9, %c0_10] : memref<1x256xf32, #tpu.memory_space<vmem>>, vector<1x256xf32>
    %c0_11 = arith.constant 0 : index
    %c0_12 = arith.constant 0 : index
    %6 = vector.load %arg7[%c0_11, %c0_12] : memref<768x128xbf16, #tpu.memory_space<vmem>>, vector<768x128xbf16>
    %c0_13 = arith.constant 0 : index
    %c0_14 = arith.constant 0 : index
    %7 = vector.load %arg8[%c0_13, %c0_14] : memref<1x128xf32, #tpu.memory_space<vmem>>, vector<1x128xf32>
    %c0_15 = arith.constant 0 : index
    %c0_16 = arith.constant 0 : index
    %8 = vector.load %arg9[%c0_15, %c0_16] : memref<1x128xf32, #tpu.memory_space<vmem>>, vector<1x128xf32>
    %c0_17 = arith.constant 0 : index
    %c0_18 = arith.constant 0 : index
    %9 = vector.load %arg10[%c0_17, %c0_18] : memref<384x64xbf16, #tpu.memory_space<vmem>>, vector<384x64xbf16>
    %c0_19 = arith.constant 0 : index
    %c0_20 = arith.constant 0 : index
    %10 = vector.load %arg11[%c0_19, %c0_20] : memref<1x64xf32, #tpu.memory_space<vmem>>, vector<1x64xf32>
    %c0_21 = arith.constant 0 : index
    %c0_22 = arith.constant 0 : index
    %11 = vector.load %arg12[%c0_21, %c0_22] : memref<1x64xf32, #tpu.memory_space<vmem>>, vector<1x64xf32>
    %c0_23 = arith.constant 0 : index
    %c0_24 = arith.constant 0 : index
    %12 = vector.load %arg0[%c0_23, %c0_24] : memref<16x4xbf16, #tpu.memory_space<vmem>>, vector<16x4xbf16>
    %c0_25 = arith.constant 0 : index
    %c0_26 = arith.constant 0 : index
    %13 = vector.load %arg13[%c0_25, %c0_26] : memref<64x256xbf16, #tpu.memory_space<vmem>>, vector<64x256xbf16>
    %c0_27 = arith.constant 0 : index
    %c0_28 = arith.constant 0 : index
    %14 = vector.load %arg14[%c0_27, %c0_28] : memref<1x256xf32, #tpu.memory_space<vmem>>, vector<1x256xf32>
    %c0_29 = arith.constant 0 : index
    %c0_30 = arith.constant 0 : index
    %15 = vector.load %arg17[%c0_29, %c0_30] : memref<1x256xf32, #tpu.memory_space<vmem>>, vector<1x256xf32>
    %c0_31 = arith.constant 0 : index
    %c0_32 = arith.constant 0 : index
    %16 = vector.load %arg18[%c0_31, %c0_32] : memref<64x128xbf16, #tpu.memory_space<vmem>>, vector<64x128xbf16>
    %c0_33 = arith.constant 0 : index
    %c0_34 = arith.constant 0 : index
    %17 = vector.load %arg19[%c0_33, %c0_34] : memref<1x128xf32, #tpu.memory_space<vmem>>, vector<1x128xf32>
    %cst = arith.constant 0.000000e+00 : bf16
    %18 = vector.broadcast %cst : bf16 to vector<1x4xbf16>
    %19 = vector.extract_strided_slice %12 {offsets = [0, 0], sizes = [15, 4], strides = [1, 1]} : vector<16x4xbf16> to vector<15x4xbf16>
    %20 = tpu.concatenate %18, %19 in 0 : vector<1x4xbf16>, vector<15x4xbf16> -> vector<16x4xbf16>
    %21 = vector.extract_strided_slice %12 {offsets = [1, 0], sizes = [15, 4], strides = [1, 1]} : vector<16x4xbf16> to vector<15x4xbf16>
    %22 = tpu.concatenate %21, %18 in 0 : vector<15x4xbf16>, vector<1x4xbf16> -> vector<16x4xbf16>
    %23 = tpu.concatenate %20, %12, %22 in 1 : vector<16x4xbf16>, vector<16x4xbf16>, vector<16x4xbf16> -> vector<16x12xbf16>
    %cst_35 = arith.constant dense<0.000000e+00> : vector<16x512xf32>
    %24 = tpu.matmul %23, %0, %cst_35 {dimension_numbers = #tpu.dot_dimension_numbers<[1], [0], [0], [1], [0, 0, 1, 1], [], []>} : vector<16x12xbf16>, vector<12x512xbf16>, vector<16x512xf32> -> vector<16x512xf32>
    %cst_36 = arith.constant dense<0.000000e+00> : vector<512xf32>
    %25 = vector.multi_reduction <add>, %24, %cst_36 [0] : vector<16x512xf32> to vector<512xf32>
    %26 = vector.shape_cast %25 : vector<512xf32> to vector<1x512xf32>
    %cst_37 = arith.constant 1.600000e+01 : f32
    %27 = vector.broadcast %cst_37 : f32 to vector<1x512xf32>
    %28 = arith.divf %26, %27 : vector<1x512xf32>
    %29 = arith.mulf %24, %24 : vector<16x512xf32>
    %cst_38 = arith.constant dense<0.000000e+00> : vector<512xf32>
    %30 = vector.multi_reduction <add>, %29, %cst_38 [0] : vector<16x512xf32> to vector<512xf32>
    %31 = vector.shape_cast %30 : vector<512xf32> to vector<1x512xf32>
    %cst_39 = arith.constant 1.600000e+01 : f32
    %32 = vector.broadcast %cst_39 : f32 to vector<1x512xf32>
    %33 = arith.divf %31, %32 : vector<1x512xf32>
    %34 = arith.mulf %28, %28 : vector<1x512xf32>
    %35 = arith.subf %33, %34 : vector<1x512xf32>
    %cst_40 = arith.constant 0.000000e+00 : f32
    %36 = vector.broadcast %cst_40 : f32 to vector<1x512xf32>
    %37 = arith.maximumf %35, %36 : vector<1x512xf32>
    %cst_41 = arith.constant 9.99999974E-6 : f32
    %38 = vector.broadcast %cst_41 : f32 to vector<1x512xf32>
    %39 = arith.addf %37, %38 : vector<1x512xf32>
    %40 = math.rsqrt %39 : vector<1x512xf32>
    %41 = arith.mulf %1, %40 : vector<1x512xf32>
    %42 = arith.mulf %28, %41 : vector<1x512xf32>
    %43 = arith.subf %2, %42 : vector<1x512xf32>
    %44 = vector.broadcast %41 : vector<1x512xf32> to vector<16x512xf32>
    %45 = arith.mulf %24, %44 : vector<16x512xf32>
    %46 = vector.broadcast %43 : vector<1x512xf32> to vector<16x512xf32>
    %47 = arith.addf %45, %46 : vector<16x512xf32>
    %cst_42 = arith.constant 0.000000e+00 : f32
    %48 = vector.broadcast %cst_42 : f32 to vector<16x512xf32>
    %49 = arith.maximumf %47, %48 : vector<16x512xf32>
    %50 = arith.truncf %49 : vector<16x512xf32> to vector<16x512xbf16>
    %cst_43 = arith.constant 0.000000e+00 : bf16
    %51 = vector.broadcast %cst_43 : bf16 to vector<1x512xbf16>
    %52 = vector.extract_strided_slice %50 {offsets = [0, 0], sizes = [15, 512], strides = [1, 1]} : vector<16x512xbf16> to vector<15x512xbf16>
    %53 = tpu.concatenate %51, %52 in 0 : vector<1x512xbf16>, vector<15x512xbf16> -> vector<16x512xbf16>
    %54 = vector.extract_strided_slice %50 {offsets = [1, 0], sizes = [15, 512], strides = [1, 1]} : vector<16x512xbf16> to vector<15x512xbf16>
    %55 = tpu.concatenate %54, %51 in 0 : vector<15x512xbf16>, vector<1x512xbf16> -> vector<16x512xbf16>
    %56 = tpu.concatenate %53, %50, %55 in 1 : vector<16x512xbf16>, vector<16x512xbf16>, vector<16x512xbf16> -> vector<16x1536xbf16>
    %cst_44 = arith.constant dense<0.000000e+00> : vector<16x256xf32>
    %57 = tpu.matmul %56, %3, %cst_44 {dimension_numbers = #tpu.dot_dimension_numbers<[1], [0], [0], [1], [0, 0, 1, 1], [], []>} : vector<16x1536xbf16>, vector<1536x256xbf16>, vector<16x256xf32> -> vector<16x256xf32>
    %cst_45 = arith.constant dense<0.000000e+00> : vector<256xf32>
    %58 = vector.multi_reduction <add>, %57, %cst_45 [0] : vector<16x256xf32> to vector<256xf32>
    %59 = vector.shape_cast %58 : vector<256xf32> to vector<1x256xf32>
    %cst_46 = arith.constant 1.600000e+01 : f32
    %60 = vector.broadcast %cst_46 : f32 to vector<1x256xf32>
    %61 = arith.divf %59, %60 : vector<1x256xf32>
    %62 = arith.mulf %57, %57 : vector<16x256xf32>
    %cst_47 = arith.constant dense<0.000000e+00> : vector<256xf32>
    %63 = vector.multi_reduction <add>, %62, %cst_47 [0] : vector<16x256xf32> to vector<256xf32>
    %64 = vector.shape_cast %63 : vector<256xf32> to vector<1x256xf32>
    %cst_48 = arith.constant 1.600000e+01 : f32
    %65 = vector.broadcast %cst_48 : f32 to vector<1x256xf32>
    %66 = arith.divf %64, %65 : vector<1x256xf32>
    %67 = arith.mulf %61, %61 : vector<1x256xf32>
    %68 = arith.subf %66, %67 : vector<1x256xf32>
    %cst_49 = arith.constant 0.000000e+00 : f32
    %69 = vector.broadcast %cst_49 : f32 to vector<1x256xf32>
    %70 = arith.maximumf %68, %69 : vector<1x256xf32>
    %cst_50 = arith.constant 9.99999974E-6 : f32
    %71 = vector.broadcast %cst_50 : f32 to vector<1x256xf32>
    %72 = arith.addf %70, %71 : vector<1x256xf32>
    %73 = math.rsqrt %72 : vector<1x256xf32>
    %74 = arith.mulf %4, %73 : vector<1x256xf32>
    %75 = arith.mulf %61, %74 : vector<1x256xf32>
    %76 = arith.subf %5, %75 : vector<1x256xf32>
    %77 = vector.broadcast %74 : vector<1x256xf32> to vector<16x256xf32>
    %78 = arith.mulf %57, %77 : vector<16x256xf32>
    %79 = vector.broadcast %76 : vector<1x256xf32> to vector<16x256xf32>
    %80 = arith.addf %78, %79 : vector<16x256xf32>
    %cst_51 = arith.constant 0.000000e+00 : f32
    %81 = vector.broadcast %cst_51 : f32 to vector<16x256xf32>
    %82 = arith.maximumf %80, %81 : vector<16x256xf32>
    %83 = arith.truncf %82 : vector<16x256xf32> to vector<16x256xbf16>
    %cst_52 = arith.constant 0.000000e+00 : bf16
    %84 = vector.broadcast %cst_52 : bf16 to vector<1x256xbf16>
    %85 = vector.extract_strided_slice %83 {offsets = [0, 0], sizes = [15, 256], strides = [1, 1]} : vector<16x256xbf16> to vector<15x256xbf16>
    %86 = tpu.concatenate %84, %85 in 0 : vector<1x256xbf16>, vector<15x256xbf16> -> vector<16x256xbf16>
    %87 = vector.extract_strided_slice %83 {offsets = [1, 0], sizes = [15, 256], strides = [1, 1]} : vector<16x256xbf16> to vector<15x256xbf16>
    %88 = tpu.concatenate %87, %84 in 0 : vector<15x256xbf16>, vector<1x256xbf16> -> vector<16x256xbf16>
    %89 = tpu.concatenate %86, %83, %88 in 1 : vector<16x256xbf16>, vector<16x256xbf16>, vector<16x256xbf16> -> vector<16x768xbf16>
    %cst_53 = arith.constant dense<0.000000e+00> : vector<16x128xf32>
    %90 = tpu.matmul %89, %6, %cst_53 {dimension_numbers = #tpu.dot_dimension_numbers<[1], [0], [0], [1], [0, 0, 1, 1], [], []>} : vector<16x768xbf16>, vector<768x128xbf16>, vector<16x128xf32> -> vector<16x128xf32>
    %cst_54 = arith.constant dense<0.000000e+00> : vector<128xf32>
    %91 = vector.multi_reduction <add>, %90, %cst_54 [0] : vector<16x128xf32> to vector<128xf32>
    %92 = vector.shape_cast %91 : vector<128xf32> to vector<1x128xf32>
    %cst_55 = arith.constant 1.600000e+01 : f32
    %93 = vector.broadcast %cst_55 : f32 to vector<1x128xf32>
    %94 = arith.divf %92, %93 : vector<1x128xf32>
    %95 = arith.mulf %90, %90 : vector<16x128xf32>
    %cst_56 = arith.constant dense<0.000000e+00> : vector<128xf32>
    %96 = vector.multi_reduction <add>, %95, %cst_56 [0] : vector<16x128xf32> to vector<128xf32>
    %97 = vector.shape_cast %96 : vector<128xf32> to vector<1x128xf32>
    %cst_57 = arith.constant 1.600000e+01 : f32
    %98 = vector.broadcast %cst_57 : f32 to vector<1x128xf32>
    %99 = arith.divf %97, %98 : vector<1x128xf32>
    %100 = arith.mulf %94, %94 : vector<1x128xf32>
    %101 = arith.subf %99, %100 : vector<1x128xf32>
    %cst_58 = arith.constant 0.000000e+00 : f32
    %102 = vector.broadcast %cst_58 : f32 to vector<1x128xf32>
    %103 = arith.maximumf %101, %102 : vector<1x128xf32>
    %cst_59 = arith.constant 9.99999974E-6 : f32
    %104 = vector.broadcast %cst_59 : f32 to vector<1x128xf32>
    %105 = arith.addf %103, %104 : vector<1x128xf32>
    %106 = math.rsqrt %105 : vector<1x128xf32>
    %107 = arith.mulf %7, %106 : vector<1x128xf32>
    %108 = arith.mulf %94, %107 : vector<1x128xf32>
    %109 = arith.subf %8, %108 : vector<1x128xf32>
    %110 = vector.broadcast %107 : vector<1x128xf32> to vector<16x128xf32>
    %111 = arith.mulf %90, %110 : vector<16x128xf32>
    %112 = vector.broadcast %109 : vector<1x128xf32> to vector<16x128xf32>
    %113 = arith.addf %111, %112 : vector<16x128xf32>
    %cst_60 = arith.constant 0.000000e+00 : f32
    %114 = vector.broadcast %cst_60 : f32 to vector<16x128xf32>
    %115 = arith.maximumf %113, %114 : vector<16x128xf32>
    %116 = arith.truncf %115 : vector<16x128xf32> to vector<16x128xbf16>
    %cst_61 = arith.constant 0.000000e+00 : bf16
    %117 = vector.broadcast %cst_61 : bf16 to vector<1x128xbf16>
    %118 = vector.extract_strided_slice %116 {offsets = [0, 0], sizes = [15, 128], strides = [1, 1]} : vector<16x128xbf16> to vector<15x128xbf16>
    %119 = tpu.concatenate %117, %118 in 0 : vector<1x128xbf16>, vector<15x128xbf16> -> vector<16x128xbf16>
    %120 = vector.extract_strided_slice %116 {offsets = [1, 0], sizes = [15, 128], strides = [1, 1]} : vector<16x128xbf16> to vector<15x128xbf16>
    %121 = tpu.concatenate %120, %117 in 0 : vector<15x128xbf16>, vector<1x128xbf16> -> vector<16x128xbf16>
    %122 = tpu.concatenate %119, %116, %121 in 1 : vector<16x128xbf16>, vector<16x128xbf16>, vector<16x128xbf16> -> vector<16x384xbf16>
    %cst_62 = arith.constant dense<0.000000e+00> : vector<16x64xf32>
    %123 = tpu.matmul %122, %9, %cst_62 {dimension_numbers = #tpu.dot_dimension_numbers<[1], [0], [0], [1], [0, 0, 1, 1], [], []>} : vector<16x384xbf16>, vector<384x64xbf16>, vector<16x64xf32> -> vector<16x64xf32>
    %cst_63 = arith.constant dense<0.000000e+00> : vector<64xf32>
    %124 = vector.multi_reduction <add>, %123, %cst_63 [0] : vector<16x64xf32> to vector<64xf32>
    %125 = vector.shape_cast %124 : vector<64xf32> to vector<1x64xf32>
    %cst_64 = arith.constant 1.600000e+01 : f32
    %126 = vector.broadcast %cst_64 : f32 to vector<1x64xf32>
    %127 = arith.divf %125, %126 : vector<1x64xf32>
    %128 = arith.mulf %123, %123 : vector<16x64xf32>
    %cst_65 = arith.constant dense<0.000000e+00> : vector<64xf32>
    %129 = vector.multi_reduction <add>, %128, %cst_65 [0] : vector<16x64xf32> to vector<64xf32>
    %130 = vector.shape_cast %129 : vector<64xf32> to vector<1x64xf32>
    %cst_66 = arith.constant 1.600000e+01 : f32
    %131 = vector.broadcast %cst_66 : f32 to vector<1x64xf32>
    %132 = arith.divf %130, %131 : vector<1x64xf32>
    %133 = arith.mulf %127, %127 : vector<1x64xf32>
    %134 = arith.subf %132, %133 : vector<1x64xf32>
    %cst_67 = arith.constant 0.000000e+00 : f32
    %135 = vector.broadcast %cst_67 : f32 to vector<1x64xf32>
    %136 = arith.maximumf %134, %135 : vector<1x64xf32>
    %cst_68 = arith.constant 9.99999974E-6 : f32
    %137 = vector.broadcast %cst_68 : f32 to vector<1x64xf32>
    %138 = arith.addf %136, %137 : vector<1x64xf32>
    %139 = math.rsqrt %138 : vector<1x64xf32>
    %140 = arith.mulf %10, %139 : vector<1x64xf32>
    %141 = arith.mulf %127, %140 : vector<1x64xf32>
    %142 = arith.subf %11, %141 : vector<1x64xf32>
    %143 = vector.broadcast %140 : vector<1x64xf32> to vector<16x64xf32>
    %144 = arith.mulf %123, %143 : vector<16x64xf32>
    %145 = vector.broadcast %142 : vector<1x64xf32> to vector<16x64xf32>
    %146 = arith.addf %144, %145 : vector<16x64xf32>
    %cst_69 = arith.constant 0.000000e+00 : f32
    %147 = vector.broadcast %cst_69 : f32 to vector<16x64xf32>
    %148 = arith.maximumf %146, %147 : vector<16x64xf32>
    %149 = arith.truncf %148 : vector<16x64xf32> to vector<16x64xbf16>
    %cst_70 = arith.constant dense<0.000000e+00> : vector<16x256xf32>
    %150 = tpu.matmul %149, %13, %cst_70 {dimension_numbers = #tpu.dot_dimension_numbers<[1], [0], [0], [1], [0, 0, 1, 1], [], []>} : vector<16x64xbf16>, vector<64x256xbf16>, vector<16x256xf32> -> vector<16x256xf32>
    %151 = vector.broadcast %14 : vector<1x256xf32> to vector<16x256xf32>
    %152 = arith.addf %150, %151 : vector<16x256xf32>
    %cst_71 = arith.constant 0.000000e+00 : f32
    %153 = vector.broadcast %cst_71 : f32 to vector<2x64xf32>
    %154 = vector.extract_strided_slice %152 {offsets = [0, 0], sizes = [1, 256], strides = [1, 1]} : vector<16x256xf32> to vector<1x256xf32>
    %155 = vector.extract_strided_slice %152 {offsets = [8, 0], sizes = [1, 256], strides = [1, 1]} : vector<16x256xf32> to vector<1x256xf32>
    %156 = tpu.concatenate %154, %155 in 0 : vector<1x256xf32>, vector<1x256xf32> -> vector<2x256xf32>
    %157 = arith.truncf %153 : vector<2x64xf32> to vector<2x64xbf16>
    %c0_72 = arith.constant 0 : index
    %c0_73 = arith.constant 0 : index
    %158 = vector.load %arg15[%c0_72, %c0_73] : memref<64x256xbf16, #tpu.memory_space<vmem>>, vector<64x256xbf16>
    %cst_74 = arith.constant dense<0.000000e+00> : vector<2x256xf32>
    %159 = tpu.matmul %157, %158, %cst_74 {dimension_numbers = #tpu.dot_dimension_numbers<[1], [0], [0], [1], [0, 0, 1, 1], [], []>} : vector<2x64xbf16>, vector<64x256xbf16>, vector<2x256xf32> -> vector<2x256xf32>
    %160 = arith.addf %156, %159 : vector<2x256xf32>
    %161 = vector.extract_strided_slice %160 {offsets = [0, 0], sizes = [2, 192], strides = [1, 1]} : vector<2x256xf32> to vector<2x192xf32>
    %162 = arith.negf %161 : vector<2x192xf32>
    %163 = math.exp %162 : vector<2x192xf32>
    %cst_75 = arith.constant 1.000000e+00 : f32
    %164 = vector.broadcast %cst_75 : f32 to vector<2x192xf32>
    %165 = arith.addf %164, %163 : vector<2x192xf32>
    %166 = arith.divf %164, %165 : vector<2x192xf32>
    %167 = vector.extract_strided_slice %166 {offsets = [0, 0], sizes = [2, 64], strides = [1, 1]} : vector<2x192xf32> to vector<2x64xf32>
    %168 = vector.extract_strided_slice %166 {offsets = [0, 64], sizes = [2, 64], strides = [1, 1]} : vector<2x192xf32> to vector<2x64xf32>
    %169 = vector.extract_strided_slice %166 {offsets = [0, 128], sizes = [2, 64], strides = [1, 1]} : vector<2x192xf32> to vector<2x64xf32>
    %170 = vector.extract_strided_slice %160 {offsets = [0, 192], sizes = [2, 64], strides = [1, 1]} : vector<2x256xf32> to vector<2x64xf32>
    %171 = math.tanh %170 : vector<2x64xf32>
    %172 = arith.mulf %168, %153 : vector<2x64xf32>
    %173 = arith.mulf %167, %171 : vector<2x64xf32>
    %174 = arith.addf %172, %173 : vector<2x64xf32>
    %175 = math.tanh %174 : vector<2x64xf32>
    %176 = arith.mulf %169, %175 : vector<2x64xf32>
    %177 = tpu.concatenate %176, %153 in 1 : vector<2x64xf32>, vector<2x64xf32> -> vector<2x128xf32>
    %178 = arith.truncf %177 : vector<2x128xf32> to vector<2x128xbf16>
    %c0_76 = arith.constant 0 : index
    %c0_77 = arith.constant 0 : index
    %179 = vector.load %arg16[%c0_76, %c0_77] : memref<128x256xbf16, #tpu.memory_space<vmem>>, vector<128x256xbf16>
    %cst_78 = arith.constant dense<0.000000e+00> : vector<2x256xf32>
    %180 = tpu.matmul %178, %179, %cst_78 {dimension_numbers = #tpu.dot_dimension_numbers<[1], [0], [0], [1], [0, 0, 1, 1], [], []>} : vector<2x128xbf16>, vector<128x256xbf16>, vector<2x256xf32> -> vector<2x256xf32>
    %181 = vector.broadcast %15 : vector<1x256xf32> to vector<2x256xf32>
    %182 = arith.addf %180, %181 : vector<2x256xf32>
    %183 = vector.extract_strided_slice %182 {offsets = [0, 0], sizes = [2, 192], strides = [1, 1]} : vector<2x256xf32> to vector<2x192xf32>
    %184 = arith.negf %183 : vector<2x192xf32>
    %185 = math.exp %184 : vector<2x192xf32>
    %cst_79 = arith.constant 1.000000e+00 : f32
    %186 = vector.broadcast %cst_79 : f32 to vector<2x192xf32>
    %187 = arith.addf %186, %185 : vector<2x192xf32>
    %188 = arith.divf %186, %187 : vector<2x192xf32>
    %189 = vector.extract_strided_slice %188 {offsets = [0, 0], sizes = [2, 64], strides = [1, 1]} : vector<2x192xf32> to vector<2x64xf32>
    %190 = vector.extract_strided_slice %188 {offsets = [0, 64], sizes = [2, 64], strides = [1, 1]} : vector<2x192xf32> to vector<2x64xf32>
    %191 = vector.extract_strided_slice %188 {offsets = [0, 128], sizes = [2, 64], strides = [1, 1]} : vector<2x192xf32> to vector<2x64xf32>
    %192 = vector.extract_strided_slice %182 {offsets = [0, 192], sizes = [2, 64], strides = [1, 1]} : vector<2x256xf32> to vector<2x64xf32>
    %193 = math.tanh %192 : vector<2x64xf32>
    %194 = arith.mulf %190, %153 : vector<2x64xf32>
    %195 = arith.mulf %189, %193 : vector<2x64xf32>
    %196 = arith.addf %194, %195 : vector<2x64xf32>
    %197 = math.tanh %196 : vector<2x64xf32>
    %198 = arith.mulf %191, %197 : vector<2x64xf32>
    %199 = vector.extract_strided_slice %152 {offsets = [1, 0], sizes = [1, 256], strides = [1, 1]} : vector<16x256xf32> to vector<1x256xf32>
    %200 = vector.extract_strided_slice %152 {offsets = [9, 0], sizes = [1, 256], strides = [1, 1]} : vector<16x256xf32> to vector<1x256xf32>
    %201 = tpu.concatenate %199, %200 in 0 : vector<1x256xf32>, vector<1x256xf32> -> vector<2x256xf32>
    %202 = arith.truncf %176 : vector<2x64xf32> to vector<2x64xbf16>
    %c0_80 = arith.constant 0 : index
    %c0_81 = arith.constant 0 : index
    %203 = vector.load %arg15[%c0_80, %c0_81] : memref<64x256xbf16, #tpu.memory_space<vmem>>, vector<64x256xbf16>
    %cst_82 = arith.constant dense<0.000000e+00> : vector<2x256xf32>
    %204 = tpu.matmul %202, %203, %cst_82 {dimension_numbers = #tpu.dot_dimension_numbers<[1], [0], [0], [1], [0, 0, 1, 1], [], []>} : vector<2x64xbf16>, vector<64x256xbf16>, vector<2x256xf32> -> vector<2x256xf32>
    %205 = arith.addf %201, %204 : vector<2x256xf32>
    %206 = vector.extract_strided_slice %205 {offsets = [0, 0], sizes = [2, 192], strides = [1, 1]} : vector<2x256xf32> to vector<2x192xf32>
    %207 = arith.negf %206 : vector<2x192xf32>
    %208 = math.exp %207 : vector<2x192xf32>
    %cst_83 = arith.constant 1.000000e+00 : f32
    %209 = vector.broadcast %cst_83 : f32 to vector<2x192xf32>
    %210 = arith.addf %209, %208 : vector<2x192xf32>
    %211 = arith.divf %209, %210 : vector<2x192xf32>
    %212 = vector.extract_strided_slice %211 {offsets = [0, 0], sizes = [2, 64], strides = [1, 1]} : vector<2x192xf32> to vector<2x64xf32>
    %213 = vector.extract_strided_slice %211 {offsets = [0, 64], sizes = [2, 64], strides = [1, 1]} : vector<2x192xf32> to vector<2x64xf32>
    %214 = vector.extract_strided_slice %211 {offsets = [0, 128], sizes = [2, 64], strides = [1, 1]} : vector<2x192xf32> to vector<2x64xf32>
    %215 = vector.extract_strided_slice %205 {offsets = [0, 192], sizes = [2, 64], strides = [1, 1]} : vector<2x256xf32> to vector<2x64xf32>
    %216 = math.tanh %215 : vector<2x64xf32>
    %217 = arith.mulf %213, %174 : vector<2x64xf32>
    %218 = arith.mulf %212, %216 : vector<2x64xf32>
    %219 = arith.addf %217, %218 : vector<2x64xf32>
    %220 = math.tanh %219 : vector<2x64xf32>
    %221 = arith.mulf %214, %220 : vector<2x64xf32>
    %222 = tpu.concatenate %221, %198 in 1 : vector<2x64xf32>, vector<2x64xf32> -> vector<2x128xf32>
    %223 = arith.truncf %222 : vector<2x128xf32> to vector<2x128xbf16>
    %c0_84 = arith.constant 0 : index
    %c0_85 = arith.constant 0 : index
    %224 = vector.load %arg16[%c0_84, %c0_85] : memref<128x256xbf16, #tpu.memory_space<vmem>>, vector<128x256xbf16>
    %cst_86 = arith.constant dense<0.000000e+00> : vector<2x256xf32>
    %225 = tpu.matmul %223, %224, %cst_86 {dimension_numbers = #tpu.dot_dimension_numbers<[1], [0], [0], [1], [0, 0, 1, 1], [], []>} : vector<2x128xbf16>, vector<128x256xbf16>, vector<2x256xf32> -> vector<2x256xf32>
    %226 = vector.broadcast %15 : vector<1x256xf32> to vector<2x256xf32>
    %227 = arith.addf %225, %226 : vector<2x256xf32>
    %228 = vector.extract_strided_slice %227 {offsets = [0, 0], sizes = [2, 192], strides = [1, 1]} : vector<2x256xf32> to vector<2x192xf32>
    %229 = arith.negf %228 : vector<2x192xf32>
    %230 = math.exp %229 : vector<2x192xf32>
    %cst_87 = arith.constant 1.000000e+00 : f32
    %231 = vector.broadcast %cst_87 : f32 to vector<2x192xf32>
    %232 = arith.addf %231, %230 : vector<2x192xf32>
    %233 = arith.divf %231, %232 : vector<2x192xf32>
    %234 = vector.extract_strided_slice %233 {offsets = [0, 0], sizes = [2, 64], strides = [1, 1]} : vector<2x192xf32> to vector<2x64xf32>
    %235 = vector.extract_strided_slice %233 {offsets = [0, 64], sizes = [2, 64], strides = [1, 1]} : vector<2x192xf32> to vector<2x64xf32>
    %236 = vector.extract_strided_slice %233 {offsets = [0, 128], sizes = [2, 64], strides = [1, 1]} : vector<2x192xf32> to vector<2x64xf32>
    %237 = vector.extract_strided_slice %227 {offsets = [0, 192], sizes = [2, 64], strides = [1, 1]} : vector<2x256xf32> to vector<2x64xf32>
    %238 = math.tanh %237 : vector<2x64xf32>
    %239 = arith.mulf %235, %196 : vector<2x64xf32>
    %240 = arith.mulf %234, %238 : vector<2x64xf32>
    %241 = arith.addf %239, %240 : vector<2x64xf32>
    %242 = math.tanh %241 : vector<2x64xf32>
    %243 = arith.mulf %236, %242 : vector<2x64xf32>
    %244 = vector.extract_strided_slice %152 {offsets = [2, 0], sizes = [1, 256], strides = [1, 1]} : vector<16x256xf32> to vector<1x256xf32>
    %245 = vector.extract_strided_slice %152 {offsets = [10, 0], sizes = [1, 256], strides = [1, 1]} : vector<16x256xf32> to vector<1x256xf32>
    %246 = tpu.concatenate %244, %245 in 0 : vector<1x256xf32>, vector<1x256xf32> -> vector<2x256xf32>
    %247 = arith.truncf %221 : vector<2x64xf32> to vector<2x64xbf16>
    %c0_88 = arith.constant 0 : index
    %c0_89 = arith.constant 0 : index
    %248 = vector.load %arg15[%c0_88, %c0_89] : memref<64x256xbf16, #tpu.memory_space<vmem>>, vector<64x256xbf16>
    %cst_90 = arith.constant dense<0.000000e+00> : vector<2x256xf32>
    %249 = tpu.matmul %247, %248, %cst_90 {dimension_numbers = #tpu.dot_dimension_numbers<[1], [0], [0], [1], [0, 0, 1, 1], [], []>} : vector<2x64xbf16>, vector<64x256xbf16>, vector<2x256xf32> -> vector<2x256xf32>
    %250 = arith.addf %246, %249 : vector<2x256xf32>
    %251 = vector.extract_strided_slice %250 {offsets = [0, 0], sizes = [2, 192], strides = [1, 1]} : vector<2x256xf32> to vector<2x192xf32>
    %252 = arith.negf %251 : vector<2x192xf32>
    %253 = math.exp %252 : vector<2x192xf32>
    %cst_91 = arith.constant 1.000000e+00 : f32
    %254 = vector.broadcast %cst_91 : f32 to vector<2x192xf32>
    %255 = arith.addf %254, %253 : vector<2x192xf32>
    %256 = arith.divf %254, %255 : vector<2x192xf32>
    %257 = vector.extract_strided_slice %256 {offsets = [0, 0], sizes = [2, 64], strides = [1, 1]} : vector<2x192xf32> to vector<2x64xf32>
    %258 = vector.extract_strided_slice %256 {offsets = [0, 64], sizes = [2, 64], strides = [1, 1]} : vector<2x192xf32> to vector<2x64xf32>
    %259 = vector.extract_strided_slice %256 {offsets = [0, 128], sizes = [2, 64], strides = [1, 1]} : vector<2x192xf32> to vector<2x64xf32>
    %260 = vector.extract_strided_slice %250 {offsets = [0, 192], sizes = [2, 64], strides = [1, 1]} : vector<2x256xf32> to vector<2x64xf32>
    %261 = math.tanh %260 : vector<2x64xf32>
    %262 = arith.mulf %258, %219 : vector<2x64xf32>
    %263 = arith.mulf %257, %261 : vector<2x64xf32>
    %264 = arith.addf %262, %263 : vector<2x64xf32>
    %265 = math.tanh %264 : vector<2x64xf32>
    %266 = arith.mulf %259, %265 : vector<2x64xf32>
    %267 = tpu.concatenate %266, %243 in 1 : vector<2x64xf32>, vector<2x64xf32> -> vector<2x128xf32>
    %268 = arith.truncf %267 : vector<2x128xf32> to vector<2x128xbf16>
    %c0_92 = arith.constant 0 : index
    %c0_93 = arith.constant 0 : index
    %269 = vector.load %arg16[%c0_92, %c0_93] : memref<128x256xbf16, #tpu.memory_space<vmem>>, vector<128x256xbf16>
    %cst_94 = arith.constant dense<0.000000e+00> : vector<2x256xf32>
    %270 = tpu.matmul %268, %269, %cst_94 {dimension_numbers = #tpu.dot_dimension_numbers<[1], [0], [0], [1], [0, 0, 1, 1], [], []>} : vector<2x128xbf16>, vector<128x256xbf16>, vector<2x256xf32> -> vector<2x256xf32>
    %271 = vector.broadcast %15 : vector<1x256xf32> to vector<2x256xf32>
    %272 = arith.addf %270, %271 : vector<2x256xf32>
    %273 = vector.extract_strided_slice %272 {offsets = [0, 0], sizes = [2, 192], strides = [1, 1]} : vector<2x256xf32> to vector<2x192xf32>
    %274 = arith.negf %273 : vector<2x192xf32>
    %275 = math.exp %274 : vector<2x192xf32>
    %cst_95 = arith.constant 1.000000e+00 : f32
    %276 = vector.broadcast %cst_95 : f32 to vector<2x192xf32>
    %277 = arith.addf %276, %275 : vector<2x192xf32>
    %278 = arith.divf %276, %277 : vector<2x192xf32>
    %279 = vector.extract_strided_slice %278 {offsets = [0, 0], sizes = [2, 64], strides = [1, 1]} : vector<2x192xf32> to vector<2x64xf32>
    %280 = vector.extract_strided_slice %278 {offsets = [0, 64], sizes = [2, 64], strides = [1, 1]} : vector<2x192xf32> to vector<2x64xf32>
    %281 = vector.extract_strided_slice %278 {offsets = [0, 128], sizes = [2, 64], strides = [1, 1]} : vector<2x192xf32> to vector<2x64xf32>
    %282 = vector.extract_strided_slice %272 {offsets = [0, 192], sizes = [2, 64], strides = [1, 1]} : vector<2x256xf32> to vector<2x64xf32>
    %283 = math.tanh %282 : vector<2x64xf32>
    %284 = arith.mulf %280, %241 : vector<2x64xf32>
    %285 = arith.mulf %279, %283 : vector<2x64xf32>
    %286 = arith.addf %284, %285 : vector<2x64xf32>
    %287 = math.tanh %286 : vector<2x64xf32>
    %288 = arith.mulf %281, %287 : vector<2x64xf32>
    %289 = vector.extract_strided_slice %152 {offsets = [3, 0], sizes = [1, 256], strides = [1, 1]} : vector<16x256xf32> to vector<1x256xf32>
    %290 = vector.extract_strided_slice %152 {offsets = [11, 0], sizes = [1, 256], strides = [1, 1]} : vector<16x256xf32> to vector<1x256xf32>
    %291 = tpu.concatenate %289, %290 in 0 : vector<1x256xf32>, vector<1x256xf32> -> vector<2x256xf32>
    %292 = arith.truncf %266 : vector<2x64xf32> to vector<2x64xbf16>
    %c0_96 = arith.constant 0 : index
    %c0_97 = arith.constant 0 : index
    %293 = vector.load %arg15[%c0_96, %c0_97] : memref<64x256xbf16, #tpu.memory_space<vmem>>, vector<64x256xbf16>
    %cst_98 = arith.constant dense<0.000000e+00> : vector<2x256xf32>
    %294 = tpu.matmul %292, %293, %cst_98 {dimension_numbers = #tpu.dot_dimension_numbers<[1], [0], [0], [1], [0, 0, 1, 1], [], []>} : vector<2x64xbf16>, vector<64x256xbf16>, vector<2x256xf32> -> vector<2x256xf32>
    %295 = arith.addf %291, %294 : vector<2x256xf32>
    %296 = vector.extract_strided_slice %295 {offsets = [0, 0], sizes = [2, 192], strides = [1, 1]} : vector<2x256xf32> to vector<2x192xf32>
    %297 = arith.negf %296 : vector<2x192xf32>
    %298 = math.exp %297 : vector<2x192xf32>
    %cst_99 = arith.constant 1.000000e+00 : f32
    %299 = vector.broadcast %cst_99 : f32 to vector<2x192xf32>
    %300 = arith.addf %299, %298 : vector<2x192xf32>
    %301 = arith.divf %299, %300 : vector<2x192xf32>
    %302 = vector.extract_strided_slice %301 {offsets = [0, 0], sizes = [2, 64], strides = [1, 1]} : vector<2x192xf32> to vector<2x64xf32>
    %303 = vector.extract_strided_slice %301 {offsets = [0, 64], sizes = [2, 64], strides = [1, 1]} : vector<2x192xf32> to vector<2x64xf32>
    %304 = vector.extract_strided_slice %301 {offsets = [0, 128], sizes = [2, 64], strides = [1, 1]} : vector<2x192xf32> to vector<2x64xf32>
    %305 = vector.extract_strided_slice %295 {offsets = [0, 192], sizes = [2, 64], strides = [1, 1]} : vector<2x256xf32> to vector<2x64xf32>
    %306 = math.tanh %305 : vector<2x64xf32>
    %307 = arith.mulf %303, %264 : vector<2x64xf32>
    %308 = arith.mulf %302, %306 : vector<2x64xf32>
    %309 = arith.addf %307, %308 : vector<2x64xf32>
    %310 = math.tanh %309 : vector<2x64xf32>
    %311 = arith.mulf %304, %310 : vector<2x64xf32>
    %312 = tpu.concatenate %311, %288 in 1 : vector<2x64xf32>, vector<2x64xf32> -> vector<2x128xf32>
    %313 = arith.truncf %312 : vector<2x128xf32> to vector<2x128xbf16>
    %c0_100 = arith.constant 0 : index
    %c0_101 = arith.constant 0 : index
    %314 = vector.load %arg16[%c0_100, %c0_101] : memref<128x256xbf16, #tpu.memory_space<vmem>>, vector<128x256xbf16>
    %cst_102 = arith.constant dense<0.000000e+00> : vector<2x256xf32>
    %315 = tpu.matmul %313, %314, %cst_102 {dimension_numbers = #tpu.dot_dimension_numbers<[1], [0], [0], [1], [0, 0, 1, 1], [], []>} : vector<2x128xbf16>, vector<128x256xbf16>, vector<2x256xf32> -> vector<2x256xf32>
    %316 = vector.broadcast %15 : vector<1x256xf32> to vector<2x256xf32>
    %317 = arith.addf %315, %316 : vector<2x256xf32>
    %318 = vector.extract_strided_slice %317 {offsets = [0, 0], sizes = [2, 192], strides = [1, 1]} : vector<2x256xf32> to vector<2x192xf32>
    %319 = arith.negf %318 : vector<2x192xf32>
    %320 = math.exp %319 : vector<2x192xf32>
    %cst_103 = arith.constant 1.000000e+00 : f32
    %321 = vector.broadcast %cst_103 : f32 to vector<2x192xf32>
    %322 = arith.addf %321, %320 : vector<2x192xf32>
    %323 = arith.divf %321, %322 : vector<2x192xf32>
    %324 = vector.extract_strided_slice %323 {offsets = [0, 0], sizes = [2, 64], strides = [1, 1]} : vector<2x192xf32> to vector<2x64xf32>
    %325 = vector.extract_strided_slice %323 {offsets = [0, 64], sizes = [2, 64], strides = [1, 1]} : vector<2x192xf32> to vector<2x64xf32>
    %326 = vector.extract_strided_slice %323 {offsets = [0, 128], sizes = [2, 64], strides = [1, 1]} : vector<2x192xf32> to vector<2x64xf32>
    %327 = vector.extract_strided_slice %317 {offsets = [0, 192], sizes = [2, 64], strides = [1, 1]} : vector<2x256xf32> to vector<2x64xf32>
    %328 = math.tanh %327 : vector<2x64xf32>
    %329 = arith.mulf %325, %286 : vector<2x64xf32>
    %330 = arith.mulf %324, %328 : vector<2x64xf32>
    %331 = arith.addf %329, %330 : vector<2x64xf32>
    %332 = math.tanh %331 : vector<2x64xf32>
    %333 = arith.mulf %326, %332 : vector<2x64xf32>
    %334 = vector.extract_strided_slice %152 {offsets = [4, 0], sizes = [1, 256], strides = [1, 1]} : vector<16x256xf32> to vector<1x256xf32>
    %335 = vector.extract_strided_slice %152 {offsets = [12, 0], sizes = [1, 256], strides = [1, 1]} : vector<16x256xf32> to vector<1x256xf32>
    %336 = tpu.concatenate %334, %335 in 0 : vector<1x256xf32>, vector<1x256xf32> -> vector<2x256xf32>
    %337 = arith.truncf %311 : vector<2x64xf32> to vector<2x64xbf16>
    %c0_104 = arith.constant 0 : index
    %c0_105 = arith.constant 0 : index
    %338 = vector.load %arg15[%c0_104, %c0_105] : memref<64x256xbf16, #tpu.memory_space<vmem>>, vector<64x256xbf16>
    %cst_106 = arith.constant dense<0.000000e+00> : vector<2x256xf32>
    %339 = tpu.matmul %337, %338, %cst_106 {dimension_numbers = #tpu.dot_dimension_numbers<[1], [0], [0], [1], [0, 0, 1, 1], [], []>} : vector<2x64xbf16>, vector<64x256xbf16>, vector<2x256xf32> -> vector<2x256xf32>
    %340 = arith.addf %336, %339 : vector<2x256xf32>
    %341 = vector.extract_strided_slice %340 {offsets = [0, 0], sizes = [2, 192], strides = [1, 1]} : vector<2x256xf32> to vector<2x192xf32>
    %342 = arith.negf %341 : vector<2x192xf32>
    %343 = math.exp %342 : vector<2x192xf32>
    %cst_107 = arith.constant 1.000000e+00 : f32
    %344 = vector.broadcast %cst_107 : f32 to vector<2x192xf32>
    %345 = arith.addf %344, %343 : vector<2x192xf32>
    %346 = arith.divf %344, %345 : vector<2x192xf32>
    %347 = vector.extract_strided_slice %346 {offsets = [0, 0], sizes = [2, 64], strides = [1, 1]} : vector<2x192xf32> to vector<2x64xf32>
    %348 = vector.extract_strided_slice %346 {offsets = [0, 64], sizes = [2, 64], strides = [1, 1]} : vector<2x192xf32> to vector<2x64xf32>
    %349 = vector.extract_strided_slice %346 {offsets = [0, 128], sizes = [2, 64], strides = [1, 1]} : vector<2x192xf32> to vector<2x64xf32>
    %350 = vector.extract_strided_slice %340 {offsets = [0, 192], sizes = [2, 64], strides = [1, 1]} : vector<2x256xf32> to vector<2x64xf32>
    %351 = math.tanh %350 : vector<2x64xf32>
    %352 = arith.mulf %348, %309 : vector<2x64xf32>
    %353 = arith.mulf %347, %351 : vector<2x64xf32>
    %354 = arith.addf %352, %353 : vector<2x64xf32>
    %355 = math.tanh %354 : vector<2x64xf32>
    %356 = arith.mulf %349, %355 : vector<2x64xf32>
    %357 = tpu.concatenate %356, %333 in 1 : vector<2x64xf32>, vector<2x64xf32> -> vector<2x128xf32>
    %358 = arith.truncf %357 : vector<2x128xf32> to vector<2x128xbf16>
    %c0_108 = arith.constant 0 : index
    %c0_109 = arith.constant 0 : index
    %359 = vector.load %arg16[%c0_108, %c0_109] : memref<128x256xbf16, #tpu.memory_space<vmem>>, vector<128x256xbf16>
    %cst_110 = arith.constant dense<0.000000e+00> : vector<2x256xf32>
    %360 = tpu.matmul %358, %359, %cst_110 {dimension_numbers = #tpu.dot_dimension_numbers<[1], [0], [0], [1], [0, 0, 1, 1], [], []>} : vector<2x128xbf16>, vector<128x256xbf16>, vector<2x256xf32> -> vector<2x256xf32>
    %361 = vector.broadcast %15 : vector<1x256xf32> to vector<2x256xf32>
    %362 = arith.addf %360, %361 : vector<2x256xf32>
    %363 = vector.extract_strided_slice %362 {offsets = [0, 0], sizes = [2, 192], strides = [1, 1]} : vector<2x256xf32> to vector<2x192xf32>
    %364 = arith.negf %363 : vector<2x192xf32>
    %365 = math.exp %364 : vector<2x192xf32>
    %cst_111 = arith.constant 1.000000e+00 : f32
    %366 = vector.broadcast %cst_111 : f32 to vector<2x192xf32>
    %367 = arith.addf %366, %365 : vector<2x192xf32>
    %368 = arith.divf %366, %367 : vector<2x192xf32>
    %369 = vector.extract_strided_slice %368 {offsets = [0, 0], sizes = [2, 64], strides = [1, 1]} : vector<2x192xf32> to vector<2x64xf32>
    %370 = vector.extract_strided_slice %368 {offsets = [0, 64], sizes = [2, 64], strides = [1, 1]} : vector<2x192xf32> to vector<2x64xf32>
    %371 = vector.extract_strided_slice %368 {offsets = [0, 128], sizes = [2, 64], strides = [1, 1]} : vector<2x192xf32> to vector<2x64xf32>
    %372 = vector.extract_strided_slice %362 {offsets = [0, 192], sizes = [2, 64], strides = [1, 1]} : vector<2x256xf32> to vector<2x64xf32>
    %373 = math.tanh %372 : vector<2x64xf32>
    %374 = arith.mulf %370, %331 : vector<2x64xf32>
    %375 = arith.mulf %369, %373 : vector<2x64xf32>
    %376 = arith.addf %374, %375 : vector<2x64xf32>
    %377 = math.tanh %376 : vector<2x64xf32>
    %378 = arith.mulf %371, %377 : vector<2x64xf32>
    %379 = vector.extract_strided_slice %152 {offsets = [5, 0], sizes = [1, 256], strides = [1, 1]} : vector<16x256xf32> to vector<1x256xf32>
    %380 = vector.extract_strided_slice %152 {offsets = [13, 0], sizes = [1, 256], strides = [1, 1]} : vector<16x256xf32> to vector<1x256xf32>
    %381 = tpu.concatenate %379, %380 in 0 : vector<1x256xf32>, vector<1x256xf32> -> vector<2x256xf32>
    %382 = arith.truncf %356 : vector<2x64xf32> to vector<2x64xbf16>
    %c0_112 = arith.constant 0 : index
    %c0_113 = arith.constant 0 : index
    %383 = vector.load %arg15[%c0_112, %c0_113] : memref<64x256xbf16, #tpu.memory_space<vmem>>, vector<64x256xbf16>
    %cst_114 = arith.constant dense<0.000000e+00> : vector<2x256xf32>
    %384 = tpu.matmul %382, %383, %cst_114 {dimension_numbers = #tpu.dot_dimension_numbers<[1], [0], [0], [1], [0, 0, 1, 1], [], []>} : vector<2x64xbf16>, vector<64x256xbf16>, vector<2x256xf32> -> vector<2x256xf32>
    %385 = arith.addf %381, %384 : vector<2x256xf32>
    %386 = vector.extract_strided_slice %385 {offsets = [0, 0], sizes = [2, 192], strides = [1, 1]} : vector<2x256xf32> to vector<2x192xf32>
    %387 = arith.negf %386 : vector<2x192xf32>
    %388 = math.exp %387 : vector<2x192xf32>
    %cst_115 = arith.constant 1.000000e+00 : f32
    %389 = vector.broadcast %cst_115 : f32 to vector<2x192xf32>
    %390 = arith.addf %389, %388 : vector<2x192xf32>
    %391 = arith.divf %389, %390 : vector<2x192xf32>
    %392 = vector.extract_strided_slice %391 {offsets = [0, 0], sizes = [2, 64], strides = [1, 1]} : vector<2x192xf32> to vector<2x64xf32>
    %393 = vector.extract_strided_slice %391 {offsets = [0, 64], sizes = [2, 64], strides = [1, 1]} : vector<2x192xf32> to vector<2x64xf32>
    %394 = vector.extract_strided_slice %391 {offsets = [0, 128], sizes = [2, 64], strides = [1, 1]} : vector<2x192xf32> to vector<2x64xf32>
    %395 = vector.extract_strided_slice %385 {offsets = [0, 192], sizes = [2, 64], strides = [1, 1]} : vector<2x256xf32> to vector<2x64xf32>
    %396 = math.tanh %395 : vector<2x64xf32>
    %397 = arith.mulf %393, %354 : vector<2x64xf32>
    %398 = arith.mulf %392, %396 : vector<2x64xf32>
    %399 = arith.addf %397, %398 : vector<2x64xf32>
    %400 = math.tanh %399 : vector<2x64xf32>
    %401 = arith.mulf %394, %400 : vector<2x64xf32>
    %402 = tpu.concatenate %401, %378 in 1 : vector<2x64xf32>, vector<2x64xf32> -> vector<2x128xf32>
    %403 = arith.truncf %402 : vector<2x128xf32> to vector<2x128xbf16>
    %c0_116 = arith.constant 0 : index
    %c0_117 = arith.constant 0 : index
    %404 = vector.load %arg16[%c0_116, %c0_117] : memref<128x256xbf16, #tpu.memory_space<vmem>>, vector<128x256xbf16>
    %cst_118 = arith.constant dense<0.000000e+00> : vector<2x256xf32>
    %405 = tpu.matmul %403, %404, %cst_118 {dimension_numbers = #tpu.dot_dimension_numbers<[1], [0], [0], [1], [0, 0, 1, 1], [], []>} : vector<2x128xbf16>, vector<128x256xbf16>, vector<2x256xf32> -> vector<2x256xf32>
    %406 = vector.broadcast %15 : vector<1x256xf32> to vector<2x256xf32>
    %407 = arith.addf %405, %406 : vector<2x256xf32>
    %408 = vector.extract_strided_slice %407 {offsets = [0, 0], sizes = [2, 192], strides = [1, 1]} : vector<2x256xf32> to vector<2x192xf32>
    %409 = arith.negf %408 : vector<2x192xf32>
    %410 = math.exp %409 : vector<2x192xf32>
    %cst_119 = arith.constant 1.000000e+00 : f32
    %411 = vector.broadcast %cst_119 : f32 to vector<2x192xf32>
    %412 = arith.addf %411, %410 : vector<2x192xf32>
    %413 = arith.divf %411, %412 : vector<2x192xf32>
    %414 = vector.extract_strided_slice %413 {offsets = [0, 0], sizes = [2, 64], strides = [1, 1]} : vector<2x192xf32> to vector<2x64xf32>
    %415 = vector.extract_strided_slice %413 {offsets = [0, 64], sizes = [2, 64], strides = [1, 1]} : vector<2x192xf32> to vector<2x64xf32>
    %416 = vector.extract_strided_slice %413 {offsets = [0, 128], sizes = [2, 64], strides = [1, 1]} : vector<2x192xf32> to vector<2x64xf32>
    %417 = vector.extract_strided_slice %407 {offsets = [0, 192], sizes = [2, 64], strides = [1, 1]} : vector<2x256xf32> to vector<2x64xf32>
    %418 = math.tanh %417 : vector<2x64xf32>
    %419 = arith.mulf %415, %376 : vector<2x64xf32>
    %420 = arith.mulf %414, %418 : vector<2x64xf32>
    %421 = arith.addf %419, %420 : vector<2x64xf32>
    %422 = math.tanh %421 : vector<2x64xf32>
    %423 = arith.mulf %416, %422 : vector<2x64xf32>
    %424 = vector.extract_strided_slice %152 {offsets = [6, 0], sizes = [1, 256], strides = [1, 1]} : vector<16x256xf32> to vector<1x256xf32>
    %425 = vector.extract_strided_slice %152 {offsets = [14, 0], sizes = [1, 256], strides = [1, 1]} : vector<16x256xf32> to vector<1x256xf32>
    %426 = tpu.concatenate %424, %425 in 0 : vector<1x256xf32>, vector<1x256xf32> -> vector<2x256xf32>
    %427 = arith.truncf %401 : vector<2x64xf32> to vector<2x64xbf16>
    %c0_120 = arith.constant 0 : index
    %c0_121 = arith.constant 0 : index
    %428 = vector.load %arg15[%c0_120, %c0_121] : memref<64x256xbf16, #tpu.memory_space<vmem>>, vector<64x256xbf16>
    %cst_122 = arith.constant dense<0.000000e+00> : vector<2x256xf32>
    %429 = tpu.matmul %427, %428, %cst_122 {dimension_numbers = #tpu.dot_dimension_numbers<[1], [0], [0], [1], [0, 0, 1, 1], [], []>} : vector<2x64xbf16>, vector<64x256xbf16>, vector<2x256xf32> -> vector<2x256xf32>
    %430 = arith.addf %426, %429 : vector<2x256xf32>
    %431 = vector.extract_strided_slice %430 {offsets = [0, 0], sizes = [2, 192], strides = [1, 1]} : vector<2x256xf32> to vector<2x192xf32>
    %432 = arith.negf %431 : vector<2x192xf32>
    %433 = math.exp %432 : vector<2x192xf32>
    %cst_123 = arith.constant 1.000000e+00 : f32
    %434 = vector.broadcast %cst_123 : f32 to vector<2x192xf32>
    %435 = arith.addf %434, %433 : vector<2x192xf32>
    %436 = arith.divf %434, %435 : vector<2x192xf32>
    %437 = vector.extract_strided_slice %436 {offsets = [0, 0], sizes = [2, 64], strides = [1, 1]} : vector<2x192xf32> to vector<2x64xf32>
    %438 = vector.extract_strided_slice %436 {offsets = [0, 64], sizes = [2, 64], strides = [1, 1]} : vector<2x192xf32> to vector<2x64xf32>
    %439 = vector.extract_strided_slice %436 {offsets = [0, 128], sizes = [2, 64], strides = [1, 1]} : vector<2x192xf32> to vector<2x64xf32>
    %440 = vector.extract_strided_slice %430 {offsets = [0, 192], sizes = [2, 64], strides = [1, 1]} : vector<2x256xf32> to vector<2x64xf32>
    %441 = math.tanh %440 : vector<2x64xf32>
    %442 = arith.mulf %438, %399 : vector<2x64xf32>
    %443 = arith.mulf %437, %441 : vector<2x64xf32>
    %444 = arith.addf %442, %443 : vector<2x64xf32>
    %445 = math.tanh %444 : vector<2x64xf32>
    %446 = arith.mulf %439, %445 : vector<2x64xf32>
    %447 = tpu.concatenate %446, %423 in 1 : vector<2x64xf32>, vector<2x64xf32> -> vector<2x128xf32>
    %448 = arith.truncf %447 : vector<2x128xf32> to vector<2x128xbf16>
    %c0_124 = arith.constant 0 : index
    %c0_125 = arith.constant 0 : index
    %449 = vector.load %arg16[%c0_124, %c0_125] : memref<128x256xbf16, #tpu.memory_space<vmem>>, vector<128x256xbf16>
    %cst_126 = arith.constant dense<0.000000e+00> : vector<2x256xf32>
    %450 = tpu.matmul %448, %449, %cst_126 {dimension_numbers = #tpu.dot_dimension_numbers<[1], [0], [0], [1], [0, 0, 1, 1], [], []>} : vector<2x128xbf16>, vector<128x256xbf16>, vector<2x256xf32> -> vector<2x256xf32>
    %451 = vector.broadcast %15 : vector<1x256xf32> to vector<2x256xf32>
    %452 = arith.addf %450, %451 : vector<2x256xf32>
    %453 = vector.extract_strided_slice %452 {offsets = [0, 0], sizes = [2, 192], strides = [1, 1]} : vector<2x256xf32> to vector<2x192xf32>
    %454 = arith.negf %453 : vector<2x192xf32>
    %455 = math.exp %454 : vector<2x192xf32>
    %cst_127 = arith.constant 1.000000e+00 : f32
    %456 = vector.broadcast %cst_127 : f32 to vector<2x192xf32>
    %457 = arith.addf %456, %455 : vector<2x192xf32>
    %458 = arith.divf %456, %457 : vector<2x192xf32>
    %459 = vector.extract_strided_slice %458 {offsets = [0, 0], sizes = [2, 64], strides = [1, 1]} : vector<2x192xf32> to vector<2x64xf32>
    %460 = vector.extract_strided_slice %458 {offsets = [0, 64], sizes = [2, 64], strides = [1, 1]} : vector<2x192xf32> to vector<2x64xf32>
    %461 = vector.extract_strided_slice %458 {offsets = [0, 128], sizes = [2, 64], strides = [1, 1]} : vector<2x192xf32> to vector<2x64xf32>
    %462 = vector.extract_strided_slice %452 {offsets = [0, 192], sizes = [2, 64], strides = [1, 1]} : vector<2x256xf32> to vector<2x64xf32>
    %463 = math.tanh %462 : vector<2x64xf32>
    %464 = arith.mulf %460, %421 : vector<2x64xf32>
    %465 = arith.mulf %459, %463 : vector<2x64xf32>
    %466 = arith.addf %464, %465 : vector<2x64xf32>
    %467 = math.tanh %466 : vector<2x64xf32>
    %468 = arith.mulf %461, %467 : vector<2x64xf32>
    %469 = vector.extract_strided_slice %152 {offsets = [7, 0], sizes = [1, 256], strides = [1, 1]} : vector<16x256xf32> to vector<1x256xf32>
    %470 = vector.extract_strided_slice %152 {offsets = [15, 0], sizes = [1, 256], strides = [1, 1]} : vector<16x256xf32> to vector<1x256xf32>
    %471 = tpu.concatenate %469, %470 in 0 : vector<1x256xf32>, vector<1x256xf32> -> vector<2x256xf32>
    %472 = arith.truncf %446 : vector<2x64xf32> to vector<2x64xbf16>
    %c0_128 = arith.constant 0 : index
    %c0_129 = arith.constant 0 : index
    %473 = vector.load %arg15[%c0_128, %c0_129] : memref<64x256xbf16, #tpu.memory_space<vmem>>, vector<64x256xbf16>
    %cst_130 = arith.constant dense<0.000000e+00> : vector<2x256xf32>
    %474 = tpu.matmul %472, %473, %cst_130 {dimension_numbers = #tpu.dot_dimension_numbers<[1], [0], [0], [1], [0, 0, 1, 1], [], []>} : vector<2x64xbf16>, vector<64x256xbf16>, vector<2x256xf32> -> vector<2x256xf32>
    %475 = arith.addf %471, %474 : vector<2x256xf32>
    %476 = vector.extract_strided_slice %475 {offsets = [0, 0], sizes = [2, 192], strides = [1, 1]} : vector<2x256xf32> to vector<2x192xf32>
    %477 = arith.negf %476 : vector<2x192xf32>
    %478 = math.exp %477 : vector<2x192xf32>
    %cst_131 = arith.constant 1.000000e+00 : f32
    %479 = vector.broadcast %cst_131 : f32 to vector<2x192xf32>
    %480 = arith.addf %479, %478 : vector<2x192xf32>
    %481 = arith.divf %479, %480 : vector<2x192xf32>
    %482 = vector.extract_strided_slice %481 {offsets = [0, 0], sizes = [2, 64], strides = [1, 1]} : vector<2x192xf32> to vector<2x64xf32>
    %483 = vector.extract_strided_slice %481 {offsets = [0, 64], sizes = [2, 64], strides = [1, 1]} : vector<2x192xf32> to vector<2x64xf32>
    %484 = vector.extract_strided_slice %481 {offsets = [0, 128], sizes = [2, 64], strides = [1, 1]} : vector<2x192xf32> to vector<2x64xf32>
    %485 = vector.extract_strided_slice %475 {offsets = [0, 192], sizes = [2, 64], strides = [1, 1]} : vector<2x256xf32> to vector<2x64xf32>
    %486 = math.tanh %485 : vector<2x64xf32>
    %487 = arith.mulf %483, %444 : vector<2x64xf32>
    %488 = arith.mulf %482, %486 : vector<2x64xf32>
    %489 = arith.addf %487, %488 : vector<2x64xf32>
    %490 = math.tanh %489 : vector<2x64xf32>
    %491 = arith.mulf %484, %490 : vector<2x64xf32>
    %492 = tpu.concatenate %491, %468 in 1 : vector<2x64xf32>, vector<2x64xf32> -> vector<2x128xf32>
    %493 = arith.truncf %492 : vector<2x128xf32> to vector<2x128xbf16>
    %c0_132 = arith.constant 0 : index
    %c0_133 = arith.constant 0 : index
    %494 = vector.load %arg16[%c0_132, %c0_133] : memref<128x256xbf16, #tpu.memory_space<vmem>>, vector<128x256xbf16>
    %cst_134 = arith.constant dense<0.000000e+00> : vector<2x256xf32>
    %495 = tpu.matmul %493, %494, %cst_134 {dimension_numbers = #tpu.dot_dimension_numbers<[1], [0], [0], [1], [0, 0, 1, 1], [], []>} : vector<2x128xbf16>, vector<128x256xbf16>, vector<2x256xf32> -> vector<2x256xf32>
    %496 = vector.broadcast %15 : vector<1x256xf32> to vector<2x256xf32>
    %497 = arith.addf %495, %496 : vector<2x256xf32>
    %498 = vector.extract_strided_slice %497 {offsets = [0, 0], sizes = [2, 192], strides = [1, 1]} : vector<2x256xf32> to vector<2x192xf32>
    %499 = arith.negf %498 : vector<2x192xf32>
    %500 = math.exp %499 : vector<2x192xf32>
    %cst_135 = arith.constant 1.000000e+00 : f32
    %501 = vector.broadcast %cst_135 : f32 to vector<2x192xf32>
    %502 = arith.addf %501, %500 : vector<2x192xf32>
    %503 = arith.divf %501, %502 : vector<2x192xf32>
    %504 = vector.extract_strided_slice %503 {offsets = [0, 0], sizes = [2, 64], strides = [1, 1]} : vector<2x192xf32> to vector<2x64xf32>
    %505 = vector.extract_strided_slice %503 {offsets = [0, 64], sizes = [2, 64], strides = [1, 1]} : vector<2x192xf32> to vector<2x64xf32>
    %506 = vector.extract_strided_slice %503 {offsets = [0, 128], sizes = [2, 64], strides = [1, 1]} : vector<2x192xf32> to vector<2x64xf32>
    %507 = vector.extract_strided_slice %497 {offsets = [0, 192], sizes = [2, 64], strides = [1, 1]} : vector<2x256xf32> to vector<2x64xf32>
    %508 = math.tanh %507 : vector<2x64xf32>
    %509 = arith.mulf %505, %466 : vector<2x64xf32>
    %510 = arith.mulf %504, %508 : vector<2x64xf32>
    %511 = arith.addf %509, %510 : vector<2x64xf32>
    %512 = math.tanh %511 : vector<2x64xf32>
    %513 = arith.mulf %506, %512 : vector<2x64xf32>
    %514 = vector.extract_strided_slice %198 {offsets = [0, 0], sizes = [1, 64], strides = [1, 1]} : vector<2x64xf32> to vector<1x64xf32>
    %515 = vector.extract_strided_slice %243 {offsets = [0, 0], sizes = [1, 64], strides = [1, 1]} : vector<2x64xf32> to vector<1x64xf32>
    %516 = vector.extract_strided_slice %288 {offsets = [0, 0], sizes = [1, 64], strides = [1, 1]} : vector<2x64xf32> to vector<1x64xf32>
    %517 = vector.extract_strided_slice %333 {offsets = [0, 0], sizes = [1, 64], strides = [1, 1]} : vector<2x64xf32> to vector<1x64xf32>
    %518 = vector.extract_strided_slice %378 {offsets = [0, 0], sizes = [1, 64], strides = [1, 1]} : vector<2x64xf32> to vector<1x64xf32>
    %519 = vector.extract_strided_slice %423 {offsets = [0, 0], sizes = [1, 64], strides = [1, 1]} : vector<2x64xf32> to vector<1x64xf32>
    %520 = vector.extract_strided_slice %468 {offsets = [0, 0], sizes = [1, 64], strides = [1, 1]} : vector<2x64xf32> to vector<1x64xf32>
    %521 = vector.extract_strided_slice %513 {offsets = [0, 0], sizes = [1, 64], strides = [1, 1]} : vector<2x64xf32> to vector<1x64xf32>
    %522 = vector.extract_strided_slice %198 {offsets = [1, 0], sizes = [1, 64], strides = [1, 1]} : vector<2x64xf32> to vector<1x64xf32>
    %523 = vector.extract_strided_slice %243 {offsets = [1, 0], sizes = [1, 64], strides = [1, 1]} : vector<2x64xf32> to vector<1x64xf32>
    %524 = vector.extract_strided_slice %288 {offsets = [1, 0], sizes = [1, 64], strides = [1, 1]} : vector<2x64xf32> to vector<1x64xf32>
    %525 = vector.extract_strided_slice %333 {offsets = [1, 0], sizes = [1, 64], strides = [1, 1]} : vector<2x64xf32> to vector<1x64xf32>
    %526 = vector.extract_strided_slice %378 {offsets = [1, 0], sizes = [1, 64], strides = [1, 1]} : vector<2x64xf32> to vector<1x64xf32>
    %527 = vector.extract_strided_slice %423 {offsets = [1, 0], sizes = [1, 64], strides = [1, 1]} : vector<2x64xf32> to vector<1x64xf32>
    %528 = vector.extract_strided_slice %468 {offsets = [1, 0], sizes = [1, 64], strides = [1, 1]} : vector<2x64xf32> to vector<1x64xf32>
    %529 = vector.extract_strided_slice %513 {offsets = [1, 0], sizes = [1, 64], strides = [1, 1]} : vector<2x64xf32> to vector<1x64xf32>
    %530 = tpu.concatenate %514, %515, %516, %517, %518, %519, %520, %521, %522, %523, %524, %525, %526, %527, %528, %529 in 0 : vector<1x64xf32>, vector<1x64xf32>, vector<1x64xf32>, vector<1x64xf32>, vector<1x64xf32>, vector<1x64xf32>, vector<1x64xf32>, vector<1x64xf32>, vector<1x64xf32>, vector<1x64xf32>, vector<1x64xf32>, vector<1x64xf32>, vector<1x64xf32>, vector<1x64xf32>, vector<1x64xf32>, vector<1x64xf32> -> vector<16x64xf32>
    %531 = arith.truncf %530 : vector<16x64xf32> to vector<16x64xbf16>
    %cst_136 = arith.constant dense<0.000000e+00> : vector<16x128xf32>
    %532 = tpu.matmul %531, %16, %cst_136 {dimension_numbers = #tpu.dot_dimension_numbers<[1], [0], [0], [1], [0, 0, 1, 1], [], []>} : vector<16x64xbf16>, vector<64x128xbf16>, vector<16x128xf32> -> vector<16x128xf32>
    %533 = vector.broadcast %17 : vector<1x128xf32> to vector<16x128xf32>
    %534 = arith.addf %532, %533 : vector<16x128xf32>
    %c0_137 = arith.constant 0 : index
    %c0_138 = arith.constant 0 : index
    %535 = vector.load %arg20[%c0_137, %c0_138] : memref<16x128xf32, #tpu.memory_space<vmem>>, vector<16x128xf32>
    tpu.vector_store %arg20[%c0_137, %c0_138], %534 {strides = array<i32>} : memref<16x128xf32, #tpu.memory_space<vmem>>, vector<16x128xf32>,
    return
  }
}

</mosaic_0001>

<bundles_post_ra>
// kernel: convlstm_forward.1
= control target key start
LH: loop header
LB: loop body
LE: loop exit
PB: predicated region body
PF: predicated region fallthrough
CT: control target
= control target key end

     0   :  { %vm455_vm0 = vcmask 1047552   ;;  %vm456_vm1 = vsmask.f32 7424  ;;  %vm490_vm2 = vcmask 1045504   ;;  %s5830_s24 = smov 4   ;;  %v5831_v10 = vmov 0   ;;  %s7708_s0 = inlined_call_operand.vmem [shape: bf16[16,4], index: 0, kind: input, shape index: {}]   ;;  %s7709_s1 = inlined_call_operand.vmem [shape: bf16[12,512], index: 1, kind: input, shape index: {}]   ;;  %s7710_s4 = inlined_call_operand.vmem [shape: bf16[1536,256], index: 4, kind: input, shape index: {}]   ;;  %s7711_s2 = inlined_call_operand.vmem [shape: f32[1,512], index: 2, kind: input, shape index: {}]   ;;  %s7712_s3 = inlined_call_operand.vmem [shape: f32[1,512], index: 3, kind: input, shape index: {}]   ;;  %s7713_s7 = inlined_call_operand.vmem [shape: bf16[768,128], index: 7, kind: input, shape index: {}]   ;;  %s7714_s5 = inlined_call_operand.vmem [shape: f32[1,256], index: 5, kind: input, shape index: {}]   ;;  %s7715_s6 = inlined_call_operand.vmem [shape: f32[1,256], index: 6, kind: input, shape index: {}]   ;;  %s7716_s10 = inlined_call_operand.vmem [shape: bf16[384,64], index: 10, kind: input, shape index: {}]   ;;  %s7717_s8 = inlined_call_operand.vmem [shape: f32[1,128], index: 8, kind: input, shape index: {}]   ;;  %s7718_s9 = inlined_call_operand.vmem [shape: f32[1,128], index: 9, kind: input, shape index: {}]   ;;  %s7719_s13 = inlined_call_operand.vmem [shape: bf16[64,256], index: 13, kind: input, shape index: {}]   ;;  %s7720_s15 = inlined_call_operand.vmem [shape: bf16[64,256], index: 15, kind: input, shape index: {}]   ;;  %s7721_s11 = inlined_call_operand.vmem [shape: f32[1,64], index: 11, kind: input, shape index: {}]   ;;  %s7722_s12 = inlined_call_operand.vmem [shape: f32[1,64], index: 12, kind: input, shape index: {}]   ;;  %s7723_s14 = inlined_call_operand.vmem [shape: f32[1,256], index: 14, kind: input, shape index: {}]   ;;  %s7724_s16 = inlined_call_operand.vmem [shape: bf16[128,256], index: 16, kind: input, shape index: {}]   ;;  %s7725_s17 = inlined_call_operand.vmem [shape: f32[1,256], index: 17, kind: input, shape index: {}]   ;;  %s7726_s18 = inlined_call_operand.vmem [shape: bf16[64,128], index: 18, kind: input, shape index: {}]   ;;  %s7727_s19 = inlined_call_operand.vmem [shape: f32[1,128], index: 19, kind: input, shape index: {}]   ;;  %s7728_s20 = inlined_call_operand.vmem [shape: f32[16,128], index: 20, kind: output, shape index: {}]  }
   0x1   :  { %7731 = sst [smem:[#allocation2_spill]] %s7708_s0  ;;  %vm5955_vm3 = vmand %vm455_vm0, %vm456_vm1  ;;  %535 = vmatprep.mubr.bf16.mxu0 %v5831_v10  ;;  %578 = vmatprep.mubr.bf16.mxu1 %v5831_v10  ;;  %s5832_s0 = smov 8   ;;  %vm448_vm4 = vcmask 1040384   ;;  %vm449_vm5 = vsmask.f32 256  ;;  %vm464_vm7 = vcmask 31744  }
   0x2   :  { %7732 = sst [smem:[#allocation3_spill]] %s7709_s1  ;;  %s7736_s23 = sld [smem:[#allocation2_spill]]  ;;  %vm5970_vm6 = vmand %vm448_vm4, %vm449_vm5  ;;  %vm468_vm8 = vcmask 64512   ;;  %vm487_vm9 = vcmask 97280   ;;  %vm5835_vm10 = vmmov 0   ;;  %v5541_v16 = vld [vmem:[%s7716_s10 + $0x98] sm:$0xff]  }
   0x3   :  { %7733 = sst [smem:[#allocation4_spill]] %s7710_s4  ;;  %v5549_v8 = vld [vmem:[%s7719_s13 + $0x10] ss:$8 sps:$4 sm:$0xff]   ;;  %vm2929_vm11 = vcmask 523264   ;;  %vm4565_vm13 = vcmask 1041408   ;;  %vm4567_vm14 = vcmask 1042432  }
   0x4   :  { %7734 = sst [smem:[#allocation5_spill]] %s7711_s2  ;;  %s7737_s2 = sld [smem:[#allocation3_spill]]  ;;  %vm4972_vm12 = vmpackc.low %vm2929_vm11, %vm2929_vm11  ;;  %vm4569_vm15 = vcmask 1043456   ;;  %vm4571_vm0 = vcmask 1044480   ;;  %vm4574_vm1 = vcmask 1046528  }
   0x5   :  { %7735 = sst [smem:[#allocation6_spill]] %s7712_s3  ;;  %s7742_s22 = sld [smem:[#allocation4_spill]] }
   0x6   :  { %s7743_s30 = sld [smem:[#allocation5_spill]]  ;;  %s7744_s1 = sld [smem:[#allocation6_spill]] }
   0x8   :  { %v5179_v0 = vld [vmem:[%s7736_s23] sm:$0xff]  }
   0x9   :  { %459 = vrot.lane.b32.xlu0 %v5179_v0, %s5830_s24  ;;  %v441_v1 = vshrl.u32 %v5179_v0, 16  ;;  %v444_v2 = vshll.u32 %v5179_v0, 16 }
   0xa   :  { %v5180_v3 = vld [vmem:[%s7737_s2 + $0x4] ss:$16 sps:$4 sm:$0x3f]   ;;  %v5182_v4 = vld [vmem:[%s7737_s2 + $0xc] ss:$16 sps:$4 sm:$0x3f]  }
   0xb   :  { %v452_v5 = vrot.slane %v444_v2, 1  ;;  %v443_v6 = vrot.slane %v441_v1, 7  ;;  %4669 = vmatprep.subr.msk.bf16.mxu0 %vm490_vm2, %v5180_v3  ;;  %v5184_v7 = vld [vmem:[%s7737_s2] ss:$16 sps:$4 sm:$0x3f]   ;;  %4671 = vmatprep.subr.msk.bf16.mxu1 %vm490_vm2, %v5182_v4 }
   0xc   :  { %v5185_v9 = vld [vmem:[%s7737_s2 + $0x8] ss:$16 sps:$4 sm:$0x3f]   ;;  %v492_v13 = vsel %vm490_vm2, %v5184_v7, 0  ;;  %v5188_v22 = vld [vmem:[%s7742_s22 + $0x4] ss:$8 sps:$4 sm:$0xff]  }
   0xd   :  { %v453_v11 = vor.u32 %v452_v5, %v441_v1  ;;  %v446_v12 = vor.u32 %v444_v2, %v443_v6  ;;  %504 = vmatpush1.bf16.msra.mxu0 %v492_v13  ;;  %v498_v14 = vsel %vm490_vm2, %v5185_v9, 0  ;;  %v5186_v23 = vld [vmem:[%s7742_s22] ss:$8 sps:$4 sm:$0xff]   ;;  %v5191_v24 = vld [vmem:[%s7742_s22 + $0x14] ss:$8 sps:$4 sm:$0xff]  }
   0xe   :  { %547 = vmatpush1.bf16.msra.mxu1 %v498_v14  ;;  %1828 = vmatprep.subr.bf16.mxu0 %v5188_v22  ;;  %v5189_v25 = vld [vmem:[%s7742_s22 + $0x10] ss:$8 sps:$4 sm:$0xff]   ;;  %v5194_v26 = vld [vmem:[%s7742_s22 + $0x24] ss:$8 sps:$4 sm:$0xff]   ;;  %v5192_v27 = vld [vmem:[%s7742_s22 + $0x20] ss:$8 sps:$4 sm:$0xff]  }
   0xf   :  { %v458_v15 = vsel %vm5955_vm3, %v453_v11, 0  ;;  %v451_v18 = vsel %vm5970_vm6, 0, %v446_v12  ;;  %v5197_v28 = vld [vmem:[%s7742_s22 + $0x34] ss:$8 sps:$4 sm:$0xff]   ;;  %v5195_v29 = vld [vmem:[%s7742_s22 + $0x30] ss:$8 sps:$4 sm:$0xff]  }
  0x10   :  { %462 = vrot.lane.b32.xlu0 %v458_v15, %s5832_s0  ;;  %v5200_v30 = vld [vmem:[%s7742_s22 + $0x44] ss:$8 sps:$4 sm:$0xff]   ;;  %v5198_v31 = vld [vmem:[%s7742_s22 + $0x40] ss:$8 sps:$4 sm:$0xff]   ;;  %v5203_v32 = vld [vmem:[%s7742_s22 + $0x54] ss:$8 sps:$4 sm:$0xff]  }
  0x11   :  { %v5201_v33 = vld [vmem:[%s7742_s22 + $0x50] ss:$8 sps:$4 sm:$0xff]   ;;  %v5206_v34 = vld [vmem:[%s7742_s22 + $0x64] ss:$8 sps:$4 sm:$0xff]   ;;  %v5204_v35 = vld [vmem:[%s7742_s22 + $0x60] ss:$8 sps:$4 sm:$0xff]  }
  0x12   :  { %v5209_v36 = vld [vmem:[%s7742_s22 + $0x74] ss:$8 sps:$4 sm:$0xff]   ;;  %v5207_v37 = vld [vmem:[%s7742_s22 + $0x70] ss:$8 sps:$4 sm:$0xff]   ;;  %v5212_v38 = vld [vmem:[%s7742_s22 + $0x84] ss:$8 sps:$4 sm:$0xff]  }
  0x13   :  { %v5210_v39 = vld [vmem:[%s7742_s22 + $0x80] ss:$8 sps:$4 sm:$0xff]   ;;  %v5215_v40 = vld [vmem:[%s7742_s22 + $0x94] ss:$8 sps:$4 sm:$0xff]   ;;  %v5213_v41 = vld [vmem:[%s7742_s22 + $0x90] ss:$8 sps:$4 sm:$0xff]  }
  0x14   :  { %v5218_v42 = vld [vmem:[%s7742_s22 + $0xa4] ss:$8 sps:$4 sm:$0xff]   ;;  %v5216_v43 = vld [vmem:[%s7742_s22 + $0xa0] ss:$8 sps:$4 sm:$0xff]   ;;  %v5221_v44 = vld [vmem:[%s7742_s22 + $0xb4] ss:$8 sps:$4 sm:$0xff]  }
  0x15   :  { %v5219_v45 = vld [vmem:[%s7742_s22 + $0xb0] ss:$8 sps:$4 sm:$0xff]   ;;  %v5224_v46 = vld [vmem:[%s7742_s22 + $0xc4] ss:$8 sps:$4 sm:$0xff]   ;;  %v5222_v47 = vld [vmem:[%s7742_s22 + $0xc0] ss:$8 sps:$4 sm:$0xff]  }
  0x16   :  { %v5227_v48 = vld [vmem:[%s7742_s22 + $0xd4] ss:$8 sps:$4 sm:$0xff]   ;;  %v5225_v49 = vld [vmem:[%s7742_s22 + $0xd0] ss:$8 sps:$4 sm:$0xff]   ;;  %v5228_v50 = vld [vmem:[%s7742_s22 + $0xe0] ss:$8 sps:$4 sm:$0xff]  }
  0x17   :  { %v5230_v51 = vld [vmem:[%s7742_s22 + $0xe4] ss:$8 sps:$4 sm:$0xff]   ;;  %v5231_v52 = vld [vmem:[%s7742_s22 + $0xf0] ss:$8 sps:$4 sm:$0xff]   ;;  %v5233_v53 = vld [vmem:[%s7742_s22 + $0xf4] ss:$8 sps:$4 sm:$0xff]  }
  0x18   :  { %v5236_v54 = vld [vmem:[%s7742_s22 + $0x104] ss:$8 sps:$4 sm:$0xff]  }
  0x7b   :  { %v460_v17 = vpop.permute.xlu0 %459 }
  0x7c   :  { %v467_v19 = vsel %vm464_vm7, %v451_v18, %v460_v17 }
  0x82   :  { %v463_v20 = vpop.permute.xlu0 %462 }
  0x83   :  { %v470_v21 = vsel %vm468_vm8, %v467_v19, %v463_v20 }
  0x84   :  { %4670 = vmatmul.mubr.msk.bf16.vlgmr.msra.gmra.mrb[0].mxu0 %vm487_vm9, %v470_v21  ;;  %4672 = vmatmul.mubr.msk.bf16.vlgmr.msra.gmra.mrb[0].mxu1 %vm487_vm9, %v470_v21 }
  0x85   :  { %1829 = vmatpush1.bf16.msra.mxu0 %v5186_v23 }
  0x86   :  { %1830 = vmatprep.subr.bf16.mxu0 %v5191_v24 }
  0x89   :  { %1831 = vmatpush1.bf16.msra.mxu0 %v5189_v25 }
  0x8a   :  { %1832 = vmatprep.subr.bf16.mxu0 %v5194_v26 }
  0x8d   :  { %1833 = vmatpush1.bf16.msra.mxu0 %v5192_v27 }
  0x8e   :  { %1834 = vmatprep.subr.bf16.mxu0 %v5197_v28 }
  0x91   :  { %1835 = vmatpush1.bf16.msra.mxu0 %v5195_v29 }
  0x92   :  { %1836 = vmatprep.subr.bf16.mxu0 %v5200_v30 }
  0x95   :  { %1837 = vmatpush1.bf16.msra.mxu0 %v5198_v31 }
  0x96   :  { %1838 = vmatprep.subr.bf16.mxu0 %v5203_v32 }
  0x99   :  { %1839 = vmatpush1.bf16.msra.mxu0 %v5201_v33 }
  0x9a   :  { %1840 = vmatprep.subr.bf16.mxu0 %v5206_v34 }
  0x9d   :  { %1841 = vmatpush1.bf16.msra.mxu0 %v5204_v35 }
  0x9e   :  { %1842 = vmatprep.subr.bf16.mxu0 %v5209_v36 }
  0xa1   :  { %1843 = vmatpush1.bf16.msra.mxu0 %v5207_v37 }
  0xa2   :  { %1844 = vmatprep.subr.bf16.mxu0 %v5212_v38 }
  0xa5   :  { %1845 = vmatpush1.bf16.msra.mxu0 %v5210_v39 }
  0xa6   :  { %1846 = vmatprep.subr.bf16.mxu0 %v5215_v40 }
  0xa9   :  { %1847 = vmatpush1.bf16.msra.mxu0 %v5213_v41 }
  0xaa   :  { %1848 = vmatprep.subr.bf16.mxu0 %v5218_v42 }
  0xad   :  { %1849 = vmatpush1.bf16.msra.mxu0 %v5216_v43 }
  0xae   :  { %1850 = vmatprep.subr.bf16.mxu0 %v5221_v44 }
  0xb1   :  { %1851 = vmatpush1.bf16.msra.mxu0 %v5219_v45 }
  0xb2   :  { %1852 = vmatprep.subr.bf16.mxu0 %v5224_v46 }
  0xb5   :  { %1853 = vmatpush1.bf16.msra.mxu0 %v5222_v47 }
  0xb6   :  { %1854 = vmatprep.subr.bf16.mxu0 %v5227_v48 }
  0xb9   :  { %1855 = vmatpush1.bf16.msra.mxu0 %v5225_v49 }
  0xba   :  { %1856 = vmatprep.subr.bf16.mxu0 %v5230_v51 }
  0xbd   :  { %1857 = vmatpush1.bf16.msra.mxu0 %v5228_v50 }
  0xbe   :  { %1858 = vmatprep.subr.bf16.mxu0 %v5233_v53 }
  0xc1   :  { %1859 = vmatpush1.bf16.msra.mxu0 %v5231_v52 }
  0xc2   :  { %1871 = vmatprep.subr.bf16.mxu0 %v5236_v54 }
 0x157   :  { %v6075_v55 = vpop.f32.mrb[0].mxu0  ;;  %v6077_v56 = vpop.f32.mrb[0].mxu1 }
 0x158   :  { %v6079_v57 = vpop.f32.mrb[1].mxu0  ;;  %v6081_v58 = vpop.f32.mrb[1].mxu1  ;;  %v622_v59 = vmul.f32 %v6075_v55, %v6075_v55  ;;  %v624_v60 = vmul.f32 %v6077_v56, %v6077_v56 }
 0x159   :  { %v623_v61 = vmul.f32 %v6079_v57, %v6079_v57  ;;  %v625_v62 = vmul.f32 %v6081_v58, %v6081_v58  ;;  %v6091_v63 = vpop.f32.mrb[2].mxu0  ;;  %v6093_v0 = vpop.f32.mrb[2].mxu1 }
 0x15a   :  { %v589_v1 = vadd.f32 %v6091_v63, %v6075_v55  ;;  %v626_v2 = vmul.f32 %v6091_v63, %v6091_v63  ;;  %v603_v3 = vadd.f32 %v6093_v0, %v6077_v56  ;;  %v628_v4 = vmul.f32 %v6093_v0, %v6093_v0  ;;  %v6103_v5 = vpop.f32.mrb[3].mxu0  ;;  %v6105_v6 = vpop.f32.mrb[3].mxu1 }
 0x15b   :  { %v596_v7 = vadd.f32 %v6103_v5, %v6079_v57  ;;  %v627_v9 = vmul.f32 %v6103_v5, %v6103_v5  ;;  %v610_v11 = vadd.f32 %v6105_v6, %v6081_v58  ;;  %v629_v12 = vmul.f32 %v6105_v6, %v6105_v6 }
 0x15c   :  { %v590_v13 = vrot.slane %v589_v1, 4  ;;  %v630_v14 = vadd.f32 %v626_v2, %v622_v59  ;;  %v604_v15 = vrot.slane %v603_v3, 4  ;;  %v644_v17 = vadd.f32 %v628_v4, %v624_v60 }
 0x15d   :  { %v597_v18 = vrot.slane %v596_v7, 4  ;;  %v637_v19 = vadd.f32 %v627_v9, %v623_v61  ;;  %v611_v20 = vrot.slane %v610_v11, 4  ;;  %v651_v21 = vadd.f32 %v629_v12, %v625_v62 }
 0x15e   :  { %v591_v22 = vadd.f32 %v590_v13, %v589_v1  ;;  %v631_v23 = vrot.slane %v630_v14, 4  ;;  %v605_v24 = vadd.f32 %v604_v15, %v603_v3  ;;  %v645_v25 = vrot.slane %v644_v17, 4 }
 0x15f   :  { %v598_v26 = vadd.f32 %v597_v18, %v596_v7  ;;  %v638_v27 = vrot.slane %v637_v19, 4  ;;  %v612_v28 = vadd.f32 %v611_v20, %v610_v11  ;;  %v652_v29 = vrot.slane %v651_v21, 4 }
 0x160   :  { %v592_v30 = vrot.slane %v591_v22, 2  ;;  %v632_v31 = vadd.f32 %v631_v23, %v630_v14  ;;  %v606_v32 = vrot.slane %v605_v24, 2  ;;  %v646_v33 = vadd.f32 %v645_v25, %v644_v17 }
 0x161   :  { %v599_v34 = vrot.slane %v598_v26, 2  ;;  %v639_v35 = vadd.f32 %v638_v27, %v637_v19  ;;  %v613_v36 = vrot.slane %v612_v28, 2  ;;  %v653_v37 = vadd.f32 %v652_v29, %v651_v21 }
 0x162   :  { %v593_v38 = vadd.f32 %v592_v30, %v591_v22  ;;  %v633_v39 = vrot.slane %v632_v31, 2  ;;  %v607_v40 = vadd.f32 %v606_v32, %v605_v24  ;;  %v647_v41 = vrot.slane %v646_v33, 2 }
 0x163   :  { %v600_v42 = vadd.f32 %v599_v34, %v598_v26  ;;  %v640_v43 = vrot.slane %v639_v35, 2  ;;  %v614_v44 = vadd.f32 %v613_v36, %v612_v28  ;;  %v654_v45 = vrot.slane %v653_v37, 2 }
 0x164   :  { %v594_v46 = vrot.slane %v593_v38, 1  ;;  %v634_v47 = vadd.f32 %v633_v39, %v632_v31  ;;  %v608_v48 = vrot.slane %v607_v40, 1  ;;  %v648_v49 = vadd.f32 %v647_v41, %v646_v33 }
 0x165   :  { %v601_v50 = vrot.slane %v600_v42, 1  ;;  %v641_v51 = vadd.f32 %v640_v43, %v639_v35  ;;  %v615_v52 = vrot.slane %v614_v44, 1  ;;  %v655_v53 = vadd.f32 %v654_v45, %v653_v37 }
 0x166   :  { %v595_v54 = vadd.f32 %v594_v46, %v593_v38  ;;  %v635_v59 = vrot.slane %v634_v47, 1  ;;  %v609_v60 = vadd.f32 %v608_v48, %v607_v40  ;;  %v649_v61 = vrot.slane %v648_v49, 1 }
 0x167   :  { %v602_v62 = vadd.f32 %v601_v50, %v600_v42  ;;  %v642_v1 = vrot.slane %v641_v51, 1  ;;  %v616_v2 = vadd.f32 %v615_v52, %v614_v44  ;;  %v656_v3 = vrot.slane %v655_v53, 1  ;;  %v70_v52 = vld [vmem:[%s7743_s30] sm:$0xf] }
 0x168   :  { %v618_v4 = vmul.f32 0.0625, %v595_v54  ;;  %v636_v7 = vadd.f32 %v635_v59, %v634_v47  ;;  %v620_v9 = vmul.f32 0.0625, %v609_v60  ;;  %v650_v11 = vadd.f32 %v649_v61, %v648_v49 }
 0x169   :  { %v619_v12 = vmul.f32 0.0625, %v602_v62  ;;  %v643_v13 = vadd.f32 %v642_v1, %v641_v51  ;;  %v621_v14 = vmul.f32 0.0625, %v616_v2  ;;  %v657_v15 = vadd.f32 %v656_v3, %v655_v53 }
 0x16a   :  { %v658_v17 = vmul.f32 0.0625, %v636_v7  ;;  %v662_v18 = vmul.f32 %v618_v4, %v618_v4  ;;  %v660_v19 = vmul.f32 0.0625, %v650_v11  ;;  %v664_v20 = vmul.f32 %v620_v9, %v620_v9 }
 0x16b   :  { %v659_v21 = vmul.f32 0.0625, %v643_v13  ;;  %v663_v22 = vmul.f32 %v619_v12, %v619_v12  ;;  %v661_v23 = vmul.f32 0.0625, %v657_v15  ;;  %v665_v24 = vmul.f32 %v621_v14, %v621_v14 }
 0x16c   :  { %v666_v25 = vsub.f32 %v658_v17, %v662_v18  ;;  %v668_v26 = vsub.f32 %v660_v19, %v664_v20  ;;  %v5833_v37 = vmov 1966171168   ;;  %v691_v39 = vlaneseq }
 0x16d   :  { %v667_v27 = vsub.f32 %v659_v21, %v663_v22  ;;  %v669_v28 = vsub.f32 %v661_v23, %v665_v24  ;;  %v689_v38 = vunpack.c.l.s4 %v5833_v37 }
 0x16e   :  { %v670_v29 = vmax.f32 %v666_v25, 0.0  ;;  %v672_v30 = vmax.f32 %v668_v26, 0.0  ;;  %v692_v41 = vshrl.u32 %v691_v39, 7 }
 0x16f   :  { %v671_v31 = vmax.f32 %v667_v27, 0.0  ;;  %v673_v32 = vmax.f32 %v669_v28, 0.0  ;;  %v690_v40 = vunpack.c.0.s8 %v689_v38 }
 0x170   :  { %v674_v33 = vadd.f32 1e-05, %v670_v29  ;;  %v676_v34 = vadd.f32 1e-05, %v672_v30  ;;  %v6122_v53 = vsub.s32 0, %v692_v41  ;;  %v6125_v59 = vsub.s32 1, %v692_v41 }
 0x171   :  { %v675_v35 = vadd.f32 1e-05, %v671_v31  ;;  %v677_v36 = vadd.f32 1e-05, %v673_v32  ;;  %v6115_v44 = vsub.s32 %v690_v40, %v692_v41  ;;  %v723_v60 = vsub.s32 2, %v692_v41 }
 0x172   :  { %5598 = vrsqrt.f32 %v674_v33  ;;  %v727_v61 = vsub.s32 3, %v692_v41 }
 0x173   :  { %5600 = vrsqrt.f32 %v676_v34 }
 0x174   :  { %5602 = vrsqrt.f32 %v675_v35 }
 0x175   :  { %5604 = vrsqrt.f32 %v677_v36 }
 0x17c   :  { %v5599_v42 = vpop.eup %5598 }
 0x17d   :  { %v5601_v43 = vpop.eup %5600 }
 0x17e   :  { %v5603_v45 = vpop.eup %5602 }
 0x17f   :  { %v5605_v46 = vpop.eup %5604  ;;  %v686_v47 = vcombine.low %v5599_v42, %v5603_v45 }
 0x180   :  { %v687_v48 = vcombine.low %v5601_v43, %v5605_v46 }
 0x181   :  { %v694_v49 = vrot.slane %v686_v47, %v6115_v44 }
 0x182   :  { %v701_v50 = vrot.slane %v687_v48, %v6115_v44 }
 0x184   :  { %v702_v51 = vcombine.low %v694_v49, %v701_v50 }
 0x186   :  { %v709_v54 = vrot.slane %v702_v51, %v6115_v44 }
 0x188   :  { %v711_v62 = vmul.f32 %v709_v54, %v70_v52 }
 0x18a   :  { %v716_v1 = vrot.slane %v711_v62, %v6122_v53  ;;  %v720_v2 = vrot.slane %v711_v62, %v6125_v59  ;;  %v724_v3 = vrot.slane %v711_v62, %v723_v60  ;;  %v728_v7 = vrot.slane %v711_v62, %v727_v61 }
 0x18c   :  { %v733_v11 = vmul.f32 %v716_v1, %v618_v4  ;;  %v734_v13 = vmul.f32 %v720_v2, %v619_v12  ;;  %v735_v15 = vmul.f32 %v724_v3, %v620_v9  ;;  %v736_v17 = vmul.f32 %v728_v7, %v621_v14 }
 0x18d   :  { %v770_v18 = vmul.f32 %v728_v7, %v6081_v58  ;;  %v774_v19 = vmul.f32 %v728_v7, %v6105_v6  ;;  %v768_v20 = vmul.f32 %v720_v2, %v6079_v57  ;;  %v772_v21 = vmul.f32 %v720_v2, %v6103_v5  ;;  %v71_v57 = vld [vmem:[%s7744_s1] sm:$0xf] }
 0x18e   :  { %v741_v22 = vcombine.low %v733_v11, %v734_v13  ;;  %v742_v23 = vcombine.low %v735_v15, %v736_v17  ;;  %v767_v24 = vmul.f32 %v716_v1, %v6075_v55  ;;  %v771_v25 = vmul.f32 %v716_v1, %v6091_v63 }
 0x18f   :  { %v769_v26 = vmul.f32 %v724_v3, %v6077_v56  ;;  %v773_v4 = vmul.f32 %v724_v3, %v6093_v0 }
 0x190   :  { %v749_v9 = vrot.slane %v741_v22, %v6115_v44  ;;  %v756_v58 = vrot.slane %v742_v23, %v6115_v44 }
 0x192   :  { %v757_v12 = vcombine.low %v749_v9, %v756_v58  ;;  %v5242_v9 = vld [vmem:[%s7742_s22 + $0x124] ss:$8 sps:$4 sm:$0xff]   ;;  %v5240_v58 = vld [vmem:[%s7742_s22 + $0x120] ss:$8 sps:$4 sm:$0xff]  }
 0x194   :  { %v764_v5 = vrot.slane %v757_v12, %v6115_v44  ;;  %v5245_v12 = vld [vmem:[%s7742_s22 + $0x134] ss:$8 sps:$4 sm:$0xff]  }
 0x196   :  { %v766_v6 = vsub.f32 %v71_v57, %v764_v5  ;;  %v5243_v57 = vld [vmem:[%s7742_s22 + $0x130] ss:$8 sps:$4 sm:$0xff]   ;;  %v5248_v5 = vld [vmem:[%s7742_s22 + $0x144] ss:$8 sps:$4 sm:$0xff]  }
 0x198   :  { %v791_v14 = vrot.slane %v766_v6, %v727_v61  ;;  %v783_v55 = vrot.slane %v766_v6, %v6125_v59  ;;  %v779_v63 = vrot.slane %v766_v6, %v6122_v53  ;;  %v787_v56 = vrot.slane %v766_v6, %v723_v60  ;;  %v5246_v6 = vld [vmem:[%s7742_s22 + $0x140] ss:$8 sps:$4 sm:$0xff]  }
 0x19a   :  { %v799_v27 = vadd.f32 %v791_v14, %v770_v18  ;;  %v803_v0 = vadd.f32 %v791_v14, %v774_v19  ;;  %v797_v28 = vadd.f32 %v783_v55, %v768_v20  ;;  %v801_v29 = vadd.f32 %v783_v55, %v772_v21  ;;  %v5234_v19 = vld [vmem:[%s7742_s22 + $0x100] ss:$8 sps:$4 sm:$0xff]   ;;  %v5251_v14 = vld [vmem:[%s7742_s22 + $0x154] ss:$8 sps:$4 sm:$0xff]   ;;  %v5249_v55 = vld [vmem:[%s7742_s22 + $0x150] ss:$8 sps:$4 sm:$0xff]  }
 0x19b   :  { %v796_v30 = vadd.f32 %v779_v63, %v767_v24  ;;  %v800_v31 = vadd.f32 %v779_v63, %v771_v25  ;;  %v798_v32 = vadd.f32 %v787_v56, %v769_v26  ;;  %v802_v33 = vadd.f32 %v787_v56, %v773_v4  ;;  %v5239_v24 = vld [vmem:[%s7742_s22 + $0x114] ss:$8 sps:$4 sm:$0xff]   ;;  %v5237_v4 = vld [vmem:[%s7742_s22 + $0x110] ss:$8 sps:$4 sm:$0xff]   ;;  %v5254_v63 = vld [vmem:[%s7742_s22 + $0x164] ss:$8 sps:$4 sm:$0xff]  }
 0x19c   :  { %v807_v34 = vmax.f32 %v799_v27, 0.0  ;;  %v811_v35 = vmax.f32 %v803_v0, 0.0  ;;  %v805_v36 = vmax.f32 %v797_v28, 0.0  ;;  %v809_v37 = vmax.f32 %v801_v29, 0.0  ;;  %v5252_v56 = vld [vmem:[%s7742_s22 + $0x160] ss:$8 sps:$4 sm:$0xff]  }
 0x19d   :  { %v804_v38 = vmax.f32 %v796_v30, 0.0  ;;  %v808_v39 = vmax.f32 %v800_v31, 0.0  ;;  %v806_v40 = vmax.f32 %v798_v32, 0.0  ;;  %v810_v41 = vmax.f32 %v802_v33, 0.0  ;;  %v5257_v27 = vld [vmem:[%s7742_s22 + $0x174] ss:$8 sps:$4 sm:$0xff]  }
 0x19e   :  { %v6145_v42 = vpack.c.bf16 %v811_v35, %v807_v34  ;;  %v6147_v43 = vpack.c.bf16 %v809_v37, %v805_v36  ;;  %v5255_v0 = vld [vmem:[%s7742_s22 + $0x170] ss:$8 sps:$4 sm:$0xff]   ;;  %v5260_v28 = vld [vmem:[%s7742_s22 + $0x184] ss:$8 sps:$4 sm:$0xff]   ;;  %v5258_v29 = vld [vmem:[%s7742_s22 + $0x180] ss:$8 sps:$4 sm:$0xff]  }
 0x19f   :  { %v6149_v45 = vpack.c.bf16 %v808_v39, %v804_v38  ;;  %v6151_v46 = vpack.c.bf16 %v810_v41, %v806_v40  ;;  %v5263_v30 = vld [vmem:[%s7742_s22 + $0x194] ss:$8 sps:$4 sm:$0xff]   ;;  %v5261_v31 = vld [vmem:[%s7742_s22 + $0x190] ss:$8 sps:$4 sm:$0xff]   ;;  %v5266_v32 = vld [vmem:[%s7742_s22 + $0x1a4] ss:$8 sps:$4 sm:$0xff]  }
 0x1a0   :  { %v824_v47 = vshrl.u32 %v6147_v43, 16  ;;  %v827_v48 = vshll.u32 %v6147_v43, 16  ;;  %v838_v49 = vshrl.u32 %v6145_v42, 16  ;;  %v841_v50 = vshll.u32 %v6145_v42, 16  ;;  %v5264_v33 = vld [vmem:[%s7742_s22 + $0x1a0] ss:$8 sps:$4 sm:$0xff]  }
 0x1a1   :  { %v817_v51 = vshrl.u32 %v6149_v45, 16  ;;  %v820_v52 = vshll.u32 %v6149_v45, 16  ;;  %v834_v54 = vshll.u32 %v6151_v46, 16  ;;  %v831_v3 = vshrl.u32 %v6151_v46, 16  ;;  %v5269_v34 = vld [vmem:[%s7742_s22 + $0x1b4] ss:$8 sps:$4 sm:$0xff]  }
 0x1a2   :  { %v826_v60 = vrot.slane %v824_v47, 7  ;;  %v840_v61 = vrot.slane %v838_v49, 7  ;;  %v854_v62 = vrot.slane %v827_v48, 1  ;;  %v858_v1 = vrot.slane %v841_v50, 1  ;;  %v5267_v35 = vld [vmem:[%s7742_s22 + $0x1b0] ss:$8 sps:$4 sm:$0xff]  }
 0x1a3   :  { %v819_v2 = vrot.slane %v817_v51, 7  ;;  %v852_v7 = vrot.slane %v820_v52, 1  ;;  %v856_v11 = vrot.slane %v834_v54, 1  ;;  %v5272_v36 = vld [vmem:[%s7742_s22 + $0x1c4] ss:$8 sps:$4 sm:$0xff]  }
 0x1a4   :  { %v829_v13 = vor.u32 %v827_v48, %v826_v60  ;;  %v843_v15 = vor.u32 %v841_v50, %v840_v61  ;;  %v6163_v17 = vor.u32 %v854_v62, %v824_v47  ;;  %v6165_v18 = vor.u32 %v858_v1, %v838_v49  ;;  %v5270_v37 = vld [vmem:[%s7742_s22 + $0x1c0] ss:$8 sps:$4 sm:$0xff]   ;;  %v5275_v38 = vld [vmem:[%s7742_s22 + $0x1d4] ss:$8 sps:$4 sm:$0xff]   ;;  %v5273_v39 = vld [vmem:[%s7742_s22 + $0x1d0] ss:$8 sps:$4 sm:$0xff]  }
 0x1a5   :  { %v822_v20 = vor.u32 %v820_v52, %v819_v2  ;;  %v6170_v21 = vor.u32 %v852_v7, %v817_v51  ;;  %v6174_v22 = vor.u32 %v856_v11, %v831_v3  ;;  %v5278_v40 = vld [vmem:[%s7742_s22 + $0x1e4] ss:$8 sps:$4 sm:$0xff]   ;;  %v5276_v41 = vld [vmem:[%s7742_s22 + $0x1e0] ss:$8 sps:$4 sm:$0xff]   ;;  %v5281_v47 = vld [vmem:[%s7742_s22 + $0x1f4] ss:$8 sps:$4 sm:$0xff]  }
 0x1a6   :  { %v849_v23 = vsel %vm5970_vm6, 0, %v829_v13  ;;  %v851_v26 = vsel %vm5970_vm6, 0, %v843_v15  ;;  %v833_v48 = vrot.slane %v831_v3, 7  ;;  %v5279_v49 = vld [vmem:[%s7742_s22 + $0x1f0] ss:$8 sps:$4 sm:$0xff]  }
 0x1a7   :  { %1860 = vmatprep.mubr.bf16.mxu0 %v849_v23  ;;  %v848_v25 = vsel %vm5970_vm6, 0, %v822_v20  ;;  %v5284_v50 = vld [vmem:[%s7742_s22 + $0x204] ss:$8 sps:$4 sm:$0xff]   ;;  %v5282_v52 = vld [vmem:[%s7742_s22 + $0x200] ss:$8 sps:$4 sm:$0xff]  }
 0x1a8   :  { %1861 = vmatmul.mubr.bf16.vlgmr.msra.gmra.mrb[4].mxu0 %v848_v25  ;;  %v836_v51 = vor.u32 %v834_v54, %v833_v48  ;;  %v5287_v60 = vld [vmem:[%s7742_s22 + $0x214] ss:$8 sps:$4 sm:$0xff]   ;;  %v5285_v54 = vld [vmem:[%s7742_s22 + $0x210] ss:$8 sps:$4 sm:$0xff]   ;;  %v5290_v62 = vld [vmem:[%s7742_s22 + $0x224] ss:$8 sps:$4 sm:$0xff]  }
 0x1a9   :  { %1872 = vmatpush1.bf16.msra.mxu0 %v5234_v19  ;;  %1903 = vmatprep.mubr.bf16.mxu0 %v851_v26  ;;  %v5288_v1 = vld [vmem:[%s7742_s22 + $0x220] ss:$8 sps:$4 sm:$0xff]   ;;  %v5293_v2 = vld [vmem:[%s7742_s22 + $0x234] ss:$8 sps:$4 sm:$0xff]   ;;  %v5296_v3 = vld [vmem:[%s7742_s22 + $0x244] ss:$8 sps:$4 sm:$0xff]  }
 0x1aa   :  { %1873 = vmatprep.subr.bf16.mxu0 %v5239_v24  ;;  %v850_v61 = vsel %vm5970_vm6, 0, %v836_v51  ;;  %v5294_v7 = vld [vmem:[%s7742_s22 + $0x240] ss:$8 sps:$4 sm:$0xff]   ;;  %v5299_v11 = vld [vmem:[%s7742_s22 + $0x254] ss:$8 sps:$4 sm:$0xff]  }
 0x1ab   :  { %v5297_v13 = vld [vmem:[%s7742_s22 + $0x250] ss:$8 sps:$4 sm:$0xff]   ;;  %v5302_v15 = vld [vmem:[%s7742_s22 + $0x264] ss:$8 sps:$4 sm:$0xff]   ;;  %v5300_v19 = vld [vmem:[%s7742_s22 + $0x260] ss:$8 sps:$4 sm:$0xff]  }
 0x1ac   :  { %v5305_v20 = vld [vmem:[%s7742_s22 + $0x274] ss:$8 sps:$4 sm:$0xff]   ;;  %v5303_v23 = vld [vmem:[%s7742_s22 + $0x270] ss:$8 sps:$4 sm:$0xff]   ;;  %v5308_v24 = vld [vmem:[%s7742_s22 + $0x284] ss:$8 sps:$4 sm:$0xff]  }
 0x1ad   :  { %1874 = vmatpush1.bf16.msra.mxu0 %v5237_v4  ;;  %v5306_v25 = vld [vmem:[%s7742_s22 + $0x280] ss:$8 sps:$4 sm:$0xff]   ;;  %v5311_v26 = vld [vmem:[%s7742_s22 + $0x294] ss:$8 sps:$4 sm:$0xff]   ;;  %v5309_v4 = vld [vmem:[%s7742_s22 + $0x290] ss:$8 sps:$4 sm:$0xff]  }
 0x1ae   :  { %1875 = vmatprep.subr.bf16.mxu0 %v5242_v9  ;;  %v5314_v9 = vld [vmem:[%s7742_s22 + $0x2a4] ss:$8 sps:$4 sm:$0xff]   ;;  %v5354_v48 = vld [vmem:[%s7742_s22 + $0x380] ss:$8 sps:$4 sm:$0xff]  }
 0x1af   :  { %v5362_v51 = vld [vmem:[%s7742_s22 + $0x3a4] ss:$8 sps:$4 sm:$0xff]  }
 0x1b1   :  { %1876 = vmatpush1.bf16.msra.mxu0 %v5240_v58  ;;  %v5312_v58 = vld [vmem:[%s7742_s22 + $0x2a0] ss:$8 sps:$4 sm:$0xff]  }
 0x1b2   :  { %1877 = vmatprep.subr.bf16.mxu0 %v5245_v12  ;;  %v5317_v12 = vld [vmem:[%s7742_s22 + $0x2b4] ss:$8 sps:$4 sm:$0xff]  }
 0x1b5   :  { %1878 = vmatpush1.bf16.msra.mxu0 %v5243_v57  ;;  %v5315_v57 = vld [vmem:[%s7742_s22 + $0x2b0] ss:$8 sps:$4 sm:$0xff]  }
 0x1b6   :  { %1879 = vmatprep.subr.bf16.mxu0 %v5248_v5  ;;  %v5320_v5 = vld [vmem:[%s7742_s22 + $0x2c4] ss:$8 sps:$4 sm:$0xff]  }
 0x1b9   :  { %1880 = vmatpush1.bf16.msra.mxu0 %v5246_v6  ;;  %v5318_v6 = vld [vmem:[%s7742_s22 + $0x2c0] ss:$8 sps:$4 sm:$0xff]  }
 0x1ba   :  { %1881 = vmatprep.subr.bf16.mxu0 %v5251_v14  ;;  %v5323_v14 = vld [vmem:[%s7742_s22 + $0x2d4] ss:$8 sps:$4 sm:$0xff]  }
 0x1bd   :  { %1882 = vmatpush1.bf16.msra.mxu0 %v5249_v55  ;;  %v5321_v55 = vld [vmem:[%s7742_s22 + $0x2d0] ss:$8 sps:$4 sm:$0xff]  }
 0x1be   :  { %1883 = vmatprep.subr.bf16.mxu0 %v5254_v63  ;;  %v5326_v63 = vld [vmem:[%s7742_s22 + $0x2e4] ss:$8 sps:$4 sm:$0xff]  }
 0x1c1   :  { %1884 = vmatpush1.bf16.msra.mxu0 %v5252_v56  ;;  %v5324_v56 = vld [vmem:[%s7742_s22 + $0x2e0] ss:$8 sps:$4 sm:$0xff]  }
 0x1c2   :  { %1885 = vmatprep.subr.bf16.mxu0 %v5257_v27  ;;  %v5329_v27 = vld [vmem:[%s7742_s22 + $0x2f4] ss:$8 sps:$4 sm:$0xff]  }
 0x1c5   :  { %1886 = vmatpush1.bf16.msra.mxu0 %v5255_v0  ;;  %v5327_v0 = vld [vmem:[%s7742_s22 + $0x2f0] ss:$8 sps:$4 sm:$0xff]  }
 0x1c6   :  { %1887 = vmatprep.subr.bf16.mxu0 %v5260_v28  ;;  %v5332_v28 = vld [vmem:[%s7742_s22 + $0x304] ss:$8 sps:$4 sm:$0xff]  }
 0x1c9   :  { %1888 = vmatpush1.bf16.msra.mxu0 %v5258_v29  ;;  %v5330_v29 = vld [vmem:[%s7742_s22 + $0x300] ss:$8 sps:$4 sm:$0xff]  }
 0x1ca   :  { %1889 = vmatprep.subr.bf16.mxu0 %v5263_v30  ;;  %v5335_v30 = vld [vmem:[%s7742_s22 + $0x314] ss:$8 sps:$4 sm:$0xff]  }
 0x1cd   :  { %1890 = vmatpush1.bf16.msra.mxu0 %v5261_v31  ;;  %v5333_v31 = vld [vmem:[%s7742_s22 + $0x310] ss:$8 sps:$4 sm:$0xff]  }
 0x1ce   :  { %1891 = vmatprep.subr.bf16.mxu0 %v5266_v32  ;;  %v5338_v32 = vld [vmem:[%s7742_s22 + $0x324] ss:$8 sps:$4 sm:$0xff]  }
 0x1d1   :  { %1892 = vmatpush1.bf16.msra.mxu0 %v5264_v33  ;;  %v5336_v33 = vld [vmem:[%s7742_s22 + $0x320] ss:$8 sps:$4 sm:$0xff]  }
 0x1d2   :  { %1893 = vmatprep.subr.bf16.mxu0 %v5269_v34  ;;  %v5344_v34 = vld [vmem:[%s7742_s22 + $0x344] ss:$8 sps:$4 sm:$0xff]  }
 0x1d5   :  { %1894 = vmatpush1.bf16.msra.mxu0 %v5267_v35  ;;  %v5342_v35 = vld [vmem:[%s7742_s22 + $0x340] ss:$8 sps:$4 sm:$0xff]  }
 0x1d6   :  { %1895 = vmatprep.subr.bf16.mxu0 %v5272_v36  ;;  %v5347_v36 = vld [vmem:[%s7742_s22 + $0x354] ss:$8 sps:$4 sm:$0xff]  }
 0x1d9   :  { %1896 = vmatpush1.bf16.msra.mxu0 %v5270_v37  ;;  %v5345_v37 = vld [vmem:[%s7742_s22 + $0x350] ss:$8 sps:$4 sm:$0xff]  }
 0x1da   :  { %1897 = vmatprep.subr.bf16.mxu0 %v5275_v38  ;;  %v5350_v38 = vld [vmem:[%s7742_s22 + $0x364] ss:$8 sps:$4 sm:$0xff]  }
 0x1dd   :  { %1898 = vmatpush1.bf16.msra.mxu0 %v5273_v39  ;;  %v5348_v39 = vld [vmem:[%s7742_s22 + $0x360] ss:$8 sps:$4 sm:$0xff]  }
 0x1de   :  { %1899 = vmatprep.subr.bf16.mxu0 %v5278_v40  ;;  %v5353_v40 = vld [vmem:[%s7742_s22 + $0x374] ss:$8 sps:$4 sm:$0xff]  }
 0x1e1   :  { %1900 = vmatpush1.bf16.msra.mxu0 %v5276_v41  ;;  %v5351_v41 = vld [vmem:[%s7742_s22 + $0x370] ss:$8 sps:$4 sm:$0xff]  }
 0x1e2   :  { %1901 = vmatprep.subr.bf16.mxu0 %v5281_v47  ;;  %v5356_v47 = vld [vmem:[%s7742_s22 + $0x384] ss:$8 sps:$4 sm:$0xff]  }
 0x1e5   :  { %1902 = vmatpush1.bf16.msra.mxu0 %v5279_v49  ;;  %v5359_v49 = vld [vmem:[%s7742_s22 + $0x394] ss:$8 sps:$4 sm:$0xff]  }
 0x1e6   :  { %1914 = vmatprep.subr.bf16.mxu0 %v5284_v50  ;;  %v5357_v50 = vld [vmem:[%s7742_s22 + $0x390] ss:$8 sps:$4 sm:$0xff]  }
 0x1e8   :  { %1904 = vmatmul.mubr.bf16.vlgmr.msra.gmra.mrb[4].mxu0 %v850_v61  ;;  %v5363_v61 = vld [vmem:[%s7742_s22 + $0x3b0] ss:$8 sps:$4 sm:$0xff]  }
 0x1e9   :  { %1915 = vmatpush1.bf16.msra.mxu0 %v5282_v52  ;;  %1946 = vmatprep.mubr.bf16.mxu0 %v6147_v43  ;;  %v5291_v43 = vld [vmem:[%s7742_s22 + $0x230] ss:$8 sps:$4 sm:$0xff]   ;;  %v5360_v52 = vld [vmem:[%s7742_s22 + $0x3a0] ss:$8 sps:$4 sm:$0xff]  }
 0x1ea   :  { %1916 = vmatprep.subr.bf16.mxu0 %v5287_v60  ;;  %v5365_v60 = vld [vmem:[%s7742_s22 + $0x3b4] ss:$8 sps:$4 sm:$0xff]  }
 0x1ed   :  { %1917 = vmatpush1.bf16.msra.mxu0 %v5285_v54  ;;  %v5368_v54 = vld [vmem:[%s7742_s22 + $0x3c4] ss:$8 sps:$4 sm:$0xff]  }
 0x1ee   :  { %1918 = vmatprep.subr.bf16.mxu0 %v5290_v62  ;;  %v5366_v62 = vld [vmem:[%s7742_s22 + $0x3c0] ss:$8 sps:$4 sm:$0xff]  }
 0x1f1   :  { %1919 = vmatpush1.bf16.msra.mxu0 %v5288_v1  ;;  %v5371_v1 = vld [vmem:[%s7742_s22 + $0x3d4] ss:$8 sps:$4 sm:$0xff]  }
 0x1f2   :  { %1920 = vmatprep.subr.bf16.mxu0 %v5293_v2  ;;  %v5369_v2 = vld [vmem:[%s7742_s22 + $0x3d0] ss:$8 sps:$4 sm:$0xff]  }
 0x1f5   :  { %1921 = vmatpush1.bf16.msra.mxu0 %v5291_v43  ;;  %v5374_v43 = vld [vmem:[%s7742_s22 + $0x3e4] ss:$8 sps:$4 sm:$0xff]  }
 0x1f6   :  { %1922 = vmatprep.subr.bf16.mxu0 %v5296_v3  ;;  %v5372_v3 = vld [vmem:[%s7742_s22 + $0x3e0] ss:$8 sps:$4 sm:$0xff]  }
 0x1f9   :  { %1923 = vmatpush1.bf16.msra.mxu0 %v5294_v7  ;;  %v5377_v7 = vld [vmem:[%s7742_s22 + $0x3f4] ss:$8 sps:$4 sm:$0xff]  }
 0x1fa   :  { %1924 = vmatprep.subr.bf16.mxu0 %v5299_v11  ;;  %v5375_v11 = vld [vmem:[%s7742_s22 + $0x3f0] ss:$8 sps:$4 sm:$0xff]  }
 0x1fd   :  { %1925 = vmatpush1.bf16.msra.mxu0 %v5297_v13  ;;  %v5380_v13 = vld [vmem:[%s7742_s22 + $0x404] ss:$8 sps:$4 sm:$0xff]  }
 0x1fe   :  { %1926 = vmatprep.subr.bf16.mxu0 %v5302_v15  ;;  %v5378_v15 = vld [vmem:[%s7742_s22 + $0x400] ss:$8 sps:$4 sm:$0xff]  }
 0x201   :  { %1927 = vmatpush1.bf16.msra.mxu0 %v5300_v19  ;;  %v5383_v19 = vld [vmem:[%s7742_s22 + $0x414] ss:$8 sps:$4 sm:$0xff]  }
 0x202   :  { %1928 = vmatprep.subr.bf16.mxu0 %v5305_v20  ;;  %v865_v20 = vsel %vm5955_vm3, %v6163_v17, 0  ;;  %v5389_v17 = vld [vmem:[%s7742_s22 + $0x434] ss:$8 sps:$4 sm:$0xff]  }
 0x205   :  { %1929 = vmatpush1.bf16.msra.mxu0 %v5303_v23  ;;  %v5381_v23 = vld [vmem:[%s7742_s22 + $0x410] ss:$8 sps:$4 sm:$0xff]  }
 0x206   :  { %1930 = vmatprep.subr.bf16.mxu0 %v5308_v24  ;;  %v5386_v24 = vld [vmem:[%s7742_s22 + $0x424] ss:$8 sps:$4 sm:$0xff]  }
 0x209   :  { %1931 = vmatpush1.bf16.msra.mxu0 %v5306_v25  ;;  %v5387_v25 = vld [vmem:[%s7742_s22 + $0x430] ss:$8 sps:$4 sm:$0xff]  }
 0x20a   :  { %1932 = vmatprep.subr.bf16.mxu0 %v5311_v26  ;;  %v5392_v26 = vld [vmem:[%s7742_s22 + $0x444] ss:$8 sps:$4 sm:$0xff]  }
 0x20d   :  { %1933 = vmatpush1.bf16.msra.mxu0 %v5309_v4  ;;  %v5390_v4 = vld [vmem:[%s7742_s22 + $0x440] ss:$8 sps:$4 sm:$0xff]  }
 0x20e   :  { %1934 = vmatprep.subr.bf16.mxu0 %v5314_v9  ;;  %v5395_v9 = vld [vmem:[%s7742_s22 + $0x454] ss:$8 sps:$4 sm:$0xff]  }
 0x211   :  { %1935 = vmatpush1.bf16.msra.mxu0 %v5312_v58  ;;  %v5393_v58 = vld [vmem:[%s7742_s22 + $0x450] ss:$8 sps:$4 sm:$0xff]  }
 0x212   :  { %1936 = vmatprep.subr.bf16.mxu0 %v5317_v12  ;;  %v5398_v12 = vld [vmem:[%s7742_s22 + $0x464] ss:$8 sps:$4 sm:$0xff]  }
 0x215   :  { %1937 = vmatpush1.bf16.msra.mxu0 %v5315_v57  ;;  %v5396_v57 = vld [vmem:[%s7742_s22 + $0x460] ss:$8 sps:$4 sm:$0xff]  }
 0x216   :  { %1938 = vmatprep.subr.bf16.mxu0 %v5320_v5  ;;  %v5401_v5 = vld [vmem:[%s7742_s22 + $0x474] ss:$8 sps:$4 sm:$0xff]  }
 0x219   :  { %1939 = vmatpush1.bf16.msra.mxu0 %v5318_v6  ;;  %v5399_v6 = vld [vmem:[%s7742_s22 + $0x470] ss:$8 sps:$4 sm:$0xff]  }
 0x21a   :  { %1940 = vmatprep.subr.bf16.mxu0 %v5323_v14  ;;  %v5404_v14 = vld [vmem:[%s7742_s22 + $0x484] ss:$8 sps:$4 sm:$0xff]  }
 0x21d   :  { %1941 = vmatpush1.bf16.msra.mxu0 %v5321_v55  ;;  %v5402_v55 = vld [vmem:[%s7742_s22 + $0x480] ss:$8 sps:$4 sm:$0xff]  }
 0x21e   :  { %1942 = vmatprep.subr.bf16.mxu0 %v5326_v63  ;;  %v5407_v63 = vld [vmem:[%s7742_s22 + $0x494] ss:$8 sps:$4 sm:$0xff]  }
 0x221   :  { %1943 = vmatpush1.bf16.msra.mxu0 %v5324_v56  ;;  %v5405_v56 = vld [vmem:[%s7742_s22 + $0x490] ss:$8 sps:$4 sm:$0xff]  }
 0x222   :  { %1944 = vmatprep.subr.bf16.mxu0 %v5329_v27  ;;  %v5410_v27 = vld [vmem:[%s7742_s22 + $0x4a4] ss:$8 sps:$4 sm:$0xff]  }
 0x225   :  { %1945 = vmatpush1.bf16.msra.mxu0 %v5327_v0  ;;  %v5408_v0 = vld [vmem:[%s7742_s22 + $0x4a0] ss:$8 sps:$4 sm:$0xff]  }
 0x226   :  { %1957 = vmatprep.subr.bf16.mxu0 %v5332_v28  ;;  %v5413_v28 = vld [vmem:[%s7742_s22 + $0x4b4] ss:$8 sps:$4 sm:$0xff]  }
 0x228   :  { %1947 = vmatmul.mubr.bf16.vlgmr.msra.gmra.mrb[4].mxu0 %v6149_v45  ;;  %v5341_v45 = vld [vmem:[%s7742_s22 + $0x334] ss:$8 sps:$4 sm:$0xff]  }
 0x229   :  { %1958 = vmatpush1.bf16.msra.mxu0 %v5330_v29  ;;  %1989 = vmatprep.mubr.bf16.mxu0 %v6145_v42  ;;  %v5339_v42 = vld [vmem:[%s7742_s22 + $0x330] ss:$8 sps:$4 sm:$0xff]  }
 0x22a   :  { %1959 = vmatprep.subr.bf16.mxu0 %v5335_v30  ;;  %v5411_v29 = vld [vmem:[%s7742_s22 + $0x4b0] ss:$8 sps:$4 sm:$0xff]   ;;  %v5416_v30 = vld [vmem:[%s7742_s22 + $0x4c4] ss:$8 sps:$4 sm:$0xff]  }
 0x22d   :  { %1960 = vmatpush1.bf16.msra.mxu0 %v5333_v31  ;;  %v5414_v31 = vld [vmem:[%s7742_s22 + $0x4c0] ss:$8 sps:$4 sm:$0xff]  }
 0x22e   :  { %1961 = vmatprep.subr.bf16.mxu0 %v5338_v32  ;;  %v5419_v32 = vld [vmem:[%s7742_s22 + $0x4d4] ss:$8 sps:$4 sm:$0xff]  }
 0x231   :  { %1962 = vmatpush1.bf16.msra.mxu0 %v5336_v33  ;;  %v5417_v33 = vld [vmem:[%s7742_s22 + $0x4d0] ss:$8 sps:$4 sm:$0xff]  }
 0x232   :  { %1963 = vmatprep.subr.bf16.mxu0 %v5341_v45  ;;  %v5422_v45 = vld [vmem:[%s7742_s22 + $0x4e4] ss:$8 sps:$4 sm:$0xff]  }
 0x235   :  { %1964 = vmatpush1.bf16.msra.mxu0 %v5339_v42  ;;  %v5420_v42 = vld [vmem:[%s7742_s22 + $0x4e0] ss:$8 sps:$4 sm:$0xff]  }
 0x236   :  { %1965 = vmatprep.subr.bf16.mxu0 %v5344_v34  ;;  %v5425_v34 = vld [vmem:[%s7742_s22 + $0x4f4] ss:$8 sps:$4 sm:$0xff]  }
 0x239   :  { %1966 = vmatpush1.bf16.msra.mxu0 %v5342_v35  ;;  %v5423_v35 = vld [vmem:[%s7742_s22 + $0x4f0] ss:$8 sps:$4 sm:$0xff]  }
 0x23a   :  { %1967 = vmatprep.subr.bf16.mxu0 %v5347_v36  ;;  %v5428_v36 = vld [vmem:[%s7742_s22 + $0x504] ss:$8 sps:$4 sm:$0xff]  }
 0x23d   :  { %1968 = vmatpush1.bf16.msra.mxu0 %v5345_v37  ;;  %v5426_v37 = vld [vmem:[%s7742_s22 + $0x500] ss:$8 sps:$4 sm:$0xff]  }
 0x23e   :  { %1969 = vmatprep.subr.bf16.mxu0 %v5350_v38  ;;  %v5431_v38 = vld [vmem:[%s7742_s22 + $0x514] ss:$8 sps:$4 sm:$0xff]  }
 0x241   :  { %1970 = vmatpush1.bf16.msra.mxu0 %v5348_v39  ;;  %v864_v39 = vsel %vm5955_vm3, %v6170_v21, 0  ;;  %v5432_v21 = vld [vmem:[%s7742_s22 + $0x520] ss:$8 sps:$4 sm:$0xff]  }
 0x242   :  { %1971 = vmatprep.subr.bf16.mxu0 %v5353_v40  ;;  %v867_v40 = vsel %vm5955_vm3, %v6165_v18, 0  ;;  %v5437_v18 = vld [vmem:[%s7742_s22 + $0x534] ss:$8 sps:$4 sm:$0xff]  }
 0x245   :  { %1972 = vmatpush1.bf16.msra.mxu0 %v5351_v41  ;;  %v5429_v41 = vld [vmem:[%s7742_s22 + $0x510] ss:$8 sps:$4 sm:$0xff]  }
 0x246   :  { %1973 = vmatprep.subr.bf16.mxu0 %v5356_v47  ;;  %v5434_v47 = vld [vmem:[%s7742_s22 + $0x524] ss:$8 sps:$4 sm:$0xff]  }
 0x249   :  { %1974 = vmatpush1.bf16.msra.mxu0 %v5354_v48  ;;  %v5435_v48 = vld [vmem:[%s7742_s22 + $0x530] ss:$8 sps:$4 sm:$0xff]  }
 0x24a   :  { %1975 = vmatprep.subr.bf16.mxu0 %v5359_v49  ;;  %v5440_v49 = vld [vmem:[%s7742_s22 + $0x544] ss:$8 sps:$4 sm:$0xff]  }
 0x24d   :  { %1976 = vmatpush1.bf16.msra.mxu0 %v5357_v50  ;;  %v5438_v50 = vld [vmem:[%s7742_s22 + $0x540] ss:$8 sps:$4 sm:$0xff]  }
 0x24e   :  { %1977 = vmatprep.subr.bf16.mxu0 %v5362_v51  ;;  %v5443_v51 = vld [vmem:[%s7742_s22 + $0x554] ss:$8 sps:$4 sm:$0xff]  }
 0x251   :  { %1978 = vmatpush1.bf16.msra.mxu0 %v5360_v52  ;;  %v5441_v52 = vld [vmem:[%s7742_s22 + $0x550] ss:$8 sps:$4 sm:$0xff]  }
 0x252   :  { %1979 = vmatprep.subr.bf16.mxu0 %v5365_v60  ;;  %v5446_v60 = vld [vmem:[%s7742_s22 + $0x564] ss:$8 sps:$4 sm:$0xff]  }
 0x255   :  { %1980 = vmatpush1.bf16.msra.mxu0 %v5363_v61  ;;  %v5444_v61 = vld [vmem:[%s7742_s22 + $0x560] ss:$8 sps:$4 sm:$0xff]  }
 0x256   :  { %1981 = vmatprep.subr.bf16.mxu0 %v5368_v54  ;;  %v5449_v54 = vld [vmem:[%s7742_s22 + $0x574] ss:$8 sps:$4 sm:$0xff]  }
 0x259   :  { %1982 = vmatpush1.bf16.msra.mxu0 %v5366_v62  ;;  %v5447_v62 = vld [vmem:[%s7742_s22 + $0x570] ss:$8 sps:$4 sm:$0xff]  }
 0x25a   :  { %1983 = vmatprep.subr.bf16.mxu0 %v5371_v1  ;;  %v5452_v1 = vld [vmem:[%s7742_s22 + $0x584] ss:$8 sps:$4 sm:$0xff]  }
 0x25d   :  { %1984 = vmatpush1.bf16.msra.mxu0 %v5369_v2  ;;  %v5450_v2 = vld [vmem:[%s7742_s22 + $0x580] ss:$8 sps:$4 sm:$0xff]  }
 0x25e   :  { %1985 = vmatprep.subr.bf16.mxu0 %v5374_v43  ;;  %v5455_v43 = vld [vmem:[%s7742_s22 + $0x594] ss:$8 sps:$4 sm:$0xff]  }
 0x261   :  { %1986 = vmatpush1.bf16.msra.mxu0 %v5372_v3  ;;  %v5453_v3 = vld [vmem:[%s7742_s22 + $0x590] ss:$8 sps:$4 sm:$0xff]  }
 0x262   :  { %1987 = vmatprep.subr.bf16.mxu0 %v5377_v7  ;;  %v5458_v7 = vld [vmem:[%s7742_s22 + $0x5a4] ss:$8 sps:$4 sm:$0xff]  }
 0x265   :  { %1988 = vmatpush1.bf16.msra.mxu0 %v5375_v11  ;;  %v5456_v11 = vld [vmem:[%s7742_s22 + $0x5a0] ss:$8 sps:$4 sm:$0xff]  }
 0x266   :  { %2000 = vmatprep.subr.bf16.mxu0 %v5380_v13  ;;  %v5461_v13 = vld [vmem:[%s7742_s22 + $0x5b4] ss:$8 sps:$4 sm:$0xff]  }
 0x268   :  { %1990 = vmatmul.mubr.bf16.vlgmr.msra.gmra.mrb[4].mxu0 %v6151_v46  ;;  %v5384_v46 = vld [vmem:[%s7742_s22 + $0x420] ss:$8 sps:$4 sm:$0xff]  }
 0x269   :  { %2001 = vmatpush1.bf16.msra.mxu0 %v5378_v15  ;;  %2032 = vmatprep.mubr.bf16.mxu0 %v865_v20  ;;  %v5459_v15 = vld [vmem:[%s7742_s22 + $0x5b0] ss:$8 sps:$4 sm:$0xff]   ;;  %v5462_v20 = vld [vmem:[%s7742_s22 + $0x5c0] ss:$8 sps:$4 sm:$0xff]  }
 0x26a   :  { %2002 = vmatprep.subr.bf16.mxu0 %v5383_v19  ;;  %v5464_v19 = vld [vmem:[%s7742_s22 + $0x5c4] ss:$8 sps:$4 sm:$0xff]  }
 0x26d   :  { %2003 = vmatpush1.bf16.msra.mxu0 %v5381_v23  ;;  %v5467_v23 = vld [vmem:[%s7742_s22 + $0x5d4] ss:$8 sps:$4 sm:$0xff]  }
 0x26e   :  { %2004 = vmatprep.subr.bf16.mxu0 %v5386_v24  ;;  %v5465_v24 = vld [vmem:[%s7742_s22 + $0x5d0] ss:$8 sps:$4 sm:$0xff]  }
 0x271   :  { %2005 = vmatpush1.bf16.msra.mxu0 %v5384_v46  ;;  %v5470_v46 = vld [vmem:[%s7742_s22 + $0x5e4] ss:$8 sps:$4 sm:$0xff]  }
 0x272   :  { %2006 = vmatprep.subr.bf16.mxu0 %v5389_v17  ;;  %v5468_v17 = vld [vmem:[%s7742_s22 + $0x5e0] ss:$8 sps:$4 sm:$0xff]  }
 0x275   :  { %2007 = vmatpush1.bf16.msra.mxu0 %v5387_v25  ;;  %v5473_v25 = vld [vmem:[%s7742_s22 + $0x5f4] ss:$8 sps:$4 sm:$0xff]  }
 0x276   :  { %2008 = vmatprep.subr.bf16.mxu0 %v5392_v26  ;;  %v5471_v26 = vld [vmem:[%s7742_s22 + $0x5f0] ss:$8 sps:$4 sm:$0xff]  }
 0x279   :  { %2009 = vmatpush1.bf16.msra.mxu0 %v5390_v4  ;;  %v866_v4 = vsel %vm5955_vm3, %v6174_v22, 0  ;;  %v5477_v22 = vld [vmem:[%s7713_s7 + $0x8] sm:$0xff]  }
 0x27a   :  { %2010 = vmatprep.subr.bf16.mxu0 %v5395_v9  ;;  %v5474_v9 = vld [vmem:[%s7713_s7 + $0x40] sm:$0xff]  }
 0x27b   :  { %5018 = vmatprep.subr.bf16.mxu1 %v5474_v9 }
 0x27d   :  { %2011 = vmatpush1.bf16.msra.mxu0 %v5393_v58  ;;  %v5475_v58 = vld [vmem:[%s7713_s7] sm:$0xff]  }
 0x27e   :  { %2012 = vmatprep.subr.bf16.mxu0 %v5398_v12  ;;  %5019 = vmatpush3.bf16.msra.mxu1 %v5475_v58  ;;  %v5476_v12 = vld [vmem:[%s7713_s7 + $0x48] sm:$0xff]  }
 0x27f   :  { %5020 = vmatprep.subr.bf16.mxu1 %v5476_v12 }
 0x281   :  { %2013 = vmatpush1.bf16.msra.mxu0 %v5396_v57  ;;  %v5478_v57 = vld [vmem:[%s7713_s7 + $0x50] sm:$0xff]  }
 0x282   :  { %2014 = vmatprep.subr.bf16.mxu0 %v5401_v5  ;;  %5021 = vmatpush3.bf16.msra.mxu1 %v5477_v22  ;;  %v5479_v5 = vld [vmem:[%s7713_s7 + $0x10] sm:$0xff]  }
 0x283   :  { %5022 = vmatprep.subr.bf16.mxu1 %v5478_v57 }
 0x285   :  { %2015 = vmatpush1.bf16.msra.mxu0 %v5399_v6  ;;  %v5480_v6 = vld [vmem:[%s7713_s7 + $0x58] sm:$0xff]  }
 0x286   :  { %2016 = vmatprep.subr.bf16.mxu0 %v5404_v14  ;;  %5023 = vmatpush3.bf16.msra.mxu1 %v5479_v5  ;;  %v5481_v14 = vld [vmem:[%s7713_s7 + $0x18] sm:$0xff]  }
 0x287   :  { %5024 = vmatprep.subr.bf16.mxu1 %v5480_v6 }
 0x289   :  { %2017 = vmatpush1.bf16.msra.mxu0 %v5402_v55  ;;  %v5482_v55 = vld [vmem:[%s7713_s7 + $0x60] sm:$0xff]  }
 0x28a   :  { %2018 = vmatprep.subr.bf16.mxu0 %v5407_v63  ;;  %5025 = vmatpush3.bf16.msra.mxu1 %v5481_v14  ;;  %v5483_v63 = vld [vmem:[%s7713_s7 + $0x20] sm:$0xff]  }
 0x28b   :  { %5026 = vmatprep.subr.bf16.mxu1 %v5482_v55 }
 0x28d   :  { %2019 = vmatpush1.bf16.msra.mxu0 %v5405_v56  ;;  %v5484_v56 = vld [vmem:[%s7713_s7 + $0x68] sm:$0xff]  }
 0x28e   :  { %2020 = vmatprep.subr.bf16.mxu0 %v5410_v27  ;;  %5027 = vmatpush3.bf16.msra.mxu1 %v5483_v63  ;;  %v5485_v27 = vld [vmem:[%s7713_s7 + $0x28] sm:$0xff]  }
 0x28f   :  { %5028 = vmatprep.subr.bf16.mxu1 %v5484_v56 }
 0x291   :  { %2021 = vmatpush1.bf16.msra.mxu0 %v5408_v0  ;;  %v5486_v0 = vld [vmem:[%s7713_s7 + $0x70] sm:$0xff]  }
 0x292   :  { %2022 = vmatprep.subr.bf16.mxu0 %v5413_v28  ;;  %5029 = vmatpush3.bf16.msra.mxu1 %v5485_v27  ;;  %v5487_v28 = vld [vmem:[%s7713_s7 + $0x30] sm:$0xff]   ;;  %v264_v27 = vld [vmem:[%s7714_s5] sm:$0x3] }
 0x293   :  { %5030 = vmatprep.subr.bf16.mxu1 %v5486_v0 }
 0x295   :  { %2023 = vmatpush1.bf16.msra.mxu0 %v5411_v29  ;;  %v5488_v29 = vld [vmem:[%s7713_s7 + $0x78] sm:$0xff]  }
 0x296   :  { %2024 = vmatprep.subr.bf16.mxu0 %v5416_v30  ;;  %v5489_v30 = vld [vmem:[%s7713_s7 + $0x38] sm:$0xff]   ;;  %5031 = vmatpush3.bf16.msra.mxu1 %v5487_v28 }
 0x297   :  { %5032 = vmatprep.subr.bf16.mxu1 %v5488_v29 }
 0x299   :  { %2025 = vmatpush1.bf16.msra.mxu0 %v5414_v31  ;;  %v5490_v31 = vld [vmem:[%s7713_s7 + $0xc0] sm:$0xff]  }
 0x29a   :  { %2026 = vmatprep.subr.bf16.mxu0 %v5419_v32  ;;  %5033 = vmatpush3.bf16.msra.mxu1 %v5489_v30 }
 0x29b   :  { %5040 = vmatprep.subr.bf16.mxu1 %v5490_v31 }
 0x29d   :  { %2027 = vmatpush1.bf16.msra.mxu0 %v5417_v33 }
 0x29e   :  { %2028 = vmatprep.subr.bf16.mxu0 %v5422_v45 }
 0x2a1   :  { %2029 = vmatpush1.bf16.msra.mxu0 %v5420_v42 }
 0x2a2   :  { %2030 = vmatprep.subr.bf16.mxu0 %v5425_v34 }
 0x2a5   :  { %2031 = vmatpush1.bf16.msra.mxu0 %v5423_v35 }
 0x2a6   :  { %2043 = vmatprep.subr.bf16.mxu0 %v5428_v36 }
 0x2a8   :  { %2033 = vmatmul.mubr.bf16.vlgmr.msra.gmra.mrb[4].mxu0 %v864_v39 }
 0x2a9   :  { %2044 = vmatpush1.bf16.msra.mxu0 %v5426_v37  ;;  %2075 = vmatprep.mubr.bf16.mxu0 %v867_v40 }
 0x2aa   :  { %2045 = vmatprep.subr.bf16.mxu0 %v5431_v38 }
 0x2ad   :  { %2046 = vmatpush1.bf16.msra.mxu0 %v5429_v41 }
 0x2ae   :  { %2047 = vmatprep.subr.bf16.mxu0 %v5434_v47 }
 0x2b1   :  { %2048 = vmatpush1.bf16.msra.mxu0 %v5432_v21 }
 0x2b2   :  { %2049 = vmatprep.subr.bf16.mxu0 %v5437_v18 }
 0x2b5   :  { %2050 = vmatpush1.bf16.msra.mxu0 %v5435_v48 }
 0x2b6   :  { %2051 = vmatprep.subr.bf16.mxu0 %v5440_v49 }
 0x2b9   :  { %2052 = vmatpush1.bf16.msra.mxu0 %v5438_v50 }
 0x2ba   :  { %2053 = vmatprep.subr.bf16.mxu0 %v5443_v51 }
 0x2bd   :  { %2054 = vmatpush1.bf16.msra.mxu0 %v5441_v52 }
 0x2be   :  { %2055 = vmatprep.subr.bf16.mxu0 %v5446_v60 }
 0x2c1   :  { %2056 = vmatpush1.bf16.msra.mxu0 %v5444_v61 }
 0x2c2   :  { %2057 = vmatprep.subr.bf16.mxu0 %v5449_v54 }
 0x2c5   :  { %2058 = vmatpush1.bf16.msra.mxu0 %v5447_v62 }
 0x2c6   :  { %2059 = vmatprep.subr.bf16.mxu0 %v5452_v1 }
 0x2c9   :  { %2060 = vmatpush1.bf16.msra.mxu0 %v5450_v2 }
 0x2ca   :  { %2061 = vmatprep.subr.bf16.mxu0 %v5455_v43 }
 0x2cd   :  { %2062 = vmatpush1.bf16.msra.mxu0 %v5453_v3 }
 0x2ce   :  { %2063 = vmatprep.subr.bf16.mxu0 %v5458_v7 }
 0x2d1   :  { %2064 = vmatpush1.bf16.msra.mxu0 %v5456_v11 }
 0x2d2   :  { %2065 = vmatprep.subr.bf16.mxu0 %v5461_v13 }
 0x2d5   :  { %2066 = vmatpush1.bf16.msra.mxu0 %v5459_v15 }
 0x2d6   :  { %2067 = vmatprep.subr.bf16.mxu0 %v5464_v19 }
 0x2d9   :  { %2068 = vmatpush1.bf16.msra.mxu0 %v5462_v20 }
 0x2da   :  { %2069 = vmatprep.subr.bf16.mxu0 %v5467_v23 }
 0x2dd   :  { %2070 = vmatpush1.bf16.msra.mxu0 %v5465_v24 }
 0x2de   :  { %2071 = vmatprep.subr.bf16.mxu0 %v5470_v46 }
 0x2e1   :  { %2072 = vmatpush1.bf16.msra.mxu0 %v5468_v17 }
 0x2e2   :  { %2073 = vmatprep.subr.bf16.mxu0 %v5473_v25 }
 0x2e5   :  { %2074 = vmatpush1.bf16.msra.mxu0 %v5471_v26 }
 0x2e8   :  { %2076 = vmatmul.mubr.bf16.vlgmr.msra.gmra.mrb[4].mxu0 %v866_v4 }
 0x2e9   :  { %4004 = vmatprep.mubr.bf16.mxu0 %v5831_v10 }
 0x3bb   :  { %v2077_v32 = vpop.f32.mrb[4].mxu0 }
 0x3bc   :  { %v2079_v33 = vpop.f32.mrb[5].mxu0  ;;  %v2102_v42 = vmul.f32 %v2077_v32, %v2077_v32 }
 0x3bd   :  { %v2081_v45 = vpop.f32.mrb[6].mxu0  ;;  %v2103_v37 = vmul.f32 %v2079_v33, %v2079_v33 }
 0x3be   :  { %v2086_v34 = vadd.f32 %v2081_v45, %v2077_v32  ;;  %v2104_v35 = vmul.f32 %v2081_v45, %v2081_v45  ;;  %v2083_v36 = vpop.f32.mrb[7].mxu0 }
 0x3bf   :  { %v2093_v38 = vadd.f32 %v2083_v36, %v2079_v33  ;;  %v2105_v39 = vmul.f32 %v2083_v36, %v2083_v36 }
 0x3c0   :  { %v2087_v40 = vrot.slane %v2086_v34, 4  ;;  %v2106_v41 = vadd.f32 %v2104_v35, %v2102_v42 }
 0x3c1   :  { %v2094_v47 = vrot.slane %v2093_v38, 4  ;;  %v2113_v21 = vadd.f32 %v2105_v39, %v2103_v37 }
 0x3c2   :  { %v2088_v18 = vadd.f32 %v2087_v40, %v2086_v34  ;;  %v2107_v48 = vrot.slane %v2106_v41, 4 }
 0x3c3   :  { %v2095_v49 = vadd.f32 %v2094_v47, %v2093_v38  ;;  %v2114_v50 = vrot.slane %v2113_v21, 4 }
 0x3c4   :  { %v2089_v51 = vrot.slane %v2088_v18, 2  ;;  %v2108_v52 = vadd.f32 %v2107_v48, %v2106_v41  ;;  %v265_v41 = vld [vmem:[%s7715_s6] sm:$0x3] }
 0x3c5   :  { %v2096_v60 = vrot.slane %v2095_v49, 2  ;;  %v2115_v61 = vadd.f32 %v2114_v50, %v2113_v21 }
 0x3c6   :  { %v2090_v54 = vadd.f32 %v2089_v51, %v2088_v18  ;;  %v2109_v62 = vrot.slane %v2108_v52, 2 }
 0x3c7   :  { %v2097_v1 = vadd.f32 %v2096_v60, %v2095_v49  ;;  %v2116_v2 = vrot.slane %v2115_v61, 2 }
 0x3c8   :  { %v2091_v43 = vrot.slane %v2090_v54, 1  ;;  %v2110_v3 = vadd.f32 %v2109_v62, %v2108_v52 }
 0x3c9   :  { %v2098_v7 = vrot.slane %v2097_v1, 1  ;;  %v2117_v11 = vadd.f32 %v2116_v2, %v2115_v61 }
 0x3ca   :  { %v2092_v13 = vadd.f32 %v2091_v43, %v2090_v54  ;;  %v2111_v15 = vrot.slane %v2110_v3, 1 }
 0x3cb   :  { %v2099_v19 = vadd.f32 %v2098_v7, %v2097_v1  ;;  %v2118_v20 = vrot.slane %v2117_v11, 1 }
 0x3cc   :  { %v2100_v23 = vmul.f32 0.0625, %v2092_v13  ;;  %v2112_v24 = vadd.f32 %v2111_v15, %v2110_v3  ;;  %v5491_v15 = vld [vmem:[%s7713_s7 + $0x80] sm:$0xff]  }
 0x3cd   :  { %v2101_v46 = vmul.f32 0.0625, %v2099_v19  ;;  %v2119_v17 = vadd.f32 %v2118_v20, %v2117_v11 }
 0x3ce   :  { %v2120_v25 = vmul.f32 0.0625, %v2112_v24  ;;  %v2122_v26 = vmul.f32 %v2100_v23, %v2100_v23  ;;  %v5493_v24 = vld [vmem:[%s7713_s7 + $0x88] sm:$0xff]  }
 0x3cf   :  { %v2121_v4 = vmul.f32 0.0625, %v2119_v17  ;;  %v2123_v9 = vmul.f32 %v2101_v46, %v2101_v46  ;;  %v5495_v17 = vld [vmem:[%s7713_s7 + $0x90] sm:$0xff]  }
 0x3d0   :  { %v2124_v58 = vsub.f32 %v2120_v25, %v2122_v26  ;;  %v5496_v25 = vld [vmem:[%s7713_s7 + $0xd8] sm:$0xff]  }
 0x3d1   :  { %v2125_v12 = vsub.f32 %v2121_v4, %v2123_v9  ;;  %v5497_v26 = vld [vmem:[%s7713_s7 + $0x98] sm:$0xff]   ;;  %v5498_v4 = vld [vmem:[%s7713_s7 + $0xe0] sm:$0xff]  }
 0x3d2   :  { %v2126_v22 = vmax.f32 %v2124_v58, 0.0  ;;  %v5499_v9 = vld [vmem:[%s7713_s7 + $0xa0] sm:$0xff]   ;;  %v5500_v58 = vld [vmem:[%s7713_s7 + $0xe8] sm:$0xff]  }
 0x3d3   :  { %v2127_v57 = vmax.f32 %v2125_v12, 0.0  ;;  %v5501_v12 = vld [vmem:[%s7713_s7 + $0xa8] sm:$0xff]  }
 0x3d4   :  { %v2128_v5 = vadd.f32 1e-05, %v2126_v22  ;;  %v5502_v22 = vld [vmem:[%s7713_s7 + $0xf0] sm:$0xff]  }
 0x3d5   :  { %v2129_v6 = vadd.f32 1e-05, %v2127_v57  ;;  %v5503_v57 = vld [vmem:[%s7713_s7 + $0xb0] sm:$0xff]  }
 0x3d6   :  { %5606 = vrsqrt.f32 %v2128_v5  ;;  %v5504_v5 = vld [vmem:[%s7713_s7 + $0xf8] sm:$0xff]  }
 0x3d7   :  { %5608 = vrsqrt.f32 %v2129_v6 }
 0x3e0   :  { %v5607_v14 = vpop.eup %5606 }
 0x3e1   :  { %v5609_v55 = vpop.eup %5608 }
 0x3e2   :  { %v2134_v63 = vcombine.low %v5607_v14, %v5609_v55  ;;  %v5505_v14 = vld [vmem:[%s7713_s7 + $0xb8] sm:$0xff]   ;;  %v5506_v55 = vld [vmem:[%s7713_s7 + $0x140] sm:$0xff]  }
 0x3e4   :  { %v2141_v56 = vrot.slane %v2134_v63, %v6115_v44 }
 0x3e6   :  { %v2148_v0 = vrot.slane %v2141_v56, %v6115_v44  ;;  %v5507_v56 = vld [vmem:[%s7713_s7 + $0x100] sm:$0xff]  }
 0x3e8   :  { %v2150_v28 = vmul.f32 %v2148_v0, %v264_v27  ;;  %v5508_v27 = vld [vmem:[%s7713_s7 + $0x148] sm:$0xff]  }
 0x3ea   :  { %v2155_v29 = vrot.slane %v2150_v28, %v6122_v53  ;;  %v2159_v30 = vrot.slane %v2150_v28, %v6125_v59  ;;  %v5509_v28 = vld [vmem:[%s7713_s7 + $0x108] sm:$0xff]  }
 0x3ec   :  { %v2162_v31 = vmul.f32 %v2155_v29, %v2100_v23  ;;  %v2163_v42 = vmul.f32 %v2159_v30, %v2101_v46  ;;  %v2183_v34 = vmul.f32 %v2155_v29, %v2077_v32  ;;  %v2184_v35 = vmul.f32 %v2159_v30, %v2079_v33  ;;  %v5492_v23 = vld [vmem:[%s7713_s7 + $0xc8] sm:$0xff]   ;;  %v5494_v46 = vld [vmem:[%s7713_s7 + $0xd0] sm:$0xff]  }
 0x3ed   :  { %v2185_v37 = vmul.f32 %v2155_v29, %v2081_v45  ;;  %v2186_v38 = vmul.f32 %v2159_v30, %v2083_v36  ;;  %v5510_v29 = vld [vmem:[%s7713_s7 + $0x150] sm:$0xff]  }
 0x3ee   :  { %v2166_v39 = vcombine.low %v2162_v31, %v2163_v42  ;;  %v5511_v30 = vld [vmem:[%s7713_s7 + $0x110] sm:$0xff]   ;;  %v5512_v31 = vld [vmem:[%s7713_s7 + $0x158] sm:$0xff]  }
 0x3ef   :  { %v5513_v42 = vld [vmem:[%s7713_s7 + $0x118] sm:$0xff]  }
 0x3f0   :  { %v2173_v40 = vrot.slane %v2166_v39, %v6115_v44  ;;  %v5518_v39 = vld [vmem:[%s7713_s7 + $0x170] sm:$0xff]  }
 0x3f2   :  { %v2180_v47 = vrot.slane %v2173_v40, %v6115_v44  ;;  %v5519_v40 = vld [vmem:[%s7713_s7 + $0x130] sm:$0xff]  }
 0x3f4   :  { %v2182_v21 = vsub.f32 %v265_v41, %v2180_v47  ;;  %v5520_v41 = vld [vmem:[%s7713_s7 + $0x178] sm:$0xff]  }
 0x3f5   :  { %v5521_v47 = vld [vmem:[%s7713_s7 + $0x138] sm:$0xff]  }
 0x3f6   :  { %v2191_v18 = vrot.slane %v2182_v21, %v6122_v53  ;;  %v2195_v48 = vrot.slane %v2182_v21, %v6125_v59 }
 0x3f8   :  { %v2198_v49 = vadd.f32 %v2191_v18, %v2183_v34  ;;  %v2199_v50 = vadd.f32 %v2195_v48, %v2184_v35  ;;  %v2200_v32 = vadd.f32 %v2191_v18, %v2185_v37  ;;  %v2201_v33 = vadd.f32 %v2195_v48, %v2186_v38  ;;  %v5514_v34 = vld [vmem:[%s7713_s7 + $0x160] sm:$0xff]   ;;  %v5516_v37 = vld [vmem:[%s7713_s7 + $0x168] sm:$0xff]  }
 0x3f9   :  { %v5515_v35 = vld [vmem:[%s7713_s7 + $0x120] sm:$0xff]   ;;  %v5517_v38 = vld [vmem:[%s7713_s7 + $0x128] sm:$0xff]  }
 0x3fa   :  { %v2203_v45 = vmax.f32 %v2199_v50, 0.0  ;;  %v2205_v36 = vmax.f32 %v2201_v33, 0.0  ;;  %v2202_v51 = vmax.f32 %v2198_v49, 0.0  ;;  %v2204_v52 = vmax.f32 %v2200_v32, 0.0  ;;  %v5522_v18 = vld [vmem:[%s7716_s10 + $0x40] sm:$0xff]   ;;  %v5524_v49 = vld [vmem:[%s7716_s10 + $0x48] sm:$0xff]  }
 0x3fb   :  { %v5523_v48 = vld [vmem:[%s7716_s10] sm:$0xff]   ;;  %v5525_v50 = vld [vmem:[%s7716_s10 + $0x8] sm:$0xff]   ;;  %v5526_v32 = vld [vmem:[%s7716_s10 + $0x50] sm:$0xff]  }
 0x3fc   :  { %v2207_v60 = vpack.c.bf16 %v2205_v36, %v2203_v45  ;;  %v2206_v61 = vpack.c.bf16 %v2204_v52, %v2202_v51  ;;  %v5527_v33 = vld [vmem:[%s7716_s10 + $0x10] sm:$0xff]   ;;  %v5528_v45 = vld [vmem:[%s7716_s10 + $0x58] sm:$0xff]   ;;  %v5530_v51 = vld [vmem:[%s7716_s10 + $0x60] sm:$0xff]  }
 0x3fd   :  { %v5529_v36 = vld [vmem:[%s7716_s10 + $0x18] sm:$0xff]   ;;  %v5531_v52 = vld [vmem:[%s7716_s10 + $0x20] sm:$0xff]  }
 0x3fe   :  { %v2216_v54 = vshrl.u32 %v2207_v60, 16  ;;  %v2209_v62 = vshrl.u32 %v2206_v61, 16  ;;  %v2212_v1 = vshll.u32 %v2206_v61, 16  ;;  %v2219_v44 = vshll.u32 %v2207_v60, 16 }
 0x400   :  { %v2218_v2 = vrot.slane %v2216_v54, 7  ;;  %v2211_v43 = vrot.slane %v2209_v62, 7  ;;  %v2226_v3 = vrot.slane %v2212_v1, 1  ;;  %v2228_v6 = vrot.slane %v2219_v44, 1 }
 0x402   :  { %v2221_v7 = vor.u32 %v2219_v44, %v2218_v2  ;;  %v2214_v11 = vor.u32 %v2212_v1, %v2211_v43  ;;  %v6744_v13 = vor.u32 %v2226_v3, %v2209_v62  ;;  %v2229_v63 = vor.u32 %v2228_v6, %v2216_v54  ;;  %v5534_v54 = vld [vmem:[%s7716_s10 + $0x70] sm:$0xff]   ;;  %v5536_v1 = vld [vmem:[%s7716_s10 + $0x78] sm:$0xff]  }
 0x403   :  { %v5535_v62 = vld [vmem:[%s7716_s10 + $0x30] sm:$0xff]   ;;  %v5537_v2 = vld [vmem:[%s7716_s10 + $0x38] sm:$0xff]   ;;  %v5834_v44 = vmov 0.0  }
 0x404   :  { %v2225_v19 = vsel %vm5970_vm6, 0, %v2221_v7  ;;  %v2224_v20 = vsel %vm5970_vm6, 0, %v2214_v11  ;;  %v2233_v0 = vsel %vm5955_vm3, %v2229_v63, 0  ;;  %v2232_v21 = vsel %vm5955_vm3, %v6744_v13, 0 }
 0x405   :  { %2554 = vmatprep.mubr.bf16.mxu1 %v2225_v19 }
 0x406   :  { %2555 = vmatmul.mubr.bf16.vlgmr.msra.gmra.mrb[4].mxu1 %v2224_v20 }
 0x407   :  { %5041 = vmatpush3.bf16.msra.mxu1 %v5491_v15  ;;  %2595 = vmatprep.mubr.bf16.mxu1 %v2207_v60  ;;  %v5532_v60 = vld [vmem:[%s7716_s10 + $0x68] sm:$0xff]  }
 0x408   :  { %5042 = vmatprep.subr.bf16.mxu1 %v5492_v23 }
 0x40b   :  { %5043 = vmatpush3.bf16.msra.mxu1 %v5493_v24 }
 0x40c   :  { %5044 = vmatprep.subr.bf16.mxu1 %v5494_v46 }
 0x40f   :  { %5045 = vmatpush3.bf16.msra.mxu1 %v5495_v17 }
 0x410   :  { %5046 = vmatprep.subr.bf16.mxu1 %v5496_v25 }
 0x413   :  { %5047 = vmatpush3.bf16.msra.mxu1 %v5497_v26 }
 0x414   :  { %5048 = vmatprep.subr.bf16.mxu1 %v5498_v4 }
 0x417   :  { %5049 = vmatpush3.bf16.msra.mxu1 %v5499_v9 }
 0x418   :  { %5050 = vmatprep.subr.bf16.mxu1 %v5500_v58 }
 0x41b   :  { %5051 = vmatpush3.bf16.msra.mxu1 %v5501_v12 }
 0x41c   :  { %5052 = vmatprep.subr.bf16.mxu1 %v5502_v22 }
 0x41f   :  { %5053 = vmatpush3.bf16.msra.mxu1 %v5503_v57 }
 0x420   :  { %5054 = vmatprep.subr.bf16.mxu1 %v5504_v5 }
 0x423   :  { %5055 = vmatpush3.bf16.msra.mxu1 %v5505_v14 }
 0x424   :  { %5062 = vmatprep.subr.bf16.mxu1 %v5506_v55 }
 0x426   :  { %2596 = vmatmul.mubr.bf16.vlgmr.msra.gmra.mrb[8].mxu1 %v2206_v61  ;;  %v5533_v61 = vld [vmem:[%s7716_s10 + $0x28] sm:$0xff]  }
 0x427   :  { %5063 = vmatpush3.bf16.msra.mxu1 %v5507_v56  ;;  %2636 = vmatprep.mubr.bf16.mxu1 %v2233_v0 }
 0x428   :  { %5064 = vmatprep.subr.bf16.mxu1 %v5508_v27 }
 0x42b   :  { %5065 = vmatpush3.bf16.msra.mxu1 %v5509_v28 }
 0x42c   :  { %5066 = vmatprep.subr.bf16.mxu1 %v5510_v29 }
 0x42f   :  { %5067 = vmatpush3.bf16.msra.mxu1 %v5511_v30 }
 0x430   :  { %5068 = vmatprep.subr.bf16.mxu1 %v5512_v31 }
 0x433   :  { %5069 = vmatpush3.bf16.msra.mxu1 %v5513_v42 }
 0x434   :  { %5070 = vmatprep.subr.bf16.mxu1 %v5514_v34 }
 0x437   :  { %5071 = vmatpush3.bf16.msra.mxu1 %v5515_v35 }
 0x438   :  { %5072 = vmatprep.subr.bf16.mxu1 %v5516_v37 }
 0x43b   :  { %5073 = vmatpush3.bf16.msra.mxu1 %v5517_v38 }
 0x43c   :  { %5074 = vmatprep.subr.bf16.mxu1 %v5518_v39 }
 0x43f   :  { %5075 = vmatpush3.bf16.msra.mxu1 %v5519_v40 }
 0x440   :  { %5076 = vmatprep.subr.bf16.mxu1 %v5520_v41 }
 0x443   :  { %5077 = vmatpush3.bf16.msra.mxu1 %v5521_v47 }
 0x444   :  { %5084 = vmatprep.subr.bf16.mxu1 %v5522_v18 }
 0x446   :  { %2637 = vmatmul.mubr.bf16.vlgmr.msra.gmra.mrb[12].mxu1 %v2232_v21 }
 0x447   :  { %5085 = vmatpush3.bf16.msra.mxu1 %v5523_v48 }
 0x448   :  { %5086 = vmatprep.subr.bf16.mxu1 %v5524_v49  ;;  %v362_v49 = vld [vmem:[%s7717_s8] sm:$0x1] }
 0x44b   :  { %5087 = vmatpush3.bf16.msra.mxu1 %v5525_v50 }
 0x44c   :  { %5088 = vmatprep.subr.bf16.mxu1 %v5526_v32 }
 0x44f   :  { %5089 = vmatpush3.bf16.msra.mxu1 %v5527_v33  ;;  %v363_v33 = vld [vmem:[%s7718_s9] sm:$0x1] }
 0x450   :  { %5090 = vmatprep.subr.bf16.mxu1 %v5528_v45 }
 0x453   :  { %5091 = vmatpush3.bf16.msra.mxu1 %v5529_v36 }
 0x454   :  { %5092 = vmatprep.subr.bf16.mxu1 %v5530_v51 }
 0x457   :  { %5093 = vmatpush3.bf16.msra.mxu1 %v5531_v52 }
 0x458   :  { %5094 = vmatprep.subr.bf16.mxu1 %v5532_v60 }
 0x45b   :  { %5095 = vmatpush3.bf16.msra.mxu1 %v5533_v61 }
 0x45c   :  { %5096 = vmatprep.subr.bf16.mxu1 %v5534_v54 }
 0x45f   :  { %5097 = vmatpush3.bf16.msra.mxu1 %v5535_v62 }
 0x460   :  { %5098 = vmatprep.subr.bf16.mxu1 %v5536_v1 }
 0x463   :  { %5099 = vmatpush3.bf16.msra.mxu1 %v5537_v2 }
 0x464   :  { %5120 = vmatprep.subr.bf16.mxu1 %v5834_v44 }
 0x4d9   :  { %v5034_v43 = vpop.f32.mrb[4].mxu1 }
 0x4da   :  { %v5035_v3 = vpop.f32.mrb[5].mxu1 }
 0x4db   :  { %v5036_v7 = vadd.f32 %v5035_v3, %v5034_v43  ;;  %v5037_v11 = vpop.f32.mrb[6].mxu1 }
 0x4dc   :  { %v5038_v13 = vpop.f32.mrb[7].mxu1 }
 0x4dd   :  { %v5039_v15 = vadd.f32 %v5038_v13, %v5037_v11 }
 0x4f9   :  { %v5056_v19 = vpop.f32.mrb[8].mxu1 }
 0x4fa   :  { %v5057_v20 = vpop.f32.mrb[9].mxu1 }
 0x4fb   :  { %v5058_v23 = vadd.f32 %v5057_v20, %v5056_v19  ;;  %v5059_v24 = vpop.f32.mrb[10].mxu1  ;;  %v5539_v20 = vld [vmem:[%s7716_s10 + $0x88] sm:$0xff]  }
 0x4fc   :  { %v5060_v46 = vpop.f32.mrb[11].mxu1 }
 0x4fd   :  { %v2598_v17 = vadd.f32 %v5058_v23, %v5036_v7  ;;  %v5061_v25 = vadd.f32 %v5060_v46, %v5059_v24  ;;  %v5540_v23 = vld [vmem:[%s7716_s10 + $0x90] sm:$0xff]   ;;  %v5542_v24 = vld [vmem:[%s7716_s10 + $0xa0] sm:$0xff]   ;;  %v5543_v46 = vld [vmem:[%s7716_s10 + $0xa8] sm:$0xff]  }
 0x4ff   :  { %v2601_v26 = vadd.f32 %v5061_v25, %v5039_v15  ;;  %v5538_v15 = vld [vmem:[%s7716_s10 + $0x80] sm:$0xff]  }
 0x519   :  { %v5078_v4 = vpop.f32.mrb[12].mxu1 }
 0x51a   :  { %v5079_v9 = vpop.f32.mrb[13].mxu1 }
 0x51b   :  { %v5080_v58 = vadd.f32 %v5079_v9, %v5078_v4  ;;  %v5081_v12 = vpop.f32.mrb[14].mxu1 }
 0x51c   :  { %v5082_v22 = vpop.f32.mrb[15].mxu1 }
 0x51d   :  { %v2639_v57 = vadd.f32 %v5080_v58, %v2598_v17  ;;  %v5083_v5 = vadd.f32 %v5082_v22, %v5081_v12  ;;  %v5544_v17 = vld [vmem:[%s7716_s10 + $0xb0] sm:$0xff]   ;;  %v5548_v58 = vld [vmem:[%s7719_s13 + $0x4] ss:$8 sps:$4 sm:$0xff]   ;;  %v5546_v12 = vld [vmem:[%s7719_s13] ss:$8 sps:$4 sm:$0xff]  }
 0x51e   :  { %v5551_v22 = vld [vmem:[%s7719_s13 + $0x14] ss:$8 sps:$4 sm:$0xff]  }
 0x51f   :  { %v2642_v6 = vadd.f32 %v5083_v5, %v2601_v26  ;;  %v2653_v14 = vmul.f32 %v2639_v57, %v2639_v57  ;;  %v5545_v26 = vld [vmem:[%s7716_s10 + $0xb8] sm:$0xff]   ;;  %v5552_v5 = vld [vmem:[%s7719_s13 + $0x20] ss:$8 sps:$4 sm:$0xff]  }
 0x521   :  { %v2645_v55 = vadd.f32 %v2642_v6, %v2639_v57  ;;  %v2654_v63 = vmul.f32 %v2642_v6, %v2642_v6 }
 0x523   :  { %v2646_v56 = vrot.slane %v2645_v55, 4  ;;  %v2655_v27 = vadd.f32 %v2654_v63, %v2653_v14  ;;  %v5555_v14 = vld [vmem:[%s7719_s13 + $0x30] ss:$8 sps:$4 sm:$0xff]  }
 0x525   :  { %v2647_v0 = vadd.f32 %v2646_v56, %v2645_v55  ;;  %v2656_v28 = vrot.slane %v2655_v27, 4  ;;  %v6970_v55 = vld [vmem:[%s7720_s15 + $0x4] ss:$8 sps:$4 sm:$0xff]  }
 0x527   :  { %v2648_v29 = vrot.slane %v2647_v0, 2  ;;  %v2657_v30 = vadd.f32 %v2656_v28, %v2655_v27 }
 0x529   :  { %v2649_v31 = vadd.f32 %v2648_v29, %v2647_v0  ;;  %v2658_v42 = vrot.slane %v2657_v30, 2 }
 0x52b   :  { %v2650_v34 = vrot.slane %v2649_v31, 1  ;;  %v2659_v35 = vadd.f32 %v2658_v42, %v2657_v30 }
 0x52d   :  { %v2651_v37 = vadd.f32 %v2650_v34, %v2649_v31  ;;  %v2660_v38 = vrot.slane %v2659_v35, 1 }
 0x52f   :  { %v2652_v39 = vmul.f32 0.0625, %v2651_v37  ;;  %v2661_v40 = vadd.f32 %v2660_v38, %v2659_v35 }
 0x531   :  { %v2662_v41 = vmul.f32 0.0625, %v2661_v40  ;;  %v2663_v47 = vmul.f32 %v2652_v39, %v2652_v39 }
 0x533   :  { %v2664_v21 = vsub.f32 %v2662_v41, %v2663_v47 }
 0x535   :  { %v2665_v18 = vmax.f32 %v2664_v21, 0.0 }
 0x537   :  { %v2666_v48 = vadd.f32 1e-05, %v2665_v18 }
 0x539   :  { %5610 = vrsqrt.f32 %v2666_v48 }
 0x543   :  { %v5611_v50 = vpop.eup %5610 }
 0x544   :  { %v2668_v32 = vmul.f32 %v5611_v50, %v362_v49 }
 0x546   :  { %v2675_v45 = vrot.slane %v2668_v32, %v6122_v53  ;;  %v2669_v36 = vmul.f32 %v2668_v32, %v2652_v39 }
 0x548   :  { %v2678_v51 = vmul.f32 %v2675_v45, %v2642_v6  ;;  %v2670_v52 = vsub.f32 %v363_v33, %v2669_v36  ;;  %v2677_v60 = vmul.f32 %v2675_v45, %v2639_v57  ;;  %v5554_v57 = vld [vmem:[%s7719_s13 + $0x24] ss:$8 sps:$4 sm:$0xff]   ;;  %v5557_v6 = vld [vmem:[%s7719_s13 + $0x34] ss:$8 sps:$4 sm:$0xff]  }
 0x54a   :  { %v2683_v61 = vrot.slane %v2670_v52, %v6122_v53 }
 0x54c   :  { %v2685_v54 = vadd.f32 %v2683_v61, %v2677_v60  ;;  %v2686_v62 = vadd.f32 %v2683_v61, %v2678_v51 }
 0x54e   :  { %v2687_v1 = vmax.f32 %v2685_v54, 0.0  ;;  %v2688_v2 = vmax.f32 %v2686_v62, 0.0 }
 0x550   :  { %v2689_v43 = vpack.c.bf16 %v2688_v2, %v2687_v1 }
 0x552   :  { %v2691_v3 = vshrl.u32 %v2689_v43, 16  ;;  %2879 = vmatprep.mubr.bf16.mxu1 %v2689_v43  ;;  %v2694_v11 = vshll.u32 %v2689_v43, 16 }
 0x554   :  { %v2693_v7 = vrot.slane %v2691_v3, 7  ;;  %v2699_v25 = vrot.slane %v2694_v11, 1 }
 0x556   :  { %v2696_v13 = vor.u32 %v2694_v11, %v2693_v7  ;;  %v2700_v4 = vor.u32 %v2699_v25, %v2691_v3 }
 0x558   :  { %v2698_v19 = vsel %vm5970_vm6, 0, %v2696_v13  ;;  %v2702_v9 = vsel %vm5955_vm3, %v2700_v4, 0  ;;  %v412_v13 = vld [vmem:[%s7721_s11] sm:$0x1] }
 0x559   :  { %2880 = vmatmul.mubr.bf16.vlgmr.msra.gmra.mrb[16].mxu1 %v2698_v19 }
 0x55a   :  { %5121 = vmatpush3.bf16.msra.mxu1 %v5538_v15  ;;  %5136 = vmatprep.mubr.msk.bf16.mxu1 %vm5835_vm10, %v5834_v44 }
 0x55b   :  { %5122 = vmatprep.subr.bf16.mxu1 %v5834_v44 }
 0x55e   :  { %5123 = vmatpush3.bf16.msra.mxu1 %v5539_v20  ;;  %v413_v20 = vld [vmem:[%s7722_s12] sm:$0x1] }
 0x55f   :  { %5124 = vmatprep.subr.bf16.mxu1 %v5834_v44 }
 0x562   :  { %5125 = vmatpush3.bf16.msra.mxu1 %v5540_v23 }
 0x563   :  { %5126 = vmatprep.subr.bf16.mxu1 %v5834_v44 }
 0x566   :  { %5127 = vmatpush3.bf16.msra.mxu1 %v5541_v16 }
 0x567   :  { %5128 = vmatprep.subr.bf16.mxu1 %v5834_v44 }
 0x56a   :  { %5129 = vmatpush3.bf16.msra.mxu1 %v5542_v24 }
 0x56b   :  { %5130 = vmatprep.subr.bf16.mxu1 %v5834_v44 }
 0x56e   :  { %5131 = vmatpush3.bf16.msra.mxu1 %v5543_v46 }
 0x56f   :  { %5132 = vmatprep.subr.bf16.mxu1 %v5834_v44 }
 0x572   :  { %5133 = vmatpush3.bf16.msra.mxu1 %v5544_v17 }
 0x573   :  { %5134 = vmatprep.subr.bf16.mxu1 %v5834_v44 }
 0x576   :  { %5135 = vmatpush3.bf16.msra.mxu1 %v5545_v26 }
 0x577   :  { %3033 = vmatprep.subr.bf16.mxu1 %v5548_v58 }
 0x579   :  { %5137 = vmatmul.mubr.bf16.vlgmr.msra.gmra.mrb[20].mxu1 %v2702_v9 }
 0x57a   :  { %3065 = vmatprep.mubr.bf16.mxu1 %v5831_v10  ;;  %3034 = vmatpush1.bf16.msra.mxu1 %v5546_v12  ;;  %v6988_v12 = vld [vmem:[%s7720_s15] ss:$8 sps:$4 sm:$0xff]  }
 0x57b   :  { %3035 = vmatprep.subr.bf16.mxu1 %v5551_v22 }
 0x57e   :  { %3036 = vmatpush1.bf16.msra.mxu1 %v5549_v8  ;;  %v6993_v8 = vld [vmem:[%s7720_s15 + $0x14] ss:$8 sps:$4 sm:$0xff]  }
 0x57f   :  { %3037 = vmatprep.subr.bf16.mxu1 %v5554_v57  ;;  %v7000_v57 = vld [vmem:[%s7720_s15 + $0x10] ss:$8 sps:$4 sm:$0xff]  }
 0x582   :  { %3038 = vmatpush1.bf16.msra.mxu1 %v5552_v5  ;;  %v7007_v5 = vld [vmem:[%s7720_s15 + $0x24] ss:$8 sps:$4 sm:$0xff]  }
 0x583   :  { %3039 = vmatprep.subr.bf16.mxu1 %v5557_v6  ;;  %v7013_v6 = vld [vmem:[%s7720_s15 + $0x20] ss:$8 sps:$4 sm:$0xff]  }
 0x586   :  { %3040 = vmatpush1.bf16.msra.mxu1 %v5555_v14  ;;  %v7019_v14 = vld [vmem:[%s7720_s15 + $0x34] ss:$8 sps:$4 sm:$0xff]  }
 0x587   :  { %3136 = vmatprep.subr.bf16.mxu1 %v6970_v55 }
 0x62c   :  { %v5100_v63 = vpop.f32.mrb[16].mxu1 }
 0x62d   :  { %v5101_v56 = vpop.f32.mrb[17].mxu1 }
 0x62e   :  { %v5102_v27 = vadd.f32 %v5101_v56, %v5100_v63  ;;  %v5103_v0 = vpop.f32.mrb[18].mxu1  ;;  %v7025_v63 = vld [vmem:[%s7720_s15 + $0x30] ss:$8 sps:$4 sm:$0xff]   ;;  %v424_v56 = vld [vmem:[%s7723_s14] sm:$0x3]  ;;  %s5836_s14 = smov 64  }
 0x62f   :  { %v5104_v28 = vpop.f32.mrb[19].mxu1 }
 0x630   :  { %v5105_v29 = vadd.f32 %v5104_v28, %v5103_v0  ;;  %v2987_v0 = vrot.slane %v424_v56, %v6125_v59 }
 0x64c   :  { %v2922_v30 = vpop.f32.mrb[20].mxu1 }
 0x64d   :  { %v2923_v31 = vadd.f32 %v5102_v27, %v2922_v30  ;;  %v5138_v42 = vpop.f32.mrb[21].mxu1  ;;  %v2983_v27 = vrot.slane %v424_v56, %v6122_v53 }
 0x64e   :  { %v2925_v34 = vpop.f32.mrb[22].mxu1 }
 0x64f   :  { %v2940_v35 = vmul.f32 %v2923_v31, %v2923_v31  ;;  %v2926_v37 = vadd.f32 %v5105_v29, %v2925_v34  ;;  %v5139_v38 = vpop.f32.mrb[23].mxu1  ;;  %v2930_v39 = vsel %vm2929_vm11, %v2923_v31, 0.0 }
 0x651   :  { %v2931_v40 = vsel %vm2929_vm11, %v2926_v37, 0.0  ;;  %v2941_v41 = vmul.f32 %v2926_v37, %v2926_v37  ;;  %v2942_v21 = vsel %vm2929_vm11, %v2940_v35, 0.0 }
 0x652   :  { %v2932_v47 = vadd.f32 %v2931_v40, %v2930_v39 }
 0x653   :  { %v2943_v18 = vsel %vm2929_vm11, %v2941_v41, 0.0 }
 0x654   :  { %v2933_v48 = vrot.slane %v2932_v47, 4  ;;  %v2944_v49 = vadd.f32 %v2943_v18, %v2942_v21 }
 0x656   :  { %v2934_v50 = vadd.f32 %v2933_v48, %v2932_v47  ;;  %v2945_v32 = vrot.slane %v2944_v49, 4 }
 0x658   :  { %v2935_v33 = vrot.slane %v2934_v50, 2  ;;  %v2946_v45 = vadd.f32 %v2945_v32, %v2944_v49 }
 0x65a   :  { %v2936_v36 = vadd.f32 %v2935_v33, %v2934_v50  ;;  %v2947_v51 = vrot.slane %v2946_v45, 2 }
 0x65c   :  { %v2937_v52 = vrot.slane %v2936_v36, 1  ;;  %v2948_v60 = vadd.f32 %v2947_v51, %v2946_v45 }
 0x65e   :  { %v2938_v61 = vadd.f32 %v2937_v52, %v2936_v36  ;;  %v2949_v54 = vrot.slane %v2948_v60, 1 }
 0x660   :  { %v2939_v62 = vmul.f32 0.0625, %v2938_v61  ;;  %v2950_v1 = vadd.f32 %v2949_v54, %v2948_v60 }
 0x662   :  { %v2951_v2 = vmul.f32 0.0625, %v2950_v1  ;;  %v2952_v43 = vmul.f32 %v2939_v62, %v2939_v62 }
 0x664   :  { %v2953_v3 = vsub.f32 %v2951_v2, %v2952_v43 }
 0x666   :  { %v2954_v7 = vmax.f32 %v2953_v3, 0.0 }
 0x668   :  { %v2955_v11 = vadd.f32 1e-05, %v2954_v7 }
 0x66a   :  { %5612 = vrsqrt.f32 %v2955_v11 }
 0x674   :  { %v5613_v15 = vpop.eup %5612 }
 0x675   :  { %v2957_v19 = vmul.f32 %v5613_v15, %v412_v13 }
 0x677   :  { %v2958_v23 = vmul.f32 %v2957_v19, %v2939_v62  ;;  %v2964_v16 = vrot.slane %v2957_v19, %v6122_v53 }
 0x679   :  { %v2959_v24 = vsub.f32 %v413_v20, %v2958_v23  ;;  %v2966_v46 = vmul.f32 %v2964_v16, %v2923_v31  ;;  %v2967_v17 = vmul.f32 %v2964_v16, %v2926_v37 }
 0x67b   :  { %v2972_v25 = vrot.slane %v2959_v24, %v6122_v53 }
 0x67d   :  { %v2974_v26 = vadd.f32 %v2972_v25, %v2966_v46  ;;  %v2975_v4 = vadd.f32 %v2972_v25, %v2967_v17 }
 0x67f   :  { %v2976_v9 = vmax.f32 %v2974_v26, 0.0  ;;  %v2977_v58 = vmax.f32 %v2975_v4, 0.0 }
 0x681   :  { %v2978_v22 = vpack.c.bf16 %v2977_v58, %v2976_v9 }
 0x683   :  { %4945 = vmatmul.mubr.msk.bf16.vlgmr.msra.gmra.mrb[24].mxu1 %vm2929_vm11, %v2978_v22 }
 0x684   :  { %3137 = vmatpush1.bf16.msra.mxu1 %v6988_v12  ;;  %3168 = vmatprep.mubr.bf16.mxu1 %v5831_v10 }
 0x685   :  { %3138 = vmatprep.subr.bf16.mxu1 %v6993_v8 }
 0x688   :  { %3139 = vmatpush1.bf16.msra.mxu1 %v7000_v57 }
 0x689   :  { %3140 = vmatprep.subr.bf16.mxu1 %v7007_v5 }
 0x68c   :  { %3141 = vmatpush1.bf16.msra.mxu1 %v7013_v6 }
 0x68d   :  { %3142 = vmatprep.subr.bf16.mxu1 %v7019_v14 }
 0x690   :  { %3143 = vmatpush1.bf16.msra.mxu1 %v7025_v63 }
 0x693   :  { %3169 = vmatmul.mubr.bf16.vlgmr.msra.gmra.mrb[28].mxu1 %v5831_v10 }
 0x694   :  { %3350 = vmatprep.mubr.bf16.mxu1 %v5831_v10 }
 0x756   :  { %v3067_v28 = vpop.f32.mrb[24].mxu1 }
 0x757   :  { %v3068_v29 = vadd.f32 %v3067_v28, %v2983_v27  ;;  %v3069_v30 = vpop.f32.mrb[25].mxu1 }
 0x758   :  { %v3070_v31 = vadd.f32 %v3069_v30, %v2987_v0  ;;  %v3071_v42 = vpop.f32.mrb[26].mxu1 }
 0x759   :  { %v3072_v34 = vadd.f32 %v3071_v42, %v2983_v27  ;;  %v3073_v35 = vpop.f32.mrb[27].mxu1  ;;  %v3391_v37 = vrot.slane %v3068_v29, 1  ;;  %v3551_v38 = vrot.slane %v3068_v29, 2  ;;  %v3715_v39 = vrot.slane %v3068_v29, 3 }
 0x75a   :  { %v3074_v40 = vadd.f32 %v3073_v35, %v2987_v0  ;;  %v3392_v41 = vrot.slane %v3070_v31, 1  ;;  %v3552_v47 = vrot.slane %v3070_v31, 2  ;;  %v3716_v21 = vrot.slane %v3070_v31, 3 }
 0x75b   :  { %v3078_v18 = vrot.slane %v3072_v34, 7  ;;  %v7037_v48 = vsel %vm448_vm4, %v3391_v37, %v3072_v34  ;;  %v3555_v49 = vrot.slane %v3072_v34, 1  ;;  %v3719_v50 = vrot.slane %v3072_v34, 2 }
 0x75c   :  { %v3079_v32 = vrot.slane %v3074_v40, 7  ;;  %v7040_v33 = vsel %vm448_vm4, %v3392_v41, %v3074_v40  ;;  %v3556_v45 = vrot.slane %v3074_v40, 1  ;;  %v3720_v36 = vrot.slane %v3074_v40, 2 }
 0x75d   :  { %v3083_v51 = vsel %vm448_vm4, %v3068_v29, %v3078_v18  ;;  %v7044_v52 = vsel %vm448_vm4, %v3551_v38, %v3555_v49  ;;  %v7047_v60 = vsel %vm448_vm4, %v3715_v39, %v3719_v50  ;;  %v3879_v61 = vrot.slane %v3068_v29, 4  ;;  %v7093_v18 = vld [vmem:[%s7724_s16] ss:$8 sps:$4 sm:$0xff]   ;;  %v7099_v49 = vld [vmem:[%s7724_s16 + $0x14] ss:$8 sps:$4 sm:$0xff]  }
 0x75e   :  { %v3084_v54 = vsel %vm448_vm4, %v3070_v31, %v3079_v32  ;;  %v7051_v62 = vsel %vm448_vm4, %v3552_v47, %v3556_v45  ;;  %v7054_v1 = vsel %vm448_vm4, %v3716_v21, %v3720_v36  ;;  %v3883_v2 = vrot.slane %v3072_v34, 3  ;;  %v7088_v21 = vld [vmem:[%s7724_s16 + $0x4] ss:$8 sps:$4 sm:$0xff]   ;;  %v7106_v50 = vld [vmem:[%s7724_s16 + $0x10] ss:$8 sps:$4 sm:$0xff]  }
 0x75f   :  { %v3880_v43 = vrot.slane %v3070_v31, 4  ;;  %v3884_v3 = vrot.slane %v3074_v40, 3  ;;  %v4043_v7 = vrot.slane %v3068_v29, 5  ;;  %v4047_v11 = vrot.slane %v3072_v34, 4  ;;  %3318 = vmatprep.subr.bf16.mxu1 %v7088_v21  ;;  %3972 = vmatprep.subr.bf16.mxu0 %v7088_v21  ;;  %v7113_v32 = vld [vmem:[%s7724_s16 + $0x24] ss:$8 sps:$4 sm:$0xff]  }
 0x760   :  { %v7057_v13 = vsel %vm448_vm4, %v3879_v61, %v3883_v2  ;;  %v4044_v15 = vrot.slane %v3070_v31, 5  ;;  %v4048_v19 = vrot.slane %v3074_v40, 4  ;;  %v4207_v20 = vrot.slane %v3068_v29, 6  ;;  %3319 = vmatpush1.bf16.msra.mxu1 %v7093_v18  ;;  %3973 = vmatpush1.bf16.msra.mxu0 %v7093_v18  ;;  %v7120_v45 = vld [vmem:[%s7724_s16 + $0x20] ss:$8 sps:$4 sm:$0xff]  }
 0x761   :  { %v7060_v23 = vsel %vm448_vm4, %v3880_v43, %v3884_v3  ;;  %v7063_v16 = vsel %vm448_vm4, %v4043_v7, %v4047_v11  ;;  %v4211_v24 = vrot.slane %v3072_v34, 5  ;;  %v4208_v46 = vrot.slane %v3070_v31, 6  ;;  %3320 = vmatprep.subr.bf16.mxu1 %v7099_v49  ;;  %3974 = vmatprep.subr.bf16.mxu0 %v7099_v49  ;;  %v7127_v36 = vld [vmem:[%s7724_s16 + $0x34] ss:$8 sps:$4 sm:$0xff]   ;;  %v7141_v61 = vld [vmem:[%s7724_s16 + $0x44] ss:$8 sps:$4 sm:$0xff]  }
 0x762   :  { %v7066_v17 = vsel %vm448_vm4, %v4044_v15, %v4048_v19  ;;  %v4212_v25 = vrot.slane %v3074_v40, 5  ;;  %v4371_v26 = vrot.slane %v3068_v29, 7  ;;  %v4375_v4 = vrot.slane %v3072_v34, 6  ;;  %v7155_v2 = vld [vmem:[%s7724_s16 + $0x54] ss:$8 sps:$4 sm:$0xff]  }
 0x763   :  { %v7069_v9 = vsel %vm448_vm4, %v4207_v20, %v4211_v24  ;;  %v4372_v58 = vrot.slane %v3070_v31, 7  ;;  %v4376_v22 = vrot.slane %v3074_v40, 6  ;;  %v7162_v43 = vld [vmem:[%s7724_s16 + $0x50] ss:$8 sps:$4 sm:$0xff]   ;;  %v7169_v3 = vld [vmem:[%s7724_s16 + $0x64] ss:$8 sps:$4 sm:$0xff]  }
 0x764   :  { %v7072_v56 = vsel %vm448_vm4, %v4208_v46, %v4212_v25  ;;  %v7075_v27 = vsel %vm448_vm4, %v4371_v26, %v4375_v4  ;;  %3321 = vmatpush1.bf16.msra.mxu1 %v7106_v50  ;;  %3975 = vmatpush1.bf16.msra.mxu0 %v7106_v50  ;;  %v7176_v7 = vld [vmem:[%s7724_s16 + $0x60] ss:$8 sps:$4 sm:$0xff]   ;;  %v7183_v11 = vld [vmem:[%s7724_s16 + $0x74] ss:$8 sps:$4 sm:$0xff]   ;;  %v7193_v19 = vld [vmem:[%s7724_s16 + $0x70] ss:$8 sps:$4 sm:$0xff]  }
 0x765   :  { %v7078_v0 = vsel %vm448_vm4, %v4372_v58, %v4376_v22  ;;  %3322 = vmatprep.subr.bf16.mxu1 %v7113_v32  ;;  %3976 = vmatprep.subr.bf16.mxu0 %v7113_v32 }
 0x766   :  { %v3170_v28 = vpop.f32.mrb[28].mxu1 }
 0x767   :  { %v3177_v30 = vadd.f32 %v3170_v28, %v3083_v51  ;;  %v3172_v42 = vpop.f32.mrb[29].mxu1  ;;  %v7134_v51 = vld [vmem:[%s7724_s16 + $0x30] ss:$8 sps:$4 sm:$0xff]  }
 0x768   :  { %v7080_v35 = vadd.f32 %v3172_v42, %v3084_v54  ;;  %v3174_v29 = vpop.f32.mrb[30].mxu1  ;;  %3323 = vmatpush1.bf16.msra.mxu1 %v7120_v45  ;;  %3977 = vmatpush1.bf16.msra.mxu0 %v7120_v45  ;;  %v7148_v54 = vld [vmem:[%s7724_s16 + $0x40] ss:$8 sps:$4 sm:$0xff]  }
 0x769   :  { %v3175_v34 = vpop.f32.mrb[31].mxu1  ;;  %v4954_v37 = vmul.f32 -1.442695, %v3177_v30  ;;  %3324 = vmatprep.subr.bf16.mxu1 %v7127_v36  ;;  %3978 = vmatprep.subr.bf16.mxu0 %v7127_v36  ;;  %v425_v42 = vld [vmem:[%s7725_s17] sm:$0x3] }
 0x76a   :  { %5614 = vtanh.f32 %v7080_v35  ;;  %v4955_v25 = vmul.f32 -1.442695, %v7080_v35  ;;  %v7237_v35 = vrot.slane %v425_v42, %v6125_v59 }
 0x76b   :  { %5616 = vpow2.f32 %v4954_v37 }
 0x76c   :  { %3325 = vmatpush1.bf16.msra.mxu1 %v7134_v51  ;;  %3979 = vmatpush1.bf16.msra.mxu0 %v7134_v51 }
 0x76d   :  { %3326 = vmatprep.subr.bf16.mxu1 %v7141_v61  ;;  %3980 = vmatprep.subr.bf16.mxu0 %v7141_v61 }
 0x770   :  { %3327 = vmatpush1.bf16.msra.mxu1 %v7148_v54  ;;  %3981 = vmatpush1.bf16.msra.mxu0 %v7148_v54 }
 0x771   :  { %3328 = vmatprep.subr.bf16.mxu1 %v7155_v2  ;;  %3982 = vmatprep.subr.bf16.mxu0 %v7155_v2 }
 0x774   :  { %v5615_v31 = vpop.eup %5614  ;;  %3329 = vmatpush1.bf16.msra.mxu1 %v7162_v43  ;;  %3983 = vmatpush1.bf16.msra.mxu0 %v7162_v43 }
 0x775   :  { %3194 = vrot.lane.b32.xlu1 %v5615_v31, %s5836_s14  ;;  %v5617_v38 = vpop.eup %5616  ;;  %3330 = vmatprep.subr.bf16.mxu1 %v7169_v3 }
 0x776   :  { %v3185_v39 = vadd.f32 1.0, %v5617_v38  ;;  %3984 = vmatprep.subr.bf16.mxu0 %v7169_v3 }
 0x778   :  { %5618 = vrcp.f32 %v3185_v39  ;;  %3331 = vmatpush1.bf16.msra.mxu1 %v7176_v7  ;;  %3985 = vmatpush1.bf16.msra.mxu0 %v7176_v7 }
 0x779   :  { %3332 = vmatprep.subr.bf16.mxu1 %v7183_v11  ;;  %3986 = vmatprep.subr.bf16.mxu0 %v7183_v11 }
 0x77c   :  { %3333 = vmatpush1.bf16.msra.mxu1 %v7193_v19  ;;  %3987 = vmatpush1.bf16.msra.mxu0 %v7193_v19 }
 0x77d   :  { %3401 = vmatprep.subr.bf16.mxu1 %v6970_v55  ;;  %4221 = vmatprep.subr.bf16.mxu0 %v6970_v55 }
 0x782   :  { %v5619_v40 = vpop.eup %5618 }
 0x783   :  { %v3192_v15 = vmul.f32 0.0, %v5619_v40 }
 0x7e7   :  { %v3195_v41 = vpop.permute.xlu1 %3194 }
 0x7e8   :  { %v3197_v47 = vmul.f32 %v5619_v40, %v3195_v41 }
 0x7ea   :  { %3199 = vrot.lane.b32.xlu1 %v3197_v47, %s5836_s14 }
 0x85c   :  { %v3200_v20 = vpop.permute.xlu1 %3199 }
 0x85d   :  { %v7195_v24 = vadd.f32 %v3200_v20, %v3192_v15 }
 0x85f   :  { %5620 = vtanh.f32 %v7195_v24 }
 0x860   :  { %5622 = vpow2.f32 %v4955_v25  ;;  %v7245_v25 = vrot.slane %v425_v42, %v6122_v53 }
 0x869   :  { %v5621_v46 = vpop.eup %5620 }
 0x86a   :  { %3205 = vrot.lane.b32.xlu0 %v5621_v46, %s5836_s14  ;;  %v5623_v26 = vpop.eup %5622 }
 0x86b   :  { %v3186_v4 = vadd.f32 1.0, %v5623_v26 }
 0x86d   :  { %5624 = vrcp.f32 %v3186_v4 }
 0x877   :  { %v5625_v58 = vpop.eup %5624 }
 0x8dc   :  { %v3206_v22 = vpop.permute.xlu0 %3205 }
 0x8dd   :  { %v3208_v28 = vmul.f32 %v5625_v58, %v3206_v22 }
 0x8df   :  { %v4973_v30 = vpack.c.bf16 %v3208_v28, %v3208_v28 }
 0x8e1   :  { %4974 = vmatmul.mubr.msk.bf16.vlgmr.msra.gmra.mrb[32].mxu1 %vm4972_vm12, %v4973_v30 }
 0x8e2   :  { %3402 = vmatpush1.bf16.msra.mxu1 %v6988_v12  ;;  %3433 = vmatprep.mubr.bf16.mxu1 %v5831_v10 }
 0x8e3   :  { %3403 = vmatprep.subr.bf16.mxu1 %v6993_v8 }
 0x8e6   :  { %3404 = vmatpush1.bf16.msra.mxu1 %v7000_v57 }
 0x8e7   :  { %3405 = vmatprep.subr.bf16.mxu1 %v7007_v5 }
 0x8ea   :  { %3406 = vmatpush1.bf16.msra.mxu1 %v7013_v6 }
 0x8eb   :  { %3407 = vmatprep.subr.bf16.mxu1 %v7019_v14 }
 0x8ee   :  { %3408 = vmatpush1.bf16.msra.mxu1 %v7025_v63 }
 0x8ef   :  { %3480 = vmatprep.subr.bf16.mxu1 %v7088_v21 }
 0x8f1   :  { %4977 = vmatmul.mubr.msk.bf16.vlgmr.msra.gmra.mrb[36].mxu1 %vm2929_vm11, %v4973_v30 }
 0x8f2   :  { %3481 = vmatpush1.bf16.msra.mxu1 %v7093_v18  ;;  %3512 = vmatprep.mubr.bf16.mxu1 %v5831_v10 }
 0x8f3   :  { %3482 = vmatprep.subr.bf16.mxu1 %v7099_v49 }
 0x8f6   :  { %3483 = vmatpush1.bf16.msra.mxu1 %v7106_v50 }
 0x8f7   :  { %3484 = vmatprep.subr.bf16.mxu1 %v7113_v32 }
 0x8fa   :  { %3485 = vmatpush1.bf16.msra.mxu1 %v7120_v45 }
 0x8fb   :  { %3486 = vmatprep.subr.bf16.mxu1 %v7127_v36 }
 0x8fe   :  { %3487 = vmatpush1.bf16.msra.mxu1 %v7134_v51 }
 0x8ff   :  { %3488 = vmatprep.subr.bf16.mxu1 %v7141_v61 }
 0x902   :  { %3489 = vmatpush1.bf16.msra.mxu1 %v7148_v54 }
 0x903   :  { %3490 = vmatprep.subr.bf16.mxu1 %v7155_v2 }
 0x906   :  { %3491 = vmatpush1.bf16.msra.mxu1 %v7162_v43 }
 0x907   :  { %3492 = vmatprep.subr.bf16.mxu1 %v7169_v3 }
 0x90a   :  { %3493 = vmatpush1.bf16.msra.mxu1 %v7176_v7 }
 0x90b   :  { %3494 = vmatprep.subr.bf16.mxu1 %v7183_v11 }
 0x90e   :  { %3495 = vmatpush1.bf16.msra.mxu1 %v7193_v19 }
 0x90f   :  { %3565 = vmatprep.subr.bf16.mxu1 %v6970_v55 }
 0x9b4   :  { %v3352_v29 = vpop.f32.mrb[32].mxu1 }
 0x9b5   :  { %v3354_v34 = vpop.f32.mrb[33].mxu1  ;;  %v3353_v26 = vadd.f32 %v3352_v29, %v7245_v25 }
 0x9b6   :  { %v3355_v31 = vadd.f32 %v3354_v34, %v7237_v35  ;;  %v3356_v37 = vpop.f32.mrb[34].mxu1 }
 0x9b7   :  { %v3357_v38 = vpop.f32.mrb[35].mxu1  ;;  %v4975_v4 = vmul.f32 -1.442695, %v3353_v26 }
 0x9b8   :  { %5626 = vtanh.f32 %v3355_v31  ;;  %v4976_v26 = vmul.f32 -1.442695, %v3355_v31 }
 0x9c2   :  { %v5627_v39 = vpop.eup %5626 }
 0x9c3   :  { %3374 = vrot.lane.b32.xlu1 %v5627_v39, %s5836_s14 }
 0x9c4   :  { %v3435_v40 = vpop.f32.mrb[36].mxu1 }
 0x9c5   :  { %v3442_v41 = vadd.f32 %v3435_v40, %v7037_v48  ;;  %v3437_v47 = vpop.f32.mrb[37].mxu1 }
 0x9c6   :  { %v3443_v15 = vadd.f32 %v3437_v47, %v7040_v33  ;;  %v3439_v20 = vpop.f32.mrb[38].mxu1 }
 0x9c7   :  { %v3440_v46 = vpop.f32.mrb[39].mxu1  ;;  %v4978_v22 = vmul.f32 -1.442695, %v3442_v41 }
 0x9c8   :  { %5628 = vtanh.f32 %v3443_v15 }
 0x9c9   :  { %5630 = vpow2.f32 %v4975_v4 }
 0x9ca   :  { %5632 = vpow2.f32 %v4978_v22 }
 0x9d2   :  { %v5629_v59 = vpop.eup %5628 }
 0x9d3   :  { %3459 = vrot.lane.b32.xlu0 %v5629_v59, %s5836_s14  ;;  %v5631_v58 = vpop.eup %5630 }
 0x9d4   :  { %v3365_v28 = vadd.f32 1.0, %v5631_v58  ;;  %v5633_v48 = vpop.eup %5632 }
 0x9d5   :  { %v3450_v37 = vadd.f32 1.0, %v5633_v48 }
 0x9d6   :  { %5634 = vrcp.f32 %v3365_v28 }
 0x9d7   :  { %5636 = vrcp.f32 %v3450_v37 }
 0x9e0   :  { %v5635_v33 = vpop.eup %5634 }
 0x9e1   :  { %v5637_v38 = vpop.eup %5636  ;;  %v3372_v29 = vmul.f32 0.0, %v5635_v33 }
 0x9e2   :  { %v3457_v47 = vmul.f32 %v5637_v38, %v7195_v24  ;;  %v4979_v24 = vmul.f32 -1.442695, %v3443_v15 }
 0xa35   :  { %v3375_v30 = vpop.permute.xlu1 %3374 }
 0xa36   :  { %v3377_v34 = vmul.f32 %v5635_v33, %v3375_v30 }
 0xa38   :  { %3379 = vrot.lane.b32.xlu1 %v3377_v34, %s5836_s14 }
 0xa45   :  { %v3460_v53 = vpop.permute.xlu0 %3459 }
 0xa46   :  { %v3462_v42 = vmul.f32 %v5637_v38, %v3460_v53 }
 0xa48   :  { %3464 = vrot.lane.b32.xlu0 %v3462_v42, %s5836_s14 }
 0xaaa   :  { %v3380_v39 = vpop.permute.xlu1 %3379 }
 0xaab   :  { %v7250_v40 = vadd.f32 %v3380_v39, %v3372_v29 }
 0xaad   :  { %5638 = vtanh.f32 %v7250_v40 }
 0xab7   :  { %v5639_v41 = vpop.eup %5638 }
 0xab8   :  { %3385 = vrot.lane.b32.xlu1 %v5639_v41, %s5836_s14 }
 0xaba   :  { %v3465_v20 = vpop.permute.xlu0 %3464 }
 0xabb   :  { %v7255_v46 = vadd.f32 %v3465_v20, %v3457_v47 }
 0xabd   :  { %5640 = vtanh.f32 %v7255_v46 }
 0xabe   :  { %5642 = vpow2.f32 %v4976_v26 }
 0xac7   :  { %v5641_v59 = vpop.eup %5640 }
 0xac8   :  { %3470 = vrot.lane.b32.xlu0 %v5641_v59, %s5836_s14  ;;  %v5643_v4 = vpop.eup %5642 }
 0xac9   :  { %v3366_v58 = vadd.f32 1.0, %v5643_v4 }
 0xacb   :  { %5644 = vrcp.f32 %v3366_v58 }
 0xacc   :  { %5646 = vpow2.f32 %v4979_v24 }
 0xad5   :  { %v5645_v22 = vpop.eup %5644 }
 0xad6   :  { %v5647_v33 = vpop.eup %5646 }
 0xad7   :  { %v3451_v30 = vadd.f32 1.0, %v5647_v33 }
 0xad9   :  { %5648 = vrcp.f32 %v3451_v30 }
 0xae3   :  { %v5649_v37 = vpop.eup %5648 }
 0xb2a   :  { %v3386_v28 = vpop.permute.xlu1 %3385 }
 0xb2b   :  { %v7259_v48 = vmul.f32 %v5645_v22, %v3386_v28 }
 0xb2d   :  { %3475 = vrot.lane.b32.xlu1 %v7259_v48, %s5836_s14 }
 0xb3a   :  { %v3471_v34 = vpop.permute.xlu0 %3470 }
 0xb3b   :  { %v3473_v38 = vmul.f32 %v5649_v37, %v3471_v34 }
 0xb3d   :  { %v3561_v15 = vpack.c.bf16 %v3473_v38, %v3473_v38 }
 0xb9f   :  { %v3476_v31 = vpop.permute.xlu1 %3475 }
 0xba0   :  { %v3478_v53 = vsel %vm2929_vm11, %v3473_v38, %v3476_v31 }
 0xba1   :  { %v3479_v42 = vpack.c.bf16 %v3478_v53, %v3478_v53 }
 0xba3   :  { %3513 = vmatmul.mubr.bf16.vlgmr.msra.gmra.mrb[40].mxu1 %v3479_v42 }
 0xba4   :  { %3566 = vmatpush1.bf16.msra.mxu1 %v6988_v12  ;;  %3597 = vmatprep.mubr.bf16.mxu1 %v5831_v10 }
 0xba5   :  { %3567 = vmatprep.subr.bf16.mxu1 %v6993_v8 }
 0xba8   :  { %3568 = vmatpush1.bf16.msra.mxu1 %v7000_v57 }
 0xba9   :  { %3569 = vmatprep.subr.bf16.mxu1 %v7007_v5 }
 0xbac   :  { %3570 = vmatpush1.bf16.msra.mxu1 %v7013_v6 }
 0xbad   :  { %3571 = vmatprep.subr.bf16.mxu1 %v7019_v14 }
 0xbb0   :  { %3572 = vmatpush1.bf16.msra.mxu1 %v7025_v63 }
 0xbb1   :  { %3644 = vmatprep.subr.bf16.mxu1 %v7088_v21 }
 0xbb3   :  { %4982 = vmatmul.mubr.msk.bf16.vlgmr.msra.gmra.mrb[44].mxu1 %vm2929_vm11, %v3561_v15 }
 0xbb4   :  { %3645 = vmatpush1.bf16.msra.mxu1 %v7093_v18  ;;  %3676 = vmatprep.mubr.bf16.mxu1 %v5831_v10 }
 0xbb5   :  { %3646 = vmatprep.subr.bf16.mxu1 %v7099_v49 }
 0xbb8   :  { %3647 = vmatpush1.bf16.msra.mxu1 %v7106_v50 }
 0xbb9   :  { %3648 = vmatprep.subr.bf16.mxu1 %v7113_v32 }
 0xbbc   :  { %3649 = vmatpush1.bf16.msra.mxu1 %v7120_v45 }
 0xbbd   :  { %3650 = vmatprep.subr.bf16.mxu1 %v7127_v36 }
 0xbc0   :  { %3651 = vmatpush1.bf16.msra.mxu1 %v7134_v51 }
 0xbc1   :  { %3652 = vmatprep.subr.bf16.mxu1 %v7141_v61 }
 0xbc4   :  { %3653 = vmatpush1.bf16.msra.mxu1 %v7148_v54 }
 0xbc5   :  { %3654 = vmatprep.subr.bf16.mxu1 %v7155_v2 }
 0xbc8   :  { %3655 = vmatpush1.bf16.msra.mxu1 %v7162_v43 }
 0xbc9   :  { %3656 = vmatprep.subr.bf16.mxu1 %v7169_v3 }
 0xbcc   :  { %3657 = vmatpush1.bf16.msra.mxu1 %v7176_v7 }
 0xbcd   :  { %3658 = vmatprep.subr.bf16.mxu1 %v7183_v11 }
 0xbd0   :  { %3659 = vmatpush1.bf16.msra.mxu1 %v7193_v19 }
 0xbd1   :  { %3729 = vmatprep.subr.bf16.mxu1 %v6970_v55 }
 0xc76   :  { %v3514_v29 = vpop.f32.mrb[40].mxu1 }
 0xc77   :  { %v3516_v39 = vpop.f32.mrb[41].mxu1  ;;  %v3515_v30 = vadd.f32 %v3514_v29, %v7245_v25 }
 0xc78   :  { %v3517_v41 = vadd.f32 %v3516_v39, %v7237_v35  ;;  %v3518_v47 = vpop.f32.mrb[42].mxu1 }
 0xc79   :  { %v3519_v20 = vpop.f32.mrb[43].mxu1  ;;  %v4980_v34 = vmul.f32 -1.442695, %v3515_v30 }
 0xc7a   :  { %5650 = vtanh.f32 %v3517_v41  ;;  %v4981_v30 = vmul.f32 -1.442695, %v3517_v41 }
 0xc84   :  { %v5651_v59 = vpop.eup %5650 }
 0xc85   :  { %3536 = vrot.lane.b32.xlu0 %v5651_v59, %s5836_s14 }
 0xc86   :  { %v3599_v26 = vpop.f32.mrb[44].mxu1 }
 0xc87   :  { %v3606_v4 = vadd.f32 %v3599_v26, %v7044_v52  ;;  %v3601_v58 = vpop.f32.mrb[45].mxu1 }
 0xc88   :  { %v3607_v22 = vadd.f32 %v3601_v58, %v7051_v62  ;;  %v3603_v28 = vpop.f32.mrb[46].mxu1 }
 0xc89   :  { %v3604_v24 = vpop.f32.mrb[47].mxu1  ;;  %v4983_v38 = vmul.f32 -1.442695, %v3606_v4 }
 0xc8a   :  { %5652 = vtanh.f32 %v3607_v22 }
 0xc8b   :  { %5654 = vpow2.f32 %v4980_v34 }
 0xc8c   :  { %5656 = vpow2.f32 %v4983_v38 }
 0xc94   :  { %v5653_v33 = vpop.eup %5652 }
 0xc95   :  { %3623 = vrot.lane.b32.xlu1 %v5653_v33, %s5836_s14  ;;  %v5655_v37 = vpop.eup %5654 }
 0xc96   :  { %v3527_v31 = vadd.f32 1.0, %v5655_v37  ;;  %v5657_v53 = vpop.eup %5656 }
 0xc97   :  { %v3614_v62 = vadd.f32 1.0, %v5657_v53 }
 0xc98   :  { %5658 = vrcp.f32 %v3527_v31 }
 0xc99   :  { %5660 = vrcp.f32 %v3614_v62 }
 0xca2   :  { %v5659_v52 = vpop.eup %5658 }
 0xca3   :  { %v5661_v39 = vpop.eup %5660  ;;  %v3534_v29 = vmul.f32 %v5659_v52, %v7250_v40 }
 0xca4   :  { %v3621_v58 = vmul.f32 %v5661_v39, %v7255_v46  ;;  %v4984_v46 = vmul.f32 -1.442695, %v3607_v22 }
 0xcf7   :  { %v3537_v42 = vpop.permute.xlu0 %3536 }
 0xcf8   :  { %v3539_v15 = vmul.f32 %v5659_v52, %v3537_v42 }
 0xcfa   :  { %3541 = vrot.lane.b32.xlu0 %v3539_v15, %s5836_s14 }
 0xd07   :  { %v3624_v47 = vpop.permute.xlu1 %3623 }
 0xd08   :  { %v3626_v20 = vmul.f32 %v5661_v39, %v3624_v47 }
 0xd0a   :  { %3628 = vrot.lane.b32.xlu1 %v3626_v20, %s5836_s14 }
 0xd6c   :  { %v3542_v59 = vpop.permute.xlu0 %3541 }
 0xd6d   :  { %v7300_v26 = vadd.f32 %v3542_v59, %v3534_v29 }
 0xd6f   :  { %5662 = vtanh.f32 %v7300_v26 }
 0xd79   :  { %v5663_v4 = vpop.eup %5662 }
 0xd7a   :  { %3547 = vrot.lane.b32.xlu0 %v5663_v4, %s5836_s14 }
 0xd7c   :  { %v3629_v28 = vpop.permute.xlu1 %3628 }
 0xd7d   :  { %v7305_v24 = vadd.f32 %v3629_v28, %v3621_v58 }
 0xd7f   :  { %5664 = vtanh.f32 %v7305_v24 }
 0xd80   :  { %5666 = vpow2.f32 %v4981_v30 }
 0xd89   :  { %v5665_v33 = vpop.eup %5664 }
 0xd8a   :  { %3634 = vrot.lane.b32.xlu1 %v5665_v33, %s5836_s14  ;;  %v5667_v40 = vpop.eup %5666 }
 0xd8b   :  { %v3528_v34 = vadd.f32 1.0, %v5667_v40 }
 0xd8d   :  { %5668 = vrcp.f32 %v3528_v34 }
 0xd8e   :  { %5670 = vpow2.f32 %v4984_v46 }
 0xd97   :  { %v5669_v37 = vpop.eup %5668 }
 0xd98   :  { %v5671_v53 = vpop.eup %5670 }
 0xd99   :  { %v3615_v52 = vadd.f32 1.0, %v5671_v53 }
 0xd9b   :  { %5672 = vrcp.f32 %v3615_v52 }
 0xda5   :  { %v5673_v15 = vpop.eup %5672 }
 0xdec   :  { %v3548_v38 = vpop.permute.xlu0 %3547 }
 0xded   :  { %v7309_v31 = vmul.f32 %v5669_v37, %v3548_v38 }
 0xdef   :  { %3639 = vrot.lane.b32.xlu0 %v7309_v31, %s5836_s14 }
 0xdfc   :  { %v3635_v42 = vpop.permute.xlu1 %3634 }
 0xdfd   :  { %v3637_v62 = vmul.f32 %v5673_v15, %v3635_v42 }
 0xdff   :  { %v3725_v22 = vpack.c.bf16 %v3637_v62, %v3637_v62 }
 0xe61   :  { %v3640_v41 = vpop.permute.xlu0 %3639 }
 0xe62   :  { %v3642_v39 = vsel %vm2929_vm11, %v3637_v62, %v3640_v41 }
 0xe63   :  { %v3643_v47 = vpack.c.bf16 %v3642_v39, %v3642_v39 }
 0xe65   :  { %3677 = vmatmul.mubr.bf16.vlgmr.msra.gmra.mrb[48].mxu1 %v3643_v47 }
 0xe66   :  { %3730 = vmatpush1.bf16.msra.mxu1 %v6988_v12  ;;  %3761 = vmatprep.mubr.bf16.mxu1 %v5831_v10 }
 0xe67   :  { %3731 = vmatprep.subr.bf16.mxu1 %v6993_v8 }
 0xe6a   :  { %3732 = vmatpush1.bf16.msra.mxu1 %v7000_v57 }
 0xe6b   :  { %3733 = vmatprep.subr.bf16.mxu1 %v7007_v5 }
 0xe6e   :  { %3734 = vmatpush1.bf16.msra.mxu1 %v7013_v6 }
 0xe6f   :  { %3735 = vmatprep.subr.bf16.mxu1 %v7019_v14 }
 0xe72   :  { %3736 = vmatpush1.bf16.msra.mxu1 %v7025_v63 }
 0xe73   :  { %3808 = vmatprep.subr.bf16.mxu1 %v7088_v21 }
 0xe75   :  { %4987 = vmatmul.mubr.msk.bf16.vlgmr.msra.gmra.mrb[52].mxu1 %vm2929_vm11, %v3725_v22 }
 0xe76   :  { %3809 = vmatpush1.bf16.msra.mxu1 %v7093_v18  ;;  %3840 = vmatprep.mubr.bf16.mxu1 %v5831_v10 }
 0xe77   :  { %3810 = vmatprep.subr.bf16.mxu1 %v7099_v49 }
 0xe7a   :  { %3811 = vmatpush1.bf16.msra.mxu1 %v7106_v50 }
 0xe7b   :  { %3812 = vmatprep.subr.bf16.mxu1 %v7113_v32 }
 0xe7e   :  { %3813 = vmatpush1.bf16.msra.mxu1 %v7120_v45 }
 0xe7f   :  { %3814 = vmatprep.subr.bf16.mxu1 %v7127_v36 }
 0xe82   :  { %3815 = vmatpush1.bf16.msra.mxu1 %v7134_v51 }
 0xe83   :  { %3816 = vmatprep.subr.bf16.mxu1 %v7141_v61 }
 0xe86   :  { %3817 = vmatpush1.bf16.msra.mxu1 %v7148_v54 }
 0xe87   :  { %3818 = vmatprep.subr.bf16.mxu1 %v7155_v2 }
 0xe8a   :  { %3819 = vmatpush1.bf16.msra.mxu1 %v7162_v43 }
 0xe8b   :  { %3820 = vmatprep.subr.bf16.mxu1 %v7169_v3 }
 0xe8e   :  { %3821 = vmatpush1.bf16.msra.mxu1 %v7176_v7 }
 0xe8f   :  { %3822 = vmatprep.subr.bf16.mxu1 %v7183_v11 }
 0xe92   :  { %3823 = vmatpush1.bf16.msra.mxu1 %v7193_v19 }
 0xe93   :  { %3893 = vmatprep.subr.bf16.mxu1 %v6970_v55 }
 0xf38   :  { %v3678_v20 = vpop.f32.mrb[48].mxu1 }
 0xf39   :  { %v3680_v29 = vpop.f32.mrb[49].mxu1  ;;  %v3679_v46 = vadd.f32 %v3678_v20, %v7245_v25 }
 0xf3a   :  { %v3681_v59 = vadd.f32 %v3680_v29, %v7237_v35  ;;  %v3682_v4 = vpop.f32.mrb[50].mxu1 }
 0xf3b   :  { %v3683_v58 = vpop.f32.mrb[51].mxu1  ;;  %v4985_v53 = vmul.f32 -1.442695, %v3679_v46 }
 0xf3c   :  { %5674 = vtanh.f32 %v3681_v59 }
 0xf46   :  { %v5675_v28 = vpop.eup %5674 }
 0xf47   :  { %3700 = vrot.lane.b32.xlu1 %v5675_v28, %s5836_s14 }
 0xf48   :  { %v3763_v33 = vpop.f32.mrb[52].mxu1 }
 0xf49   :  { %v3770_v30 = vadd.f32 %v3763_v33, %v7047_v60  ;;  %v3765_v40 = vpop.f32.mrb[53].mxu1 }
 0xf4a   :  { %v3771_v34 = vadd.f32 %v3765_v40, %v7054_v1  ;;  %v3767_v37 = vpop.f32.mrb[54].mxu1 }
 0xf4b   :  { %v3768_v38 = vpop.f32.mrb[55].mxu1  ;;  %v4988_v42 = vmul.f32 -1.442695, %v3770_v30 }
 0xf4c   :  { %5676 = vtanh.f32 %v3771_v34  ;;  %v4986_v38 = vmul.f32 -1.442695, %v3681_v59 }
 0xf4d   :  { %5678 = vpow2.f32 %v4985_v53  ;;  %v4535_v53 = vrot.slane %v7309_v31, 7 }
 0xf4e   :  { %5680 = vpow2.f32 %v4988_v42 }
 0xf56   :  { %v5677_v55 = vpop.eup %5676 }
 0xf57   :  { %3787 = vrot.lane.b32.xlu0 %v5677_v55, %s5836_s14  ;;  %v5679_v52 = vpop.eup %5678 }
 0xf58   :  { %v3691_v15 = vadd.f32 1.0, %v5679_v52  ;;  %v5681_v62 = vpop.eup %5680 }
 0xf59   :  { %v3778_v1 = vadd.f32 1.0, %v5681_v62 }
 0xf5a   :  { %5682 = vrcp.f32 %v3691_v15 }
 0xf5b   :  { %5684 = vrcp.f32 %v3778_v1  ;;  %v4989_v1 = vmul.f32 -1.442695, %v3771_v34 }
 0xf64   :  { %v5683_v60 = vpop.eup %5682 }
 0xf65   :  { %v5685_v47 = vpop.eup %5684  ;;  %v3698_v20 = vmul.f32 %v5683_v60, %v7300_v26 }
 0xf66   :  { %v3785_v33 = vmul.f32 %v5685_v47, %v7305_v24  ;;  %v4550_v24 = vrot.slane %v7259_v48, 1 }
 0xf68   :  { %v4576_v59 = vsel %vm448_vm4, %v4550_v24, %v7309_v31  ;;  %v7382_v31 = vld [vmem:[%s7720_s15 + $0x4] ss:$8 sps:$4 sm:$0xff]  }
 0xfb9   :  { %v3701_v41 = vpop.permute.xlu1 %3700 }
 0xfba   :  { %v3703_v39 = vmul.f32 %v5683_v60, %v3701_v41  ;;  %v4564_v60 = vsel %vm448_vm4, %v7259_v48, %v4535_v53 }
 0xfbc   :  { %3705 = vrot.lane.b32.xlu1 %v3703_v39, %s5836_s14 }
 0xfc9   :  { %v3788_v22 = vpop.permute.xlu0 %3787 }
 0xfca   :  { %v3790_v29 = vmul.f32 %v5685_v47, %v3788_v22 }
 0xfcc   :  { %3792 = vrot.lane.b32.xlu0 %v3790_v29, %s5836_s14 }
0x102e   :  { %v3706_v4 = vpop.permute.xlu1 %3705 }
0x102f   :  { %v7350_v58 = vadd.f32 %v3706_v4, %v3698_v20 }
0x1031   :  { %5686 = vtanh.f32 %v7350_v58 }
0x103b   :  { %v5687_v28 = vpop.eup %5686 }
0x103c   :  { %3711 = vrot.lane.b32.xlu1 %v5687_v28, %s5836_s14 }
0x103e   :  { %v3793_v30 = vpop.permute.xlu0 %3792 }
0x103f   :  { %v7355_v40 = vadd.f32 %v3793_v30, %v3785_v33 }
0x1041   :  { %5688 = vtanh.f32 %v7355_v40 }
0x1042   :  { %5690 = vpow2.f32 %v4986_v38 }
0x104b   :  { %v5689_v37 = vpop.eup %5688 }
0x104c   :  { %3798 = vrot.lane.b32.xlu0 %v5689_v37, %s5836_s14  ;;  %v5691_v26 = vpop.eup %5690 }
0x104d   :  { %v3692_v55 = vadd.f32 1.0, %v5691_v26 }
0x104f   :  { %5692 = vrcp.f32 %v3692_v55 }
0x1050   :  { %5694 = vpow2.f32 %v4989_v1 }
0x1059   :  { %v5693_v46 = vpop.eup %5692 }
0x105a   :  { %v5695_v47 = vpop.eup %5694 }
0x105b   :  { %v3779_v22 = vadd.f32 1.0, %v5695_v47 }
0x105d   :  { %5696 = vrcp.f32 %v3779_v22 }
0x1067   :  { %v5697_v20 = vpop.eup %5696 }
0x10ae   :  { %v3712_v52 = vpop.permute.xlu1 %3711 }
0x10af   :  { %v3714_v42 = vmul.f32 %v5693_v46, %v3712_v52 }
0x10b1   :  { %v4537_v15 = vrot.slane %v3714_v42, 6  ;;  %v4552_v62 = vrot.slane %v3714_v42, 7  ;;  %3803 = vrot.lane.b32.xlu1 %v3714_v42, %s5836_s14 }
0x10b3   :  { %v7366_v41 = vsel %vm4565_vm13, %v4564_v60, %v4537_v15  ;;  %v7368_v39 = vsel %vm4565_vm13, %v4576_v59, %v4552_v62 }
0x10be   :  { %v3799_v29 = vpop.permute.xlu0 %3798 }
0x10bf   :  { %v3801_v4 = vmul.f32 %v5697_v20, %v3799_v29 }
0x10c1   :  { %v3889_v48 = vpack.c.bf16 %v3801_v4, %v3801_v4 }
0x1123   :  { %v3804_v28 = vpop.permute.xlu1 %3803 }
0x1124   :  { %v3806_v33 = vsel %vm2929_vm11, %v3801_v4, %v3804_v28 }
0x1125   :  { %v3807_v30 = vpack.c.bf16 %v3806_v33, %v3806_v33 }
0x1127   :  { %3841 = vmatmul.mubr.bf16.vlgmr.msra.gmra.mrb[56].mxu1 %v3807_v30 }
0x1128   :  { %3894 = vmatpush1.bf16.msra.mxu1 %v6988_v12  ;;  %3925 = vmatprep.mubr.bf16.mxu1 %v5831_v10 }
0x1129   :  { %3895 = vmatprep.subr.bf16.mxu1 %v6993_v8 }
0x112c   :  { %3896 = vmatpush1.bf16.msra.mxu1 %v7000_v57 }
0x112d   :  { %3897 = vmatprep.subr.bf16.mxu1 %v7007_v5 }
0x1130   :  { %3898 = vmatpush1.bf16.msra.mxu1 %v7013_v6 }
0x1131   :  { %3899 = vmatprep.subr.bf16.mxu1 %v7019_v14 }
0x1134   :  { %3900 = vmatpush1.bf16.msra.mxu1 %v7025_v63 }
0x1135   :  { %4057 = vmatprep.subr.bf16.mxu1 %v7382_v31 }
0x1137   :  { %4992 = vmatmul.mubr.msk.bf16.vlgmr.msra.gmra.mrb[60].mxu1 %vm2929_vm11, %v3889_v48 }
0x1138   :  { %4058 = vmatpush1.bf16.msra.mxu1 %v6988_v12  ;;  %4089 = vmatprep.mubr.bf16.mxu1 %v5831_v10 }
0x1139   :  { %4059 = vmatprep.subr.bf16.mxu1 %v6993_v8 }
0x113c   :  { %4060 = vmatpush1.bf16.msra.mxu1 %v7000_v57 }
0x113d   :  { %4061 = vmatprep.subr.bf16.mxu1 %v7007_v5 }
0x1140   :  { %4062 = vmatpush1.bf16.msra.mxu1 %v7013_v6 }
0x1141   :  { %4063 = vmatprep.subr.bf16.mxu1 %v7019_v14 }
0x1144   :  { %4064 = vmatpush1.bf16.msra.mxu1 %v7025_v63 }
0x1145   :  { %4136 = vmatprep.subr.bf16.mxu1 %v7088_v21 }
0x11fa   :  { %v3842_v34 = vpop.f32.mrb[56].mxu1 }
0x11fb   :  { %v3844_v37 = vpop.f32.mrb[57].mxu1  ;;  %v3843_v53 = vadd.f32 %v3842_v34, %v7245_v25 }
0x11fc   :  { %v3845_v12 = vadd.f32 %v3844_v37, %v7237_v35  ;;  %v3846_v38 = vpop.f32.mrb[58].mxu1 }
0x11fd   :  { %v3847_v26 = vpop.f32.mrb[59].mxu1  ;;  %v4990_v52 = vmul.f32 -1.442695, %v3843_v53 }
0x11fe   :  { %5698 = vtanh.f32 %v3845_v12  ;;  %v4991_v37 = vmul.f32 -1.442695, %v3845_v12 }
0x1208   :  { %v5699_v8 = vpop.eup %5698 }
0x1209   :  { %3864 = vrot.lane.b32.xlu0 %v5699_v8, %s5836_s14 }
0x120a   :  { %v3927_v57 = vpop.f32.mrb[60].mxu1 }
0x120b   :  { %v3934_v5 = vadd.f32 %v3927_v57, %v7057_v13  ;;  %v3929_v6 = vpop.f32.mrb[61].mxu1 }
0x120c   :  { %v3935_v14 = vadd.f32 %v3929_v6, %v7060_v23  ;;  %v3931_v55 = vpop.f32.mrb[62].mxu1 }
0x120d   :  { %v3932_v63 = vpop.f32.mrb[63].mxu1  ;;  %v4993_v24 = vmul.f32 -1.442695, %v3934_v5 }
0x120e   :  { %5700 = vtanh.f32 %v3935_v14  ;;  %v4994_v38 = vmul.f32 -1.442695, %v3935_v14 }
0x120f   :  { %5702 = vpow2.f32 %v4990_v52 }
0x1210   :  { %5704 = vpow2.f32 %v4993_v24 }
0x1218   :  { %v5701_v46 = vpop.eup %5700 }
0x1219   :  { %3951 = vrot.lane.b32.xlu1 %v5701_v46, %s5836_s14  ;;  %v5703_v42 = vpop.eup %5702 }
0x121a   :  { %v3855_v15 = vadd.f32 1.0, %v5703_v42  ;;  %v5705_v62 = vpop.eup %5704 }
0x121b   :  { %v3942_v23 = vadd.f32 1.0, %v5705_v62 }
0x121c   :  { %5706 = vrcp.f32 %v3855_v15 }
0x121d   :  { %5708 = vrcp.f32 %v3942_v23 }
0x1226   :  { %v5707_v13 = vpop.eup %5706 }
0x1227   :  { %v5709_v1 = vpop.eup %5708  ;;  %v3862_v29 = vmul.f32 %v5707_v13, %v7350_v58 }
0x1228   :  { %v3949_v33 = vmul.f32 %v5709_v1, %v7355_v40 }
0x127b   :  { %v3865_v60 = vpop.permute.xlu0 %3864 }
0x127c   :  { %v3867_v59 = vmul.f32 %v5707_v13, %v3865_v60 }
0x127e   :  { %3869 = vrot.lane.b32.xlu0 %v3867_v59, %s5836_s14 }
0x128b   :  { %v3952_v47 = vpop.permute.xlu1 %3951 }
0x128c   :  { %v3954_v22 = vmul.f32 %v5709_v1, %v3952_v47 }
0x128e   :  { %3956 = vrot.lane.b32.xlu1 %v3954_v22, %s5836_s14 }
0x12f0   :  { %v3870_v20 = vpop.permute.xlu0 %3869 }
0x12f1   :  { %v7404_v4 = vadd.f32 %v3870_v20, %v3862_v29 }
0x12f3   :  { %5710 = vtanh.f32 %v7404_v4 }
0x12fd   :  { %v5711_v28 = vpop.eup %5710 }
0x12fe   :  { %3875 = vrot.lane.b32.xlu0 %v5711_v28, %s5836_s14 }
0x1300   :  { %v3957_v30 = vpop.permute.xlu1 %3956 }
0x1301   :  { %v7409_v48 = vadd.f32 %v3957_v30, %v3949_v33 }
0x1303   :  { %5712 = vtanh.f32 %v7409_v48 }
0x1304   :  { %5714 = vpow2.f32 %v4991_v37 }
0x1305   :  { %5716 = vpow2.f32 %v4994_v38 }
0x130d   :  { %v5713_v34 = vpop.eup %5712 }
0x130e   :  { %3962 = vrot.lane.b32.xlu1 %v5713_v34, %s5836_s14  ;;  %v5715_v58 = vpop.eup %5714 }
0x130f   :  { %v3856_v26 = vadd.f32 1.0, %v5715_v58  ;;  %v5717_v8 = vpop.eup %5716 }
0x1310   :  { %v3943_v40 = vadd.f32 1.0, %v5717_v8 }
0x1311   :  { %5718 = vrcp.f32 %v3856_v26 }
0x1312   :  { %5720 = vrcp.f32 %v3943_v40 }
0x131b   :  { %v5719_v57 = vpop.eup %5718 }
0x131c   :  { %v5721_v14 = vpop.eup %5720 }
0x1370   :  { %v3876_v5 = vpop.permute.xlu0 %3875 }
0x1371   :  { %v3878_v6 = vmul.f32 %v5719_v57, %v3876_v5 }
0x1373   :  { %v4539_v55 = vrot.slane %v3878_v6, 5  ;;  %v4554_v63 = vrot.slane %v3878_v6, 6  ;;  %3967 = vrot.lane.b32.xlu0 %v3878_v6, %s5836_s14 }
0x1375   :  { %v7415_v46 = vsel %vm4567_vm14, %v7366_v41, %v4539_v55  ;;  %v7418_v12 = vsel %vm4567_vm14, %v7368_v39, %v4554_v63 }
0x1380   :  { %v3963_v53 = vpop.permute.xlu1 %3962 }
0x1381   :  { %v3965_v52 = vmul.f32 %v5721_v14, %v3963_v53 }
0x1383   :  { %v4053_v42 = vpack.c.bf16 %v3965_v52, %v3965_v52 }
0x1385   :  { %4997 = vmatmul.mubr.msk.bf16.vlgmr.msra.gmra.mrb[64].mxu1 %vm2929_vm11, %v4053_v42  ;;  %v7521_v42 = vld [vmem:[%s7724_s16 + $0x10] ss:$8 sps:$4 sm:$0xff]  }
0x1386   :  { %4137 = vmatpush1.bf16.msra.mxu1 %v7093_v18  ;;  %4168 = vmatprep.mubr.bf16.mxu1 %v5831_v10 }
0x1387   :  { %4138 = vmatprep.subr.bf16.mxu1 %v7099_v49 }
0x138a   :  { %4139 = vmatpush1.bf16.msra.mxu1 %v7106_v50 }
0x138b   :  { %4140 = vmatprep.subr.bf16.mxu1 %v7113_v32  ;;  %v7442_v32 = vld [vmem:[%s7720_s15] ss:$8 sps:$4 sm:$0xff]  }
0x138e   :  { %4141 = vmatpush1.bf16.msra.mxu1 %v7120_v45  ;;  %v7449_v45 = vld [vmem:[%s7720_s15 + $0x14] ss:$8 sps:$4 sm:$0xff]  }
0x138f   :  { %4142 = vmatprep.subr.bf16.mxu1 %v7127_v36  ;;  %v7455_v36 = vld [vmem:[%s7720_s15 + $0x10] ss:$8 sps:$4 sm:$0xff]  }
0x1392   :  { %4143 = vmatpush1.bf16.msra.mxu1 %v7134_v51  ;;  %v7461_v51 = vld [vmem:[%s7720_s15 + $0x24] ss:$8 sps:$4 sm:$0xff]  }
0x1393   :  { %4144 = vmatprep.subr.bf16.mxu1 %v7141_v61  ;;  %v7467_v61 = vld [vmem:[%s7720_s15 + $0x20] ss:$8 sps:$4 sm:$0xff]  }
0x1396   :  { %4145 = vmatpush1.bf16.msra.mxu1 %v7148_v54  ;;  %v7473_v54 = vld [vmem:[%s7720_s15 + $0x34] ss:$8 sps:$4 sm:$0xff]  }
0x1397   :  { %4146 = vmatprep.subr.bf16.mxu1 %v7155_v2  ;;  %v7479_v2 = vld [vmem:[%s7720_s15 + $0x30] ss:$8 sps:$4 sm:$0xff]  }
0x139a   :  { %4147 = vmatpush1.bf16.msra.mxu1 %v7162_v43 }
0x139b   :  { %4148 = vmatprep.subr.bf16.mxu1 %v7169_v3 }
0x139e   :  { %4149 = vmatpush1.bf16.msra.mxu1 %v7176_v7 }
0x139f   :  { %4150 = vmatprep.subr.bf16.mxu1 %v7183_v11 }
0x13a2   :  { %4151 = vmatpush1.bf16.msra.mxu1 %v7193_v19 }
0x13a3   :  { %4385 = vmatprep.subr.bf16.mxu1 %v7382_v31 }
0x13e5   :  { %v3968_v18 = vpop.permute.xlu0 %3967 }
0x13e6   :  { %v3970_v49 = vsel %vm2929_vm11, %v3965_v52, %v3968_v18  ;;  %v7515_v52 = vld [vmem:[%s7724_s16 + $0x14] ss:$8 sps:$4 sm:$0xff]   ;;  %v7527_v18 = vld [vmem:[%s7724_s16 + $0x24] ss:$8 sps:$4 sm:$0xff]  }
0x13e7   :  { %v3971_v50 = vpack.c.bf16 %v3970_v49, %v3970_v49  ;;  %v7533_v49 = vld [vmem:[%s7724_s16 + $0x20] ss:$8 sps:$4 sm:$0xff]  }
0x13e9   :  { %4005 = vmatmul.mubr.bf16.vlgmr.msra.gmra.mrb[8].mxu0 %v3971_v50  ;;  %v7539_v50 = vld [vmem:[%s7724_s16 + $0x34] ss:$8 sps:$4 sm:$0xff]  }
0x13ea   :  { %4222 = vmatpush1.bf16.msra.mxu0 %v7442_v32  ;;  %4253 = vmatprep.mubr.bf16.mxu0 %v5831_v10 }
0x13eb   :  { %4223 = vmatprep.subr.bf16.mxu0 %v7449_v45 }
0x13ee   :  { %4224 = vmatpush1.bf16.msra.mxu0 %v7455_v36 }
0x13ef   :  { %4225 = vmatprep.subr.bf16.mxu0 %v7461_v51 }
0x13f2   :  { %4226 = vmatpush1.bf16.msra.mxu0 %v7467_v61 }
0x13f3   :  { %4227 = vmatprep.subr.bf16.mxu0 %v7473_v54 }
0x13f6   :  { %4228 = vmatpush1.bf16.msra.mxu0 %v7479_v2 }
0x13f7   :  { %4300 = vmatprep.subr.bf16.mxu0 %v7088_v21 }
0x1458   :  { %v4091_v43 = vpop.f32.mrb[64].mxu1 }
0x1459   :  { %v4098_v3 = vadd.f32 %v4091_v43, %v7063_v16  ;;  %v4093_v7 = vpop.f32.mrb[65].mxu1  ;;  %v7545_v43 = vld [vmem:[%s7724_s16 + $0x30] ss:$8 sps:$4 sm:$0xff]  }
0x145a   :  { %v4099_v11 = vadd.f32 %v4093_v7, %v7066_v17  ;;  %v4095_v19 = vpop.f32.mrb[66].mxu1  ;;  %v7557_v7 = vld [vmem:[%s7724_s16 + $0x40] ss:$8 sps:$4 sm:$0xff]  }
0x145b   :  { %v4096_v41 = vpop.f32.mrb[67].mxu1  ;;  %v4998_v31 = vmul.f32 -1.442695, %v4098_v3  ;;  %v7551_v3 = vld [vmem:[%s7724_s16 + $0x44] ss:$8 sps:$4 sm:$0xff]  }
0x145c   :  { %5722 = vtanh.f32 %v4099_v11  ;;  %v4999_v26 = vmul.f32 -1.442695, %v4099_v11  ;;  %v7563_v11 = vld [vmem:[%s7724_s16 + $0x54] ss:$8 sps:$4 sm:$0xff]   ;;  %v7569_v19 = vld [vmem:[%s7724_s16 + $0x50] ss:$8 sps:$4 sm:$0xff]  }
0x145d   :  { %5724 = vpow2.f32 %v4998_v31  ;;  %v7575_v41 = vld [vmem:[%s7724_s16 + $0x64] ss:$8 sps:$4 sm:$0xff]   ;;  %v7587_v31 = vld [vmem:[%s7724_s16 + $0x74] ss:$8 sps:$4 sm:$0xff]  }
0x1466   :  { %v5723_v39 = vpop.eup %5722 }
0x1467   :  { %4115 = vrot.lane.b32.xlu0 %v5723_v39, %s5836_s14  ;;  %v5725_v16 = vpop.eup %5724  ;;  %v7581_v39 = vld [vmem:[%s7724_s16 + $0x60] ss:$8 sps:$4 sm:$0xff]  }
0x1468   :  { %v4106_v17 = vadd.f32 1.0, %v5725_v16 }
0x14bc   :  { %v4006_v24 = vpop.f32.mrb[8].mxu0 }
0x14bd   :  { %v4008_v15 = vpop.f32.mrb[9].mxu0  ;;  %v4007_v47 = vadd.f32 %v4006_v24, %v7245_v25  ;;  %v7593_v24 = vld [vmem:[%s7724_s16 + $0x70] ss:$8 sps:$4 sm:$0xff]  }
0x14be   :  { %v7487_v62 = vadd.f32 %v4008_v15, %v7237_v35  ;;  %v4010_v21 = vpop.f32.mrb[10].mxu0 }
0x14bf   :  { %v4011_v13 = vpop.f32.mrb[11].mxu0  ;;  %v4995_v22 = vmul.f32 -1.442695, %v4007_v47 }
0x14c0   :  { %5726 = vtanh.f32 %v7487_v62  ;;  %v4996_v15 = vmul.f32 -1.442695, %v7487_v62 }
0x14c1   :  { %5728 = vrcp.f32 %v4106_v17 }
0x14c2   :  { %5730 = vpow2.f32 %v4995_v22 }
0x14ca   :  { %v5727_v60 = vpop.eup %5726 }
0x14cb   :  { %4028 = vrot.lane.b32.xlu1 %v5727_v60, %s5836_s14  ;;  %v5729_v59 = vpop.eup %5728 }
0x14cc   :  { %v5731_v29 = vpop.eup %5730  ;;  %v4113_v34 = vmul.f32 %v5729_v59, %v7409_v48 }
0x14cd   :  { %v4019_v20 = vadd.f32 1.0, %v5731_v29 }
0x14cf   :  { %5732 = vrcp.f32 %v4019_v20 }
0x14d9   :  { %v4116_v23 = vpop.permute.xlu0 %4115  ;;  %v5733_v28 = vpop.eup %5732 }
0x14da   :  { %v4118_v1 = vmul.f32 %v5729_v59, %v4116_v23  ;;  %v4026_v8 = vmul.f32 %v5733_v28, %v7404_v4  ;;  %v7508_v4 = vld [vmem:[%s7724_s16] ss:$8 sps:$4 sm:$0xff]  }
0x14dc   :  { %4120 = vrot.lane.b32.xlu0 %v4118_v1, %s5836_s14 }
0x153d   :  { %v4029_v33 = vpop.permute.xlu1 %4028 }
0x153e   :  { %v4031_v30 = vmul.f32 %v5733_v28, %v4029_v33 }
0x1540   :  { %4033 = vrot.lane.b32.xlu1 %v4031_v30, %s5836_s14 }
0x154e   :  { %v4121_v37 = vpop.permute.xlu0 %4120 }
0x154f   :  { %v7495_v58 = vadd.f32 %v4121_v37, %v4113_v34 }
0x1551   :  { %5734 = vtanh.f32 %v7495_v58 }
0x1552   :  { %5736 = vpow2.f32 %v4999_v26 }
0x155b   :  { %v5735_v38 = vpop.eup %5734 }
0x155c   :  { %4126 = vrot.lane.b32.xlu0 %v5735_v38, %s5836_s14  ;;  %v5737_v6 = vpop.eup %5736 }
0x155d   :  { %v4107_v48 = vadd.f32 1.0, %v5737_v6 }
0x15b2   :  { %v4034_v57 = vpop.permute.xlu1 %4033 }
0x15b3   :  { %v7500_v5 = vadd.f32 %v4034_v57, %v4026_v8 }
0x15b5   :  { %5738 = vtanh.f32 %v7500_v5 }
0x15b6   :  { %5740 = vrcp.f32 %v4107_v48 }
0x15b7   :  { %5742 = vpow2.f32 %v4996_v15 }
0x15bf   :  { %v5739_v40 = vpop.eup %5738 }
0x15c0   :  { %4039 = vrot.lane.b32.xlu1 %v5739_v40, %s5836_s14  ;;  %v5741_v55 = vpop.eup %5740 }
0x15c1   :  { %v5743_v21 = vpop.eup %5742 }
0x15c2   :  { %v4020_v13 = vadd.f32 1.0, %v5743_v21 }
0x15c4   :  { %5744 = vrcp.f32 %v4020_v13 }
0x15ce   :  { %v4127_v63 = vpop.permute.xlu0 %4126  ;;  %v5745_v16 = vpop.eup %5744 }
0x15cf   :  { %v4129_v14 = vmul.f32 %v5741_v55, %v4127_v63 }
0x15d1   :  { %v4217_v53 = vpack.c.bf16 %v4129_v14, %v4129_v14 }
0x15d3   :  { %5002 = vmatmul.mubr.msk.bf16.vlgmr.msra.gmra.mrb[12].mxu0 %vm2929_vm11, %v4217_v53 }
0x15d4   :  { %4301 = vmatpush1.bf16.msra.mxu0 %v7508_v4  ;;  %4332 = vmatprep.mubr.bf16.mxu0 %v5831_v10 }
0x15d5   :  { %4302 = vmatprep.subr.bf16.mxu0 %v7515_v52 }
0x15d8   :  { %4303 = vmatpush1.bf16.msra.mxu0 %v7521_v42 }
0x15d9   :  { %4304 = vmatprep.subr.bf16.mxu0 %v7527_v18 }
0x15dc   :  { %4305 = vmatpush1.bf16.msra.mxu0 %v7533_v49 }
0x15dd   :  { %4306 = vmatprep.subr.bf16.mxu0 %v7539_v50 }
0x15e0   :  { %4307 = vmatpush1.bf16.msra.mxu0 %v7545_v43 }
0x15e1   :  { %4308 = vmatprep.subr.bf16.mxu0 %v7551_v3 }
0x15e4   :  { %4309 = vmatpush1.bf16.msra.mxu0 %v7557_v7 }
0x15e5   :  { %4310 = vmatprep.subr.bf16.mxu0 %v7563_v11 }
0x15e8   :  { %4311 = vmatpush1.bf16.msra.mxu0 %v7569_v19 }
0x15e9   :  { %4312 = vmatprep.subr.bf16.mxu0 %v7575_v41 }
0x15ec   :  { %4313 = vmatpush1.bf16.msra.mxu0 %v7581_v39 }
0x15ed   :  { %4314 = vmatprep.subr.bf16.mxu0 %v7587_v31 }
0x15f0   :  { %4315 = vmatpush1.bf16.msra.mxu0 %v7593_v24 }
0x15f1   :  { %5140 = vmatprep.subr.bf16.mxu0 %v5834_v44 }
0x1632   :  { %v4040_v60 = vpop.permute.xlu1 %4039 }
0x1633   :  { %v4042_v17 = vmul.f32 %v5745_v16, %v4040_v60 }
0x1635   :  { %v4541_v59 = vrot.slane %v4042_v17, 4  ;;  %v4556_v23 = vrot.slane %v4042_v17, 5  ;;  %4131 = vrot.lane.b32.xlu1 %v4042_v17, %s5836_s14 }
0x1637   :  { %v7600_v1 = vsel %vm4569_vm15, %v7415_v46, %v4541_v59  ;;  %v7603_v47 = vsel %vm4569_vm15, %v7418_v12, %v4556_v23 }
0x16a6   :  { %v4255_v22 = vpop.f32.mrb[12].mxu0 }
0x16a7   :  { %v4262_v62 = vadd.f32 %v4255_v22, %v7069_v9  ;;  %v4257_v29 = vpop.f32.mrb[13].mxu0  ;;  %v4132_v20 = vpop.permute.xlu1 %4131 }
0x16a8   :  { %v4263_v28 = vadd.f32 %v4257_v29, %v7072_v56  ;;  %v4134_v33 = vsel %vm2929_vm11, %v4129_v14, %v4132_v20  ;;  %v4259_v30 = vpop.f32.mrb[14].mxu0  ;;  %v5829_v56 = vld [vmem:[%s7724_s16 + $0x4] ss:$8 sps:$4 sm:$0xff]  }
0x16a9   :  { %v4135_v34 = vpack.c.bf16 %v4134_v33, %v4134_v33  ;;  %v4260_v37 = vpop.f32.mrb[15].mxu0  ;;  %v5003_v46 = vmul.f32 -1.442695, %v4262_v62 }
0x16aa   :  { %5746 = vtanh.f32 %v4263_v28  ;;  %v5004_v15 = vmul.f32 -1.442695, %v4263_v28 }
0x16ab   :  { %4169 = vmatmul.mubr.bf16.vlgmr.msra.gmra.mrb[68].mxu1 %v4135_v34  ;;  %5748 = vpow2.f32 %v5003_v46 }
0x16ac   :  { %4386 = vmatpush1.bf16.msra.mxu1 %v7442_v32  ;;  %4417 = vmatprep.mubr.bf16.mxu1 %v5831_v10 }
0x16ad   :  { %4387 = vmatprep.subr.bf16.mxu1 %v7449_v45 }
0x16b0   :  { %4388 = vmatpush1.bf16.msra.mxu1 %v7455_v36 }
0x16b1   :  { %4389 = vmatprep.subr.bf16.mxu1 %v7461_v51 }
0x16b4   :  { %v5747_v9 = vpop.eup %5746  ;;  %4390 = vmatpush1.bf16.msra.mxu1 %v7467_v61 }
0x16b5   :  { %4279 = vrot.lane.b32.xlu1 %v5747_v9, %s5836_s14  ;;  %4391 = vmatprep.subr.bf16.mxu1 %v7473_v54  ;;  %v5749_v12 = vpop.eup %5748 }
0x16b6   :  { %v4270_v32 = vadd.f32 1.0, %v5749_v12 }
0x16b8   :  { %4392 = vmatpush1.bf16.msra.mxu1 %v7479_v2  ;;  %5750 = vrcp.f32 %v4270_v32 }
0x16b9   :  { %4464 = vmatprep.subr.bf16.mxu1 %v5829_v56 }
0x16c2   :  { %v5751_v45 = vpop.eup %5750 }
0x16c3   :  { %v4277_v57 = vmul.f32 %v5751_v45, %v7495_v58 }
0x1727   :  { %v4280_v36 = vpop.permute.xlu1 %4279 }
0x1728   :  { %v4282_v51 = vmul.f32 %v5751_v45, %v4280_v36 }
0x172a   :  { %4284 = vrot.lane.b32.xlu1 %v4282_v51, %s5836_s14 }
0x177e   :  { %v4170_v61 = vpop.f32.mrb[68].mxu1 }
0x177f   :  { %v4172_v38 = vpop.f32.mrb[69].mxu1  ;;  %v4171_v55 = vadd.f32 %v4170_v61, %v7245_v25 }
0x1780   :  { %v4173_v54 = vadd.f32 %v4172_v38, %v7237_v35  ;;  %v4174_v2 = vpop.f32.mrb[70].mxu1 }
0x1781   :  { %v4175_v26 = vpop.f32.mrb[71].mxu1  ;;  %v5000_v63 = vmul.f32 -1.442695, %v4171_v55 }
0x1782   :  { %5752 = vtanh.f32 %v4173_v54 }
0x178c   :  { %v5753_v8 = vpop.eup %5752 }
0x178d   :  { %4192 = vrot.lane.b32.xlu0 %v5753_v8, %s5836_s14 }
0x179c   :  { %v4285_v6 = vpop.permute.xlu1 %4284 }
0x179d   :  { %v7624_v40 = vadd.f32 %v4285_v6, %v4277_v57 }
0x179f   :  { %5754 = vtanh.f32 %v7624_v40 }
0x17a0   :  { %5756 = vpow2.f32 %v5000_v63 }
0x17a9   :  { %v5755_v48 = vpop.eup %5754 }
0x17aa   :  { %4290 = vrot.lane.b32.xlu1 %v5755_v48, %s5836_s14  ;;  %v5757_v14 = vpop.eup %5756 }
0x17ab   :  { %v4183_v53 = vadd.f32 1.0, %v5757_v14 }
0x17ad   :  { %5758 = vrcp.f32 %v4183_v53 }
0x17ae   :  { %5760 = vpow2.f32 %v5004_v15 }
0x17b7   :  { %v5759_v21 = vpop.eup %5758 }
0x17b8   :  { %v5761_v58 = vpop.eup %5760 }
0x17b9   :  { %v4271_v60 = vadd.f32 1.0, %v5761_v58 }
0x17bb   :  { %5762 = vrcp.f32 %v4271_v60 }
0x17c5   :  { %v5763_v17 = vpop.eup %5762 }
0x17ff   :  { %v4193_v13 = vpop.permute.xlu0 %4192 }
0x1800   :  { %v4195_v16 = vmul.f32 %v5759_v21, %v4193_v13 }
0x1802   :  { %4197 = vrot.lane.b32.xlu0 %v4195_v16, %s5836_s14 }
0x181c   :  { %v4291_v59 = vpop.permute.xlu1 %4290 }
0x181d   :  { %v4293_v23 = vmul.f32 %v5763_v17, %v4291_v59 }
0x181f   :  { %v4381_v22 = vpack.c.bf16 %v4293_v23, %v4293_v23 }
0x1821   :  { %5007 = vmatmul.mubr.msk.bf16.vlgmr.msra.gmra.mrb[72].mxu1 %vm2929_vm11, %v4381_v22 }
0x1822   :  { %4465 = vmatpush1.bf16.msra.mxu1 %v7508_v4  ;;  %4496 = vmatprep.mubr.bf16.mxu1 %v5831_v10  ;;  %v4190_v10 = vmul.f32 %v5759_v21, %v7500_v5 }
0x1823   :  { %4466 = vmatprep.subr.bf16.mxu1 %v7515_v52 }
0x1826   :  { %4467 = vmatpush1.bf16.msra.mxu1 %v7521_v42 }
0x1827   :  { %4468 = vmatprep.subr.bf16.mxu1 %v7527_v18  ;;  %v5001_v18 = vmul.f32 -1.442695, %v4173_v54 }
0x182a   :  { %4469 = vmatpush1.bf16.msra.mxu1 %v7533_v49 }
0x182b   :  { %4470 = vmatprep.subr.bf16.mxu1 %v7539_v50 }
0x182e   :  { %4471 = vmatpush1.bf16.msra.mxu1 %v7545_v43 }
0x182f   :  { %4472 = vmatprep.subr.bf16.mxu1 %v7551_v3 }
0x1832   :  { %4473 = vmatpush1.bf16.msra.mxu1 %v7557_v7 }
0x1833   :  { %4474 = vmatprep.subr.bf16.mxu1 %v7563_v11 }
0x1836   :  { %4475 = vmatpush1.bf16.msra.mxu1 %v7569_v19 }
0x1837   :  { %4476 = vmatprep.subr.bf16.mxu1 %v7575_v41 }
0x183a   :  { %4477 = vmatpush1.bf16.msra.mxu1 %v7581_v39 }
0x183b   :  { %4478 = vmatprep.subr.bf16.mxu1 %v7587_v31 }
0x183e   :  { %4479 = vmatpush1.bf16.msra.mxu1 %v7593_v24 }
0x1874   :  { %v4198_v4 = vpop.permute.xlu0 %4197 }
0x1875   :  { %v7648_v52 = vadd.f32 %v4198_v4, %v4190_v10 }
0x1877   :  { %5764 = vtanh.f32 %v7648_v52 }
0x1878   :  { %5766 = vpow2.f32 %v5001_v18 }
0x1881   :  { %v5765_v42 = vpop.eup %5764 }
0x1882   :  { %4203 = vrot.lane.b32.xlu0 %v5765_v42, %s5836_s14  ;;  %v5767_v49 = vpop.eup %5766 }
0x1883   :  { %v4184_v50 = vadd.f32 1.0, %v5767_v49 }
0x1885   :  { %5768 = vrcp.f32 %v4184_v50 }
0x188f   :  { %v5769_v43 = vpop.eup %5768 }
0x18f4   :  { %v4419_v3 = vpop.f32.mrb[72].mxu1  ;;  %v4204_v7 = vpop.permute.xlu0 %4203 }
0x18f5   :  { %v4426_v11 = vadd.f32 %v4419_v3, %v7075_v27  ;;  %v4421_v19 = vpop.f32.mrb[73].mxu1  ;;  %v4206_v5 = vmul.f32 %v5769_v43, %v4204_v7 }
0x18f6   :  { %v7654_v41 = vadd.f32 %v4421_v19, %v7078_v0  ;;  %v4423_v39 = vpop.f32.mrb[74].mxu1 }
0x18f7   :  { %v4543_v31 = vrot.slane %v4206_v5, 3  ;;  %v4558_v24 = vrot.slane %v4206_v5, 4  ;;  %v4424_v62 = vpop.f32.mrb[75].mxu1  ;;  %4295 = vrot.lane.b32.xlu0 %v4206_v5, %s5836_s14  ;;  %v5008_v27 = vmul.f32 -1.442695, %v4426_v11 }
0x18f8   :  { %5770 = vtanh.f32 %v7654_v41  ;;  %v5009_v10 = vmul.f32 -1.442695, %v7654_v41 }
0x18f9   :  { %v4572_v29 = vsel %vm4571_vm0, %v7600_v1, %v4543_v31  ;;  %v4580_v20 = vsel %vm4571_vm0, %v7603_v47, %v4558_v24  ;;  %5772 = vpow2.f32 %v5008_v27 }
0x1902   :  { %v5771_v28 = vpop.eup %5770 }
0x1903   :  { %4443 = vrot.lane.b32.xlu0 %v5771_v28, %s5836_s14  ;;  %v5773_v0 = vpop.eup %5772 }
0x1904   :  { %v4434_v33 = vadd.f32 1.0, %v5773_v0  ;;  %v5595_v0 = vld [vmem:[%s7726_s18 + $0x8] sm:$0xff]  }
0x1906   :  { %5774 = vrcp.f32 %v4434_v33 }
0x1910   :  { %v5775_v9 = vpop.eup %5774 }
0x1911   :  { %v4441_v47 = vmul.f32 %v5775_v9, %v7624_v40 }
0x1969   :  { %v4296_v30 = vpop.permute.xlu0 %4295 }
0x196a   :  { %v4298_v34 = vsel %vm2929_vm11, %v4293_v23, %v4296_v30 }
0x196b   :  { %v4299_v37 = vpack.c.bf16 %v4298_v34, %v4298_v34  ;;  %v5596_v34 = vld [vmem:[%s7726_s18 + $0x10] sm:$0xff]  }
0x196d   :  { %4333 = vmatmul.mubr.bf16.vlgmr.msra.gmra.mrb[16].mxu0 %v4299_v37  ;;  %v5597_v37 = vld [vmem:[%s7726_s18 + $0x18] sm:$0xff]  }
0x196e   :  { %5148 = vmatprep.mubr.msk.bf16.mxu0 %vm5835_vm10, %v5834_v44 }
0x1975   :  { %v4444_v1 = vpop.permute.xlu0 %4443 }
0x1976   :  { %v4446_v56 = vmul.f32 %v5775_v9, %v4444_v1 }
0x1978   :  { %4448 = vrot.lane.b32.xlu0 %v4446_v56, %s5836_s14 }
0x19ea   :  { %v4449_v46 = vpop.permute.xlu0 %4448 }
0x19eb   :  { %v4451_v12 = vadd.f32 %v4449_v46, %v4441_v47 }
0x19ed   :  { %5776 = vtanh.f32 %v4451_v12 }
0x19f7   :  { %v5777_v32 = vpop.eup %5776 }
0x19f8   :  { %4454 = vrot.lane.b32.xlu0 %v5777_v32, %s5836_s14 }
0x1a40   :  { %v4334_v45 = vpop.f32.mrb[16].mxu0 }
0x1a41   :  { %v4336_v36 = vpop.f32.mrb[17].mxu0  ;;  %v4335_v2 = vadd.f32 %v4334_v45, %v7245_v25 }
0x1a42   :  { %v4337_v51 = vadd.f32 %v4336_v36, %v7237_v35  ;;  %v4338_v61 = vpop.f32.mrb[18].mxu0 }
0x1a43   :  { %v4339_v38 = vpop.f32.mrb[19].mxu0  ;;  %v5005_v26 = vmul.f32 -1.442695, %v4335_v2 }
0x1a44   :  { %5778 = vtanh.f32 %v4337_v51  ;;  %v5006_v15 = vmul.f32 -1.442695, %v4337_v51 }
0x1a45   :  { %5780 = vpow2.f32 %v5005_v26 }
0x1a4e   :  { %v5779_v54 = vpop.eup %5778 }
0x1a4f   :  { %4356 = vrot.lane.b32.xlu1 %v5779_v54, %s5836_s14  ;;  %v5781_v8 = vpop.eup %5780 }
0x1a50   :  { %v4347_v57 = vadd.f32 1.0, %v5781_v8 }
0x1a52   :  { %5782 = vrcp.f32 %v4347_v57 }
0x1a5c   :  { %v5783_v6 = vpop.eup %5782 }
0x1a5d   :  { %v4354_v55 = vmul.f32 %v5783_v6, %v7648_v52 }
0x1a6a   :  { %v4455_v42 = vpop.permute.xlu0 %4454 }
0x1ac1   :  { %v4357_v40 = vpop.permute.xlu1 %4356 }
0x1ac2   :  { %v4359_v48 = vmul.f32 %v5783_v6, %v4357_v40 }
0x1ac4   :  { %4361 = vrot.lane.b32.xlu1 %v4359_v48, %s5836_s14 }
0x1b36   :  { %v4362_v63 = vpop.permute.xlu1 %4361 }
0x1b37   :  { %v4364_v14 = vadd.f32 %v4362_v63, %v4354_v55 }
0x1b39   :  { %5784 = vtanh.f32 %v4364_v14 }
0x1b3a   :  { %5786 = vpow2.f32 %v5006_v15 }
0x1b43   :  { %v5785_v53 = vpop.eup %5784 }
0x1b44   :  { %4367 = vrot.lane.b32.xlu1 %v5785_v53, %s5836_s14  ;;  %v5787_v21 = vpop.eup %5786 }
0x1b45   :  { %v4348_v13 = vadd.f32 1.0, %v5787_v21 }
0x1b47   :  { %5788 = vrcp.f32 %v4348_v13 }
0x1b48   :  { %5790 = vpow2.f32 %v5009_v10 }
0x1b51   :  { %v5789_v16 = vpop.eup %5788 }
0x1b52   :  { %v5791_v4 = vpop.eup %5790 }
0x1b53   :  { %v4435_v52 = vadd.f32 1.0, %v5791_v4 }
0x1b55   :  { %5792 = vrcp.f32 %v4435_v52 }
0x1b5f   :  { %v5793_v18 = vpop.eup %5792 }
0x1b60   :  { %v4457_v49 = vmul.f32 %v5793_v18, %v4455_v42 }
0x1bb6   :  { %v4368_v58 = vpop.permute.xlu1 %4367 }
0x1bb7   :  { %v4370_v60 = vmul.f32 %v5789_v16, %v4368_v58 }
0x1bb9   :  { %v4545_v17 = vrot.slane %v4370_v60, 2  ;;  %v4560_v59 = vrot.slane %v4370_v60, 3  ;;  %4459 = vrot.lane.b32.xlu1 %v4370_v60, %s5836_s14 }
0x1bbb   :  { %v4573_v23 = vsel %vm490_vm2, %v4572_v29, %v4545_v17  ;;  %v4581_v22 = vsel %vm490_vm2, %v4580_v20, %v4560_v59 }
0x1c2b   :  { %v4460_v50 = vpop.permute.xlu1 %4459 }
0x1c2c   :  { %v4462_v43 = vsel %vm2929_vm11, %v4457_v49, %v4460_v50 }
0x1c2d   :  { %v4463_v3 = vpack.c.bf16 %v4462_v43, %v4462_v43 }
0x1c2f   :  { %4497 = vmatmul.mubr.bf16.vlgmr.msra.gmra.mrb[76].mxu1 %v4463_v3 }
0x1d02   :  { %v4498_v7 = vpop.f32.mrb[76].mxu1 }
0x1d03   :  { %v4500_v11 = vpop.f32.mrb[77].mxu1  ;;  %v4499_v31 = vadd.f32 %v4498_v7, %v7245_v25 }
0x1d04   :  { %v4501_v19 = vadd.f32 %v4500_v11, %v7237_v35  ;;  %v4502_v5 = vpop.f32.mrb[78].mxu1  ;;  %v5594_v35 = vld [vmem:[%s7726_s18] sm:$0xff]  }
0x1d05   :  { %v4503_v39 = vpop.f32.mrb[79].mxu1  ;;  %v5010_v24 = vmul.f32 -1.442695, %v4499_v31  ;;  %5141 = vmatpush3.bf16.msra.mxu0 %v5594_v35 }
0x1d06   :  { %5794 = vtanh.f32 %v4501_v19  ;;  %5142 = vmatprep.subr.bf16.mxu0 %v5834_v44  ;;  %v5011_v1 = vmul.f32 -1.442695, %v4501_v19 }
0x1d07   :  { %5796 = vpow2.f32 %v5010_v24 }
0x1d09   :  { %5143 = vmatpush3.bf16.msra.mxu0 %v5595_v0 }
0x1d0a   :  { %5144 = vmatprep.subr.bf16.mxu0 %v5834_v44 }
0x1d0d   :  { %5145 = vmatpush3.bf16.msra.mxu0 %v5596_v34 }
0x1d0e   :  { %5146 = vmatprep.subr.bf16.mxu0 %v5834_v44  ;;  %v5012_v44 = vld [vmem:[%s7727_s19] ss:$0 sm:$0xff] }
0x1d10   :  { %v5795_v41 = vpop.eup %5794 }
0x1d11   :  { %4520 = vrot.lane.b32.xlu0 %v5795_v41, %s5836_s14  ;;  %v5797_v62 = vpop.eup %5796  ;;  %5147 = vmatpush3.bf16.msra.mxu0 %v5597_v37 }
0x1d12   :  { %v4511_v29 = vadd.f32 1.0, %v5797_v62 }
0x1d14   :  { %5798 = vrcp.f32 %v4511_v29 }
0x1d1e   :  { %v5799_v20 = vpop.eup %5798 }
0x1d1f   :  { %v4518_v25 = vmul.f32 %v5799_v20, %v4364_v14 }
0x1d83   :  { %v4521_v28 = vpop.permute.xlu0 %4520 }
0x1d84   :  { %v4523_v27 = vmul.f32 %v5799_v20, %v4521_v28 }
0x1d86   :  { %4525 = vrot.lane.b32.xlu1 %v4523_v27, %s5836_s14 }
0x1df8   :  { %v4526_v33 = vpop.permute.xlu1 %4525 }
0x1df9   :  { %v4528_v30 = vadd.f32 %v4526_v33, %v4518_v25 }
0x1dfb   :  { %5800 = vtanh.f32 %v4528_v30 }
0x1dfc   :  { %5802 = vpow2.f32 %v5011_v1 }
0x1e05   :  { %v5801_v9 = vpop.eup %5800 }
0x1e06   :  { %4531 = vrot.lane.b32.xlu0 %v5801_v9, %s5836_s14  ;;  %v5803_v56 = vpop.eup %5802 }
0x1e07   :  { %v4512_v47 = vadd.f32 1.0, %v5803_v56 }
0x1e09   :  { %5804 = vrcp.f32 %v4512_v47 }
0x1e13   :  { %v5805_v46 = vpop.eup %5804 }
0x1e78   :  { %v4532_v12 = vpop.permute.xlu0 %4531 }
0x1e79   :  { %v4534_v32 = vmul.f32 %v5805_v46, %v4532_v12 }
0x1e7b   :  { %v4548_v45 = vrot.slane %v4534_v32, 1  ;;  %v4562_v36 = vrot.slane %v4534_v32, 2 }
0x1e7d   :  { %v4575_v51 = vsel %vm4574_vm1, %v4573_v23, %v4548_v45  ;;  %v4582_v61 = vsel %vm4574_vm1, %v4581_v22, %v4562_v36 }
0x1e7e   :  { %v4583_v38 = vpack.c.bf16 %v4582_v61, %v4575_v51 }
0x1e80   :  { %5149 = vmatmul.mubr.msk.bf16.vlgmr.msra.gmra.mrb[20].mxu0 %vm2929_vm11, %v4583_v38 }
0x1f53   :  { %v4651_v54 = vpop.f32.mrb[20].mxu0 }
0x1f54   :  { %v4652_v2 = vadd.f32 %v5012_v44, %v4651_v54  ;;  %v5150_v26 = vpop.f32.mrb[21].mxu0 }
0x1f55   :  { %v4654_v8 = vpop.f32.mrb[22].mxu0 }
0x1f56   :  { %4658 = vst [vmem:[%s7728_s20] sm:$0xff] %v4652_v2  ;;  %v4655_v57 = vadd.f32 %v5012_v44, %v4654_v8  ;;  %v5151_v6 = vpop.f32.mrb[23].mxu0 }
0x1f58   :  { %4659 = vst [vmem:[%s7728_s20 + $0x8] sm:$0xff] %v4655_v57 }

</bundles_post_ra>
